<compile_context>
chip_gen: v5e
topology: v5e:2x2
jax: 0.10.0
libtpu: 0.0.40
codegen_flags: <defaults>
</compile_context>

<pallas_src>
import jax
import jax.numpy as jnp
from jax.experimental import pallas as pl
from jax.experimental.pallas import tpu as pltpu

F_IN = 8             # SAGEConv in_channels
NODE_NUM = 16        # node_num
HIDDEN = 1000        # nn.Linear hidden width (as in the module)
ROBUSTNESS_LEN = 24  # robustness_length

SRC_PAD = 16         # source-node axis (sublane-aligned, == NODE_NUM)
N_PAD = 128          # target-node / emb dim padded to one lane width
H_PAD = 1024         # hidden padded to a multiple of 128
R_PAD = 32           # robustness dim padded to 32 (full-array block is legal)
N_CHUNK = 512        # w2 output-column / w3 input-row chunk
NUM_CHUNKS = H_PAD // N_CHUNK


def connectivity_kernel(xt_ref, adjt_ref, xb_ref, wsage_ref, bsage_ref,
                        w1_ref, b1_ref, w2_ref, b2_ref, w3_ref, b3_ref,
                        emb_ref, out_ref, h1_ref, acc_ref):
    k = pl.program_id(0)

    # ---- prologue (first grid step): aggregation + fused SAGE + MLP layer 1 ----
    @pl.when(k == 0)
    def _prologue():
        adjt = adjt_ref[...]          # [16, Np]      adjt[j, i] = #edges j -> i
        xb = xb_ref[...]              # [F, 16, Np]   xb[f, j, i] = x[j, f]

        deg = jnp.sum(adjt, axis=0, keepdims=True)          # [1, Np] in-degree
        inv_deg = pl.reciprocal(jnp.maximum(deg, 1.0), approx=True)

        # mean aggregation: elementwise multiply + sublane sum (no relayout)
        mean_agg_t = jnp.sum(adjt[None, :, :] * xb, axis=1) * inv_deg      # [F, Np]

        # max aggregation: masked sublane reduce over the 16 source slots
        masked = jnp.where(adjt[None, :, :] > 0, xb, jnp.float32(-1e30))   # [F,16,Np]
        max_agg_t = jnp.where(deg > 0, jnp.max(masked, axis=1), 0.0)       # [F, Np]

        # fused SAGE linears: [2, 3F] @ [3F, Np] (row0 = mean branch, row1 = max)
        sage_in = jnp.concatenate([mean_agg_t, max_agg_t, xt_ref[...]], axis=0)
        act = jnp.maximum(
            jnp.dot(wsage_ref[...], sage_in, preferred_element_type=jnp.float32)
            + bsage_ref[...], 0.0)                           # [2, Np]
        emb = act[0:1, :] + act[1:2, :]                      # [1, Np]
        emb_ref[...] = emb

        # MLP layer 1: only the real NODE_NUM lanes feed w1 (w1 is [16, Hp])
        h1 = jnp.maximum(
            jnp.dot(emb[:, :NODE_NUM].astype(jnp.bfloat16), w1_ref[...],
                    preferred_element_type=jnp.float32) + b1_ref[...], 0.0)  # [1, Hp]
        h1_ref[...] = h1.astype(jnp.bfloat16)
        acc_ref[...] = jnp.zeros_like(acc_ref)

    # ---- layers 2+3, chunked over w2 output columns (weight DMA overlaps compute) ----
    h2_chunk = jnp.maximum(
        jnp.dot(h1_ref[...], w2_ref[...], preferred_element_type=jnp.float32)
        + b2_ref[...], 0.0)                                  # [1, N_CHUNK]
    acc_ref[...] += jnp.dot(h2_chunk.astype(jnp.bfloat16), w3_ref[...],
                            preferred_element_type=jnp.float32)              # [1, Rp]

    # ---- epilogue (last grid step): layer-3 bias + relu ----
    @pl.when(k == pl.num_programs(0) - 1)
    def _epilogue():
        out_ref[...] = jnp.maximum(acc_ref[...] + b3_ref[...], 0.0)


def connectivity_branch(x, edge_index, params):
    """x: [N, 8] f32, edge_index: [2, E] int32 (row0=source, row1=target)."""
    n = x.shape[0]
    # TODO(synk): sparse scatter-based message passing is densified in this glue;
    # the dense aggregation itself runs inside the Pallas kernel.
    adjt = jnp.zeros((SRC_PAD, N_PAD), jnp.float32).at[
        edge_index[0], edge_index[1]].add(1.0)              # [16, 128] edge counts
    xt = jnp.zeros((F_IN, N_PAD), jnp.float32).at[:, :n].set(x.T)       # root term
    xb16 = jnp.zeros((F_IN, SRC_PAD), jnp.float32).at[:, :n].set(x.T)
    x_bcast = jnp.broadcast_to(xb16[:, :, None], (F_IN, SRC_PAD, N_PAD))  # [8,16,128]

    # Fused SAGE weights: row0 = [wlm | 0 | wrm], row1 = [0 | wlx | wrx]
    zf = jnp.zeros((1, F_IN), jnp.float32)
    w_sage = jnp.concatenate([
        jnp.concatenate([params["wlm"], zf, params["wrm"]], axis=1),
        jnp.concatenate([zf, params["wlx"], params["wrx"]], axis=1)], axis=0)  # [2, 24]
    b_sage = jnp.concatenate([params["blm"], params["blx"]], axis=0)           # [2, 1]

    def pad2(a, rows, cols, dtype=jnp.float32):
        return jnp.pad(a, ((0, rows - a.shape[0]), (0, cols - a.shape[1]))).astype(dtype)

    w1 = pad2(params["w1"], NODE_NUM, H_PAD, jnp.bfloat16)  # [16, 1024] bf16 (no row pad)
    b1 = pad2(params["b1"], 1, H_PAD)                       # [1, 1024]   f32
    w2 = pad2(params["w2"], H_PAD, H_PAD, jnp.bfloat16)     # [1024, 1024] bf16
    b2 = pad2(params["b2"], 1, H_PAD)                       # [1, 1024]   f32
    w3 = pad2(params["w3"], H_PAD, R_PAD, jnp.bfloat16)     # [1024, 32]  bf16
    b3 = pad2(params["b3"], 1, R_PAD)                       # [1, 32]     f32

    emb, out = pl.pallas_call(
        connectivity_kernel,
        out_shape=(jax.ShapeDtypeStruct((1, N_PAD), jnp.float32),
                   jax.ShapeDtypeStruct((1, R_PAD), jnp.float32)),
        grid_spec=pltpu.PrefetchScalarGridSpec(
            num_scalar_prefetch=0,
            grid=(NUM_CHUNKS,),
            in_specs=[
                pl.BlockSpec((F_IN, N_PAD), lambda k: (0, 0)),            # xt (root term)
                pl.BlockSpec((SRC_PAD, N_PAD), lambda k: (0, 0)),         # adjt [16,128]
                pl.BlockSpec((F_IN, SRC_PAD, N_PAD), lambda k: (0, 0, 0)),  # x_bcast
                pl.BlockSpec((2, 3 * F_IN), lambda k: (0, 0)),            # fused SAGE W
                pl.BlockSpec((2, 1), lambda k: (0, 0)),                   # fused SAGE b
                pl.BlockSpec((NODE_NUM, H_PAD), lambda k: (0, 0)),        # w1 (bf16)
                pl.BlockSpec((1, H_PAD), lambda k: (0, 0)),               # b1
                pl.BlockSpec((H_PAD, N_CHUNK), lambda k: (0, k)),         # w2 col chunk
                pl.BlockSpec((1, N_CHUNK), lambda k: (0, k)),             # b2 chunk
                pl.BlockSpec((N_CHUNK, R_PAD), lambda k: (k, 0)),         # w3 row chunk
                pl.BlockSpec((1, R_PAD), lambda k: (0, 0)),               # b3
            ],
            out_specs=[pl.BlockSpec((1, N_PAD), lambda k: (0, 0)),        # emb
                       pl.BlockSpec((1, R_PAD), lambda k: (0, 0))],       # out
            scratch_shapes=[pltpu.VMEM((1, H_PAD), jnp.bfloat16),   # h1 activation
                            pltpu.VMEM((1, R_PAD), jnp.float32)],   # layer-3 accumulator
        ),
        compiler_params=pltpu.CompilerParams(
            dimension_semantics=("arbitrary",)),
    )(xt, adjt, x_bcast, w_sage, b_sage, w1, b1, w2, b2, w3, b3)

    return emb[0, :n], out[0, :ROBUSTNESS_LEN]


def reference(x, edge_index, params):
    """Pure-JAX f32 reference of the PyTorch forward (for a sanity check)."""
    n = x.shape[0]
    adj = jnp.zeros((n, n), jnp.float32).at[edge_index[1], edge_index[0]].add(1.0)
    deg = adj.sum(axis=1)
    mean_agg = (adj @ x) / jnp.maximum(deg, 1.0)[:, None]
    masked = jnp.where(adj[:, :, None] > 0, x[None, :, :], -1e30)
    max_agg = jnp.max(masked, axis=1)
    max_agg = jnp.where(deg[:, None] > 0, max_agg, 0.0)
    x_mean = jax.nn.relu(mean_agg @ params["wlm"].T + params["blm"][0] + x @ params["wrm"].T)
    x_max = jax.nn.relu(max_agg @ params["wlx"].T + params["blx"][0] + x @ params["wrx"].T)
    emb = (x_mean + x_max).reshape(-1)
    h = jax.nn.relu(emb @ params["w1"] + params["b1"][0])
    h = jax.nn.relu(h @ params["w2"] + params["b2"][0])
    h = jax.nn.relu(h @ params["w3"] + params["b3"][0])
    return emb, h


def make_params(key):
    ks = jax.random.split(key, 13)

    def init(k, shape, fan_in):
        return (jax.random.normal(k, shape) / jnp.sqrt(fan_in)).astype(jnp.float32)

    return {
        # SAGEConv(8, 1) mean: lin_l weight [1,8]+bias, lin_r weight [1,8] no bias
        "wlm": init(ks[0], (1, F_IN), F_IN),
        "blm": init(ks[1], (1, 1), F_IN),
        "wrm": init(ks[2], (1, F_IN), F_IN),
        # SAGEConv(8, 1, aggr='max')
        "wlx": init(ks[3], (1, F_IN), F_IN),
        "blx": init(ks[4], (1, 1), F_IN),
        "wrx": init(ks[5], (1, F_IN), F_IN),
        # Linear(node_num, 1000)  (stored transposed: [in, out])
        "w1": init(ks[6], (NODE_NUM, HIDDEN), NODE_NUM),
        "b1": init(ks[7], (1, HIDDEN), NODE_NUM),
        # Linear(1000, 1000)
        "w2": init(ks[8], (HIDDEN, HIDDEN), HIDDEN),
        "b2": init(ks[9], (1, HIDDEN), HIDDEN),
        # Linear(1000, robustness_length)
        "w3": init(ks[10], (HIDDEN, ROBUSTNESS_LEN), HIDDEN),
        "b3": init(ks[11], (1, ROBUSTNESS_LEN), HIDDEN),
    }


if __name__ == "__main__":
    key = jax.random.PRNGKey(0)
    kx, kp = jax.random.split(key)

    # Node features X: [node_num, 8]
    X = jax.random.normal(kx, (NODE_NUM, F_IN), dtype=jnp.float32)

    # Deterministic edge_index: bidirectional ring + a few chords  -> [2, 40]
    n = NODE_NUM
    src = list(range(n)) + [(i + 1) % n for i in range(n)] + list(range(8))
    dst = [(i + 1) % n for i in range(n)] + list(range(n)) + [(i + 5) % n for i in range(8)]
    edge_index = jnp.array([src, dst], dtype=jnp.int32)

    params = make_params(kp)

    emb, out = connectivity_branch(X, edge_index, params)
    jax.block_until_ready(out)

    emb_ref, out_ref = reference(X, edge_index, params)
    assert emb.shape == (NODE_NUM,) and out.shape == (ROBUSTNESS_LEN,)
    assert jnp.allclose(emb, emb_ref, rtol=5e-2, atol=5e-2)
    assert jnp.allclose(out, out_ref, rtol=5e-2, atol=5e-2)

    print("KERNEL_OK")
</pallas_src>

<mosaic_0001>
module attributes {stable_mosaic.version = 11 : i64} {
  func.func @connectivity_kernel(%arg0: i32, %arg1: memref<8x128xf32, #tpu.memory_space<vmem>>, %arg2: memref<16x128xf32, #tpu.memory_space<vmem>>, %arg3: memref<8x16x128xf32, #tpu.memory_space<vmem>>, %arg4: memref<2x24xf32, #tpu.memory_space<vmem>>, %arg5: memref<2x1xf32, #tpu.memory_space<vmem>>, %arg6: memref<16x1024xbf16, #tpu.memory_space<vmem>>, %arg7: memref<1x1024xf32, #tpu.memory_space<vmem>>, %arg8: memref<1024x512xbf16, #tpu.memory_space<vmem>>, %arg9: memref<1x512xf32, #tpu.memory_space<vmem>>, %arg10: memref<512x32xbf16, #tpu.memory_space<vmem>>, %arg11: memref<1x32xf32, #tpu.memory_space<vmem>>, %arg12: memref<1x128xf32, #tpu.memory_space<vmem>>, %arg13: memref<1x32xf32, #tpu.memory_space<vmem>>, %arg14: memref<1x1024xbf16, #tpu.memory_space<vmem>>, %arg15: memref<1x32xf32, #tpu.memory_space<vmem>>) attributes {dimension_semantics = [#tpu.dimension_semantics<arbitrary>], iteration_bounds = array<i64: 2>, scalar_prefetch = 0 : i64, scratch_operands = 2 : i64, tpu.core_type = #tpu.core_type<tc>, window_params = [{pipeline_mode = #tpu.pipeline_mode<synchronous>, transform_indices = @transform_0, window_bounds = array<i64: 8, 128>}, {pipeline_mode = #tpu.pipeline_mode<synchronous>, transform_indices = @transform_1, window_bounds = array<i64: 16, 128>}, {pipeline_mode = #tpu.pipeline_mode<synchronous>, transform_indices = @transform_2, window_bounds = array<i64: 8, 16, 128>}, {pipeline_mode = #tpu.pipeline_mode<synchronous>, transform_indices = @transform_3, window_bounds = array<i64: 2, 24>}, {pipeline_mode = #tpu.pipeline_mode<synchronous>, transform_indices = @transform_4, window_bounds = array<i64: 2, 1>}, {pipeline_mode = #tpu.pipeline_mode<synchronous>, transform_indices = @transform_5, window_bounds = array<i64: 16, 1024>}, {pipeline_mode = #tpu.pipeline_mode<synchronous>, transform_indices = @transform_6, window_bounds = array<i64: 1, 1024>}, {transform_indices = @transform_7, window_bounds = array<i64: 1024, 512>}, {transform_indices = @transform_8, window_bounds = array<i64: 1, 512>}, {transform_indices = @transform_9, window_bounds = array<i64: 512, 32>}, {pipeline_mode = #tpu.pipeline_mode<synchronous>, transform_indices = @transform_10, window_bounds = array<i64: 1, 32>}, {pipeline_mode = #tpu.pipeline_mode<synchronous>, transform_indices = @transform_11, window_bounds = array<i64: 1, 128>}, {pipeline_mode = #tpu.pipeline_mode<synchronous>, transform_indices = @transform_12, window_bounds = array<i64: 1, 32>}]} {
    %c0_i32 = arith.constant 0 : i32
    %0 = arith.cmpi eq, %arg0, %c0_i32 : i32
    %1 = arith.extui %0 : i1 to i32
    %c0_i32_0 = arith.constant 0 : i32
    %2 = arith.cmpi ne, %1, %c0_i32_0 : i32
    scf.if %2 {
      %c0_15 = arith.constant 0 : index
      %c0_16 = arith.constant 0 : index
      %19 = vector.load %arg2[%c0_15, %c0_16] : memref<16x128xf32, #tpu.memory_space<vmem>>, vector<16x128xf32>
      %c0_17 = arith.constant 0 : index
      %c0_18 = arith.constant 0 : index
      %c0_19 = arith.constant 0 : index
      %20 = vector.load %arg3[%c0_17, %c0_18, %c0_19] : memref<8x16x128xf32, #tpu.memory_space<vmem>>, vector<8x16x128xf32>
      %cst_20 = arith.constant dense<0.000000e+00> : vector<128xf32>
      %21 = vector.multi_reduction <add>, %19, %cst_20 [0] : vector<16x128xf32> to vector<128xf32>
      %22 = vector.shape_cast %21 : vector<128xf32> to vector<1x128xf32>
      %cst_21 = arith.constant 1.000000e+00 : f32
      %23 = vector.broadcast %cst_21 : f32 to vector<1x128xf32>
      %24 = arith.maximumf %22, %23 : vector<1x128xf32>
      %25 = tpu.reciprocal %24 {approx = true} : vector<1x128xf32> -> vector<1x128xf32>
      %26 = vector.shape_cast %19 : vector<16x128xf32> to vector<1x16x128xf32>
      %27 = vector.broadcast %26 : vector<1x16x128xf32> to vector<8x16x128xf32>
      %28 = arith.mulf %27, %20 : vector<8x16x128xf32>
      %cst_22 = arith.constant dense<0.000000e+00> : vector<8x128xf32>
      %29 = vector.multi_reduction <add>, %28, %cst_22 [1] : vector<8x16x128xf32> to vector<8x128xf32>
      %30 = vector.broadcast %25 : vector<1x128xf32> to vector<8x128xf32>
      %31 = arith.mulf %29, %30 : vector<8x128xf32>
      %32 = vector.shape_cast %19 : vector<16x128xf32> to vector<1x16x128xf32>
      %cst_23 = arith.constant 0.000000e+00 : f32
      %33 = vector.broadcast %cst_23 : f32 to vector<1x16x128xf32>
      %34 = arith.cmpf ogt, %32, %33 : vector<1x16x128xf32>
      %cst_24 = arith.constant -1.000000e+30 : f32
      %35 = vector.shape_cast %34 : vector<1x16x128xi1> to vector<1x16x128xi1>
      %36 = vector.broadcast %35 : vector<1x16x128xi1> to vector<8x16x128xi1>
      %37 = vector.broadcast %cst_24 : f32 to vector<8x16x128xf32>
      %38 = arith.select %36, %20, %37 : vector<8x16x128xi1>, vector<8x16x128xf32>
      %cst_25 = arith.constant 0.000000e+00 : f32
      %39 = vector.broadcast %cst_25 : f32 to vector<1x128xf32>
      %40 = arith.cmpf ogt, %22, %39 : vector<1x128xf32>
      %cst_26 = arith.constant dense<0xFF800000> : vector<8x128xf32>
      %41 = vector.multi_reduction <maximumf>, %38, %cst_26 [1] : vector<8x16x128xf32> to vector<8x128xf32>
      %cst_27 = arith.constant 0.000000e+00 : f32
      %42 = vector.shape_cast %40 : vector<1x128xi1> to vector<1x128xi1>
      %43 = vector.broadcast %42 : vector<1x128xi1> to vector<8x128xi1>
      %44 = vector.broadcast %cst_27 : f32 to vector<8x128xf32>
      %45 = arith.select %43, %41, %44 : vector<8x128xi1>, vector<8x128xf32>
      %c0_28 = arith.constant 0 : index
      %c0_29 = arith.constant 0 : index
      %46 = vector.load %arg1[%c0_28, %c0_29] : memref<8x128xf32, #tpu.memory_space<vmem>>, vector<8x128xf32>
      %47 = tpu.concatenate %31, %45, %46 in 0 : vector<8x128xf32>, vector<8x128xf32>, vector<8x128xf32> -> vector<24x128xf32>
      %c0_30 = arith.constant 0 : index
      %c0_31 = arith.constant 0 : index
      %48 = vector.load %arg4[%c0_30, %c0_31] : memref<2x24xf32, #tpu.memory_space<vmem>>, vector<2x24xf32>
      %cst_32 = arith.constant dense<0.000000e+00> : vector<2x128xf32>
      %49 = tpu.matmul %48, %47, %cst_32 {dimension_numbers = #tpu.dot_dimension_numbers<[1], [0], [0], [1], [0, 0, 1, 1], [], []>} : vector<2x24xf32>, vector<24x128xf32>, vector<2x128xf32> -> vector<2x128xf32>
      %c0_33 = arith.constant 0 : index
      %c0_34 = arith.constant 0 : index
      %50 = vector.load %arg5[%c0_33, %c0_34] : memref<2x1xf32, #tpu.memory_space<vmem>>, vector<2x1xf32>
      %51 = vector.broadcast %50 : vector<2x1xf32> to vector<2x128xf32>
      %52 = arith.addf %49, %51 : vector<2x128xf32>
      %cst_35 = arith.constant 0.000000e+00 : f32
      %53 = vector.broadcast %cst_35 : f32 to vector<2x128xf32>
      %54 = arith.maximumf %52, %53 : vector<2x128xf32>
      %55 = vector.extract_strided_slice %54 {offsets = [0, 0], sizes = [1, 128], strides = [1, 1]} : vector<2x128xf32> to vector<1x128xf32>
      %56 = vector.extract_strided_slice %54 {offsets = [1, 0], sizes = [1, 128], strides = [1, 1]} : vector<2x128xf32> to vector<1x128xf32>
      %57 = arith.addf %55, %56 : vector<1x128xf32>
      %c0_36 = arith.constant 0 : index
      %c0_37 = arith.constant 0 : index
      %58 = vector.load %arg12[%c0_36, %c0_37] : memref<1x128xf32, #tpu.memory_space<vmem>>, vector<1x128xf32>
      tpu.vector_store %arg12[%c0_36, %c0_37], %57 {strides = array<i32>} : memref<1x128xf32, #tpu.memory_space<vmem>>, vector<1x128xf32>,
      %59 = vector.extract_strided_slice %57 {offsets = [0, 0], sizes = [1, 16], strides = [1, 1]} : vector<1x128xf32> to vector<1x16xf32>
      %60 = arith.truncf %59 : vector<1x16xf32> to vector<1x16xbf16>
      %c0_38 = arith.constant 0 : index
      %c0_39 = arith.constant 0 : index
      %61 = vector.load %arg6[%c0_38, %c0_39] : memref<16x1024xbf16, #tpu.memory_space<vmem>>, vector<16x1024xbf16>
      %cst_40 = arith.constant dense<0.000000e+00> : vector<1x1024xf32>
      %62 = tpu.matmul %60, %61, %cst_40 {dimension_numbers = #tpu.dot_dimension_numbers<[1], [0], [0], [1], [0, 0, 1, 1], [], []>} : vector<1x16xbf16>, vector<16x1024xbf16>, vector<1x1024xf32> -> vector<1x1024xf32>
      %c0_41 = arith.constant 0 : index
      %c0_42 = arith.constant 0 : index
      %63 = vector.load %arg7[%c0_41, %c0_42] : memref<1x1024xf32, #tpu.memory_space<vmem>>, vector<1x1024xf32>
      %64 = arith.addf %62, %63 : vector<1x1024xf32>
      %cst_43 = arith.constant 0.000000e+00 : f32
      %65 = vector.broadcast %cst_43 : f32 to vector<1x1024xf32>
      %66 = arith.maximumf %64, %65 : vector<1x1024xf32>
      %67 = arith.truncf %66 : vector<1x1024xf32> to vector<1x1024xbf16>
      %c0_44 = arith.constant 0 : index
      %c0_45 = arith.constant 0 : index
      %68 = vector.load %arg14[%c0_44, %c0_45] : memref<1x1024xbf16, #tpu.memory_space<vmem>>, vector<1x1024xbf16>
      tpu.vector_store %arg14[%c0_44, %c0_45], %67 {strides = array<i32>} : memref<1x1024xbf16, #tpu.memory_space<vmem>>, vector<1x1024xbf16>,
      %cst_46 = arith.constant 0.000000e+00 : f32
      %69 = vector.broadcast %cst_46 : f32 to vector<1x32xf32>
      %c0_47 = arith.constant 0 : index
      %c0_48 = arith.constant 0 : index
      %70 = vector.load %arg15[%c0_47, %c0_48] : memref<1x32xf32, #tpu.memory_space<vmem>>, vector<1x32xf32>
      tpu.vector_store %arg15[%c0_47, %c0_48], %69 {strides = array<i32>} : memref<1x32xf32, #tpu.memory_space<vmem>>, vector<1x32xf32>,
    } else {
    }
    %c0 = arith.constant 0 : index
    %c0_1 = arith.constant 0 : index
    %3 = vector.load %arg14[%c0, %c0_1] : memref<1x1024xbf16, #tpu.memory_space<vmem>>, vector<1x1024xbf16>
    %c0_2 = arith.constant 0 : index
    %c0_3 = arith.constant 0 : index
    %4 = vector.load %arg8[%c0_2, %c0_3] : memref<1024x512xbf16, #tpu.memory_space<vmem>>, vector<1024x512xbf16>
    %cst = arith.constant dense<0.000000e+00> : vector<1x512xf32>
    %5 = tpu.matmul %3, %4, %cst {dimension_numbers = #tpu.dot_dimension_numbers<[1], [0], [0], [1], [0, 0, 1, 1], [], []>} : vector<1x1024xbf16>, vector<1024x512xbf16>, vector<1x512xf32> -> vector<1x512xf32>
    %c0_4 = arith.constant 0 : index
    %c0_5 = arith.constant 0 : index
    %6 = vector.load %arg9[%c0_4, %c0_5] : memref<1x512xf32, #tpu.memory_space<vmem>>, vector<1x512xf32>
    %7 = arith.addf %5, %6 : vector<1x512xf32>
    %cst_6 = arith.constant 0.000000e+00 : f32
    %8 = vector.broadcast %cst_6 : f32 to vector<1x512xf32>
    %9 = arith.maximumf %7, %8 : vector<1x512xf32>
    %c0_7 = arith.constant 0 : index
    %c0_8 = arith.constant 0 : index
    %10 = vector.load %arg15[%c0_7, %c0_8] : memref<1x32xf32, #tpu.memory_space<vmem>>, vector<1x32xf32>
    %11 = arith.truncf %9 : vector<1x512xf32> to vector<1x512xbf16>
    %c0_9 = arith.constant 0 : index
    %c0_10 = arith.constant 0 : index
    %12 = vector.load %arg10[%c0_9, %c0_10] : memref<512x32xbf16, #tpu.memory_space<vmem>>, vector<512x32xbf16>
    %cst_11 = arith.constant dense<0.000000e+00> : vector<1x32xf32>
    %13 = tpu.matmul %11, %12, %cst_11 {dimension_numbers = #tpu.dot_dimension_numbers<[1], [0], [0], [1], [0, 0, 1, 1], [], []>} : vector<1x512xbf16>, vector<512x32xbf16>, vector<1x32xf32> -> vector<1x32xf32>
    %14 = arith.addf %10, %13 : vector<1x32xf32>
    %c0_12 = arith.constant 0 : index
    %c0_13 = arith.constant 0 : index
    %15 = vector.load %arg15[%c0_12, %c0_13] : memref<1x32xf32, #tpu.memory_space<vmem>>, vector<1x32xf32>
    tpu.vector_store %arg15[%c0_12, %c0_13], %14 {strides = array<i32>} : memref<1x32xf32, #tpu.memory_space<vmem>>, vector<1x32xf32>,
    %c1_i32 = arith.constant 1 : i32
    %16 = arith.cmpi eq, %arg0, %c1_i32 : i32
    %17 = arith.extui %16 : i1 to i32
    %c0_i32_14 = arith.constant 0 : i32
    %18 = arith.cmpi ne, %17, %c0_i32_14 : i32
    scf.if %18 {
      %c0_15 = arith.constant 0 : index
      %c0_16 = arith.constant 0 : index
      %19 = vector.load %arg15[%c0_15, %c0_16] : memref<1x32xf32, #tpu.memory_space<vmem>>, vector<1x32xf32>
      %c0_17 = arith.constant 0 : index
      %c0_18 = arith.constant 0 : index
      %20 = vector.load %arg11[%c0_17, %c0_18] : memref<1x32xf32, #tpu.memory_space<vmem>>, vector<1x32xf32>
      %21 = arith.addf %19, %20 : vector<1x32xf32>
      %cst_19 = arith.constant 0.000000e+00 : f32
      %22 = vector.broadcast %cst_19 : f32 to vector<1x32xf32>
      %23 = arith.maximumf %21, %22 : vector<1x32xf32>
      %c0_20 = arith.constant 0 : index
      %c0_21 = arith.constant 0 : index
      %24 = vector.load %arg13[%c0_20, %c0_21] : memref<1x32xf32, #tpu.memory_space<vmem>>, vector<1x32xf32>
      tpu.vector_store %arg13[%c0_20, %c0_21], %23 {strides = array<i32>} : memref<1x32xf32, #tpu.memory_space<vmem>>, vector<1x32xf32>,
    } else {
    }
    return
  }
  func.func @transform_0(%arg0: i32) -> (i32, i32) {
    %c0_i32 = arith.constant 0 : i32
    %c0_i32_0 = arith.constant 0 : i32
    %c0_i32_1 = arith.constant 0 : i32
    return %c0_i32, %c0_i32_0 : i32, i32
  }
  func.func @transform_1(%arg0: i32) -> (i32, i32) {
    %c0_i32 = arith.constant 0 : i32
    %c0_i32_0 = arith.constant 0 : i32
    %c0_i32_1 = arith.constant 0 : i32
    return %c0_i32, %c0_i32_0 : i32, i32
  }
  func.func @transform_2(%arg0: i32) -> (i32, i32, i32) {
    %c0_i32 = arith.constant 0 : i32
    %c0_i32_0 = arith.constant 0 : i32
    %c0_i32_1 = arith.constant 0 : i32
    %c0_i32_2 = arith.constant 0 : i32
    return %c0_i32, %c0_i32_0, %c0_i32_1 : i32, i32, i32
  }
  func.func @transform_3(%arg0: i32) -> (i32, i32) {
    %c0_i32 = arith.constant 0 : i32
    %c0_i32_0 = arith.constant 0 : i32
    %c0_i32_1 = arith.constant 0 : i32
    return %c0_i32, %c0_i32_0 : i32, i32
  }
  func.func @transform_4(%arg0: i32) -> (i32, i32) {
    %c0_i32 = arith.constant 0 : i32
    %c0_i32_0 = arith.constant 0 : i32
    %c0_i32_1 = arith.constant 0 : i32
    return %c0_i32, %c0_i32_0 : i32, i32
  }
  func.func @transform_5(%arg0: i32) -> (i32, i32) {
    %c0_i32 = arith.constant 0 : i32
    %c0_i32_0 = arith.constant 0 : i32
    %c0_i32_1 = arith.constant 0 : i32
    return %c0_i32, %c0_i32_0 : i32, i32
  }
  func.func @transform_6(%arg0: i32) -> (i32, i32) {
    %c0_i32 = arith.constant 0 : i32
    %c0_i32_0 = arith.constant 0 : i32
    %c0_i32_1 = arith.constant 0 : i32
    return %c0_i32, %c0_i32_0 : i32, i32
  }
  func.func @transform_7(%arg0: i32) -> (i32, i32) {
    %c0_i32 = arith.constant 0 : i32
    %c0_i32_0 = arith.constant 0 : i32
    return %c0_i32, %arg0 : i32, i32
  }
  func.func @transform_8(%arg0: i32) -> (i32, i32) {
    %c0_i32 = arith.constant 0 : i32
    %c0_i32_0 = arith.constant 0 : i32
    return %c0_i32, %arg0 : i32, i32
  }
  func.func @transform_9(%arg0: i32) -> (i32, i32) {
    %c0_i32 = arith.constant 0 : i32
    %c0_i32_0 = arith.constant 0 : i32
    return %arg0, %c0_i32 : i32, i32
  }
  func.func @transform_10(%arg0: i32) -> (i32, i32) {
    %c0_i32 = arith.constant 0 : i32
    %c0_i32_0 = arith.constant 0 : i32
    %c0_i32_1 = arith.constant 0 : i32
    return %c0_i32, %c0_i32_0 : i32, i32
  }
  func.func @transform_11(%arg0: i32) -> (i32, i32) {
    %c0_i32 = arith.constant 0 : i32
    %c0_i32_0 = arith.constant 0 : i32
    %c0_i32_1 = arith.constant 0 : i32
    return %c0_i32, %c0_i32_0 : i32, i32
  }
  func.func @transform_12(%arg0: i32) -> (i32, i32) {
    %c0_i32 = arith.constant 0 : i32
    %c0_i32_0 = arith.constant 0 : i32
    %c0_i32_1 = arith.constant 0 : i32
    return %c0_i32, %c0_i32_0 : i32, i32
  }
}

</mosaic_0001>

<bundles_post_ra>
// kernel: tpu_custom_call.1
= control target key start
LH: loop header
LB: loop body
LE: loop exit
PB: predicated region body
PF: predicated region fallthrough
CT: control target
= control target key end

     0   :  { %s6783_s0 = inlined_call_operand.hbm [shape: f32[8,128], index: 0, kind: input, shape index: {}]   ;;  %s6784_s1 = inlined_call_operand.hbm [shape: f32[16,128], index: 1, kind: input, shape index: {}]   ;;  %s6785_s2 = inlined_call_operand.hbm [shape: f32[8,16,128], index: 2, kind: input, shape index: {}]   ;;  %s6786_s3 = inlined_call_operand.hbm [shape: f32[2,24], index: 3, kind: input, shape index: {}]   ;;  %s6787_s4 = inlined_call_operand.vmem [shape: f32[2,1], index: 4, kind: input, shape index: {}]   ;;  %s6788_s5 = inlined_call_operand.hbm [shape: bf16[16,1024], index: 5, kind: input, shape index: {}]   ;;  %s6789_s6 = inlined_call_operand.hbm [shape: f32[1,1024], index: 6, kind: input, shape index: {}]   ;;  %s6790_s7 = inlined_call_operand.hbm [shape: bf16[1024,1024], index: 7, kind: input, shape index: {}]   ;;  %s6791_s8 = inlined_call_operand.hbm [shape: f32[1,1024], index: 8, kind: input, shape index: {}]   ;;  %s6792_s9 = inlined_call_operand.vmem [shape: bf16[1024,32], index: 9, kind: input, shape index: {}]   ;;  %s6793_s10 = inlined_call_operand.hbm [shape: f32[1,32], index: 10, kind: input, shape index: {}]   ;;  %s6794_s11 = inlined_call_operand.hbm [shape: f32[1,128], index: 11, kind: output, shape index: {0}]   ;;  %s6795_s12 = inlined_call_operand.hbm [shape: f32[1,32], index: 12, kind: output, shape index: {1}]  }
   0x1   :  { %6801 = sst [smem:[#allocation31_spill]] %s6783_s0 }
   0x2   :  { %6802 = sst [smem:[#allocation32_spill]] %s6784_s1 }
   0x3   :  { %6803 = sst [smem:[#allocation33_spill]] %s6785_s2 }
   0x4   :  { %6804 = sst [smem:[#allocation34_spill]] %s6786_s3 }
   0x5   :  { %6805 = sst [smem:[#allocation35_spill]] %s6788_s5 }
   0x6   :  { %6806 = sst [smem:[#allocation36_spill]] %s6790_s7 }
   0x7   :  { %6807 = sst [smem:[#allocation37_spill]] %s6795_s12 }
   0x8   :  { %18 = vsyncpa [#allocation5], 0 }
   0x9   :  { %19 = vsyncpa [#allocation8], 0 }
   0xa   :  { %20 = vsyncpa [#allocation11], 0 }
   0xb   :  { %21 = vsyncpa [#allocation14], 0 }
   0xc   :  { %22 = vsyncpa [#allocation6], 0 }
   0xd   :  { %23 = vsyncpa [#allocation20], 0  ;;  %s5755_s21 = smov 0   ;;  %s5757_s22 = smov 0  }
   0xe   :  { %s5759_s23 = smov 0   ;;  %s5761_s24 = smov 0  }
   0xf LB: > { %s6808_s0 = sld [smem:[#allocation31_spill]]  ;;  %s5779_s28 = sadd.s32 4294967295, %s5671_s24   ;;  %s5671_s24 = sphi %s5761_s24, %s6844_s24   ;;  %s5667_s23 = sphi %s5759_s23, %s6848_s23   ;;  %s5663_s22 = sphi %s5757_s22, %s6847_s22   ;;  %s5659_s21 = sphi %s5755_s21, %s6846_s21  }
  0x10   : > { %p3610_p0 = scmp.ge.s32.totalorder %s5671_s24, 1  ;;  %p197_p1 = scmp.eq.s32.totalorder %s5779_s28, 0 }
  0x11   : > { %p322_p2 = scmp.lt.s32.totalorder %s5671_s24, 3  ;;  %p3611_p3 = scmp.ne.s32.totalorder %s5779_s28, 0 }
  0x12   : > { %s5673_s30 = smov [#allocation4]   ;;  %s6810_s1 = sld [smem:[#allocation32_spill]] }
  0x13   : > { %p5785_p4 = pnand %p3610_p0, %p322_p2  ;;  %s336_s13 = sshll.u32 %s5673_s30, 4  ;;  %s337_s13 = int_to_ptr.vmem [resolvable:$true] %s336_s13 }
  0x14   : > { %s5674_s18 = smov [#allocation7]   ;;  %s5675_s20 = smov 128  }
  0x15   : > { %s334_s27 = sshll.u32 %s6808_s0, 4  ;;  %p5175_p5 = pneg %p5785_p4  ;;  %s335_s27 = int_to_ptr.hbm [resolvable:$true] %s334_s27 }
  0x16   : > { %s347_s19 = sshll.u32 %s5674_s18, 4  ;;  %s5676_s25 = smov 8   ;;  %s348_s19 = int_to_ptr.vmem [resolvable:$true] %s347_s19 }
  0x17   : > { %p5796_p6 = pnand %p5175_p5, %p197_p1  ;;  %s6812_s2 = sld [smem:[#allocation33_spill]] }
  0x18   : > { %s345_s16 = sshll.u32 %s6810_s1, 4  ;;  %s5677_s15 = smov [#allocation9]   ;;  %s346_s16 = int_to_ptr.hbm [resolvable:$true] %s345_s16 }
  0x19   : > { %5178 = dma.hbm_to_vmem [thread:$0]  (!%p5796_p6), %s335_s27, 128, %s337_s13, [#allocation5]  }
  0x1a   : > { %5181 = dma.hbm_to_vmem [thread:$0]  (!%p5796_p6), %s346_s16, 256, %s348_s19, [#allocation8], %s5675_s20, %s5675_s20, %s5676_s25  }
  0x1b   : > { %s361_s18 = sshll.u32 %s5677_s15, 4  ;;  %s6813_s3 = sld [smem:[#allocation34_spill]]  ;;  %s362_s18 = int_to_ptr.vmem [resolvable:$true] %s361_s18 }
  0x1c   : > { %s5678_s16 = smov [#allocation10]   ;;  %s5815_s26 = sadd.s32 1, %s5671_s24  }
  0x1d   : > { %s359_s14 = sshll.u32 %s6812_s2, 4  ;;  %s376_s19 = sshll.u32 %s5678_s16, 4  ;;  %s360_s14 = int_to_ptr.hbm [resolvable:$true] %s359_s14  ;;  %s377_s19 = int_to_ptr.vmem [resolvable:$true] %s376_s19 }
  0x1e   : > { %5184 = dma.hbm_to_vmem [thread:$0]  (!%p5796_p6), %s360_s14, 2048, %s362_s18, [#allocation8], %s5675_s20, %s5675_s20, %s5676_s25  }
  0x1f   : > { %6814 = sst [smem:[#allocation29_spill]] %s5815_s26  ;;  %s183_s30 = sadd.s32 1, %s5667_s23 }
  0x20   : > { %s180_s15 = ssub.s32 %s5671_s24, %s5815_s26  ;;  %p190_p7 = scmp.ne.s32.totalorder %s5667_s23, %s5663_s22 }
  0x21   : > { %s374_s0 = sshll.u32 %s6813_s3, 4  ;;  %p181_p8 = scmp.eq.s32.totalorder %s180_s15, 0  ;;  %s375_s0 = int_to_ptr.hbm [resolvable:$true] %s374_s0 }
  0x22   : > { %5187 = dma.hbm_to_vmem [thread:$0]  (!%p5796_p6), %s375_s0, 32, %s377_s19, [#allocation11]  }
  0x23   : > { %p191_p9 = scmp.eq.s32.totalorder %s5671_s24, 0  ;;  %p196_p10 = scmp.ne.s32.totalorder %s5663_s22, %s5659_s21 }
  0x24   : > { %s5826_s20 = scalar_select %p181_p8, %s5667_s23, %s183_s30  }
  0x25   : > { %p5828_p11 = por %p191_p9, %p190_p7  ;;  %p5834_p12 = por %p197_p1, %p196_p10 }
  0x26   : > { %6815 = sst [smem:[#allocation30_spill]] %s5826_s20  ;;  %p5211_p13 = scmp.lt.s32.totalorder %s5671_s24, 2 }
  0x27   : > { %s428_s0 = sand.u32 1, %s5671_s24   ;;  %s6796_s18 = sand.u32 1, %s5667_s23  }
  0x28   : > { %s3619_s27 = sshll.u32 %s6796_s18, 11  ;;  %s4838_s13 = sshll.u32 %s5671_s24, 4 }
  0x29   : > { %s6818_s7 = sld [smem:[#allocation36_spill]]  ;;  %s432_s15 = scalar_lea.vmem [#allocation15], %s3619_s27 }
  0x2a   : > { %s440_s1 = sshll.u32 %s432_s15, 4  ;;  %p5849_p0 = pnand %p5211_p13, %p5828_p11  ;;  %s441_s1 = int_to_ptr.vmem [resolvable:$true] %s440_s1 }
  0x2b   : > { %s6820_s5 = sld [smem:[#allocation35_spill]]  ;;  %s5856_s26 = scalar_lea.sflag [#allocation5], %s428_s0 }
  0x2c   : > { %p5407_p5 = pneg %p5849_p0 }
  0x2f   : > { %s437_s19 = scalar_lea.hbm %s6818_s7, %s4838_s13  ;;  %s5410_s3 = scalar_lea.hbm %s6818_s7, 4096 }
  0x30   : > { %s438_s30 = sshll.u32 %s437_s19, 4  ;;  %s439_s30 = int_to_ptr.hbm [resolvable:$true] %s438_s30 }
  0x31   : > { %s388_s18 = sshll.u32 %s6820_s5, 4  ;;  %s5403_s13 = sshra.s32 %s439_s30, 4  ;;  %s389_s18 = int_to_ptr.hbm [resolvable:$true] %s388_s18  ;;  %s5404_s13 = int_to_ptr.hbm [resolvable:$true] %s5403_s13 }
  0x32   : > { %s5405_s27 = scalar_lea.hbm %s5404_s13, 2048  ;;  %p5411_p9 = scmp.lt.s32.totalorder %s5404_s13, %s6818_s7 }
  0x33   : > { %p5406_p2 = scmp.ne.s32.totalorder %s5404_s13, %s5405_s27  ;;  %p5412_p10 = scmp.lt.s32.totalorder %s5410_s3, %s5405_s27 }
  0x35   : > { %p5408_p7 = pnand %p5407_p5, %p5406_p2  ;;  %p5413_p11 = por %p5412_p10, %p5411_p9 }
  0x37   : > { %p5409_p8 = pneg %p5408_p7 }
  0x39   : > { %p5414_p13 = pnand %p5413_p11, %p5409_p8 }
  0x3b   : > { %5417 = shalt.err (!%p5414_p13)
}
  0x3c   : > { %s5679_s0 = smov 512   ;;  %s5680_s19 = smov 256  }
  0x3d   : > { %s5681_s15 = smov 16   ;;  %s5682_s25 = smov [#allocation12]  }
  0x3e   : > { %5200 = dma.hbm_to_vmem [thread:$0]  (!%p5849_p0), %s439_s30, 32768, %s441_s1, %s5856_s26, %s5679_s0, %s5680_s19, %s5681_s15  }
  0x3f   : > { %s390_s16 = sshll.u32 %s5682_s25, 4  ;;  %s403_s13 = sshll.u32 %s6789_s6, 4  ;;  %s391_s16 = int_to_ptr.vmem [resolvable:$true] %s390_s16  ;;  %s404_s13 = int_to_ptr.hbm [resolvable:$true] %s403_s13 }
  0x40   : > { %s5683_s27 = smov 32   ;;  %s415_s21 = sshll.u32 %s6793_s10, 4  ;;  %s416_s21 = int_to_ptr.hbm [resolvable:$true] %s415_s21 }
  0x41   : > { %5190 = dma.hbm_to_vmem [thread:$0]  (!%p5796_p6), %s389_s18, 1024, %s391_s16, [#allocation11], %s5679_s0, %s5679_s0, %s5683_s27  }
  0x42   : > { %s5684_s7 = smov [#allocation13]   ;;  %s5685_s30 = smov [#allocation17]  }
  0x43   : > { %s405_s1 = sshll.u32 %s5684_s7, 4  ;;  %s417_s5 = sshll.u32 %s5685_s30, 4  ;;  %s406_s1 = int_to_ptr.vmem [resolvable:$true] %s405_s1  ;;  %s418_s5 = int_to_ptr.vmem [resolvable:$true] %s417_s5 }
  0x44   : > { %5193 = dma.hbm_to_vmem [thread:$0]  (!%p5796_p6), %s404_s13, 128, %s406_s1, [#allocation14]  }
  0x45   : > { %s6821_s12 = sand.u32 1, %s5667_s23   ;;  %s3623_s15 = sshll.u32 %s5671_s24, 2 }
  0x46   : > { %s3622_s19 = sshll.u32 %s6821_s12, 2  ;;  %s458_s27 = scalar_lea.hbm %s6791_s8, %s3623_s15 }
  0x47   : > { %5196 = dma.hbm_to_vmem [thread:$0]  (!%p5796_p6), %s416_s21, 16, %s418_s5, [#allocation8]  }
  0x48   : > { %s454_s18 = scalar_lea.vmem [#allocation16], %s3622_s19  ;;  %s460_s7 = sshll.u32 %s458_s27, 4  ;;  %s461_s7 = int_to_ptr.hbm [resolvable:$true] %s460_s7 }
  0x49   : > { %s462_s0 = sshll.u32 %s454_s18, 4  ;;  %s5523_s3 = sshra.s32 %s461_s7, 4  ;;  %s463_s0 = int_to_ptr.vmem [resolvable:$true] %s462_s0  ;;  %s5524_s3 = int_to_ptr.hbm [resolvable:$true] %s5523_s3 }
  0x4a   : > { %s5525_s13 = scalar_lea.hbm %s5524_s3, 4  ;;  %s5530_s24 = scalar_lea.hbm %s6791_s8, 8 }
  0x4b   : > { %p5526_p2 = scmp.ne.s32.totalorder %s5524_s3, %s5525_s13  ;;  %p5531_p6 = scmp.lt.s32.totalorder %s5524_s3, %s6791_s8 }
  0x4c   : > { %p5532_p9 = scmp.lt.s32.totalorder %s5530_s24, %s5525_s13 }
  0x4d   : > { %p5528_p7 = pnand %p5526_p2, %p5407_p5 }
  0x4e   : > { %p5533_p10 = por %p5532_p9, %p5531_p6 }
  0x4f   : > { %p5529_p8 = pneg %p5528_p7 }
  0x51   : > { %p5534_p11 = pnand %p5533_p10, %p5529_p8 }
  0x53   : > { %5537 = shalt.err (!%p5534_p11)
}
  0x54   : > { %5203 = dma.hbm_to_vmem [thread:$0]  (!%p5849_p0), %s461_s7, 64, %s463_s0, %s5856_s26  }
  0x55   : > { %480 = sbr.rel (%p5785_p4) target bundleno = 1029 (0x405), region = 64 }
  0x5a   : > { %5626 = dma.done.wait (%p197_p1), [#allocation5], 128  }
  0x5b   : > { %5628 = vsyncadd (%p197_p1), [#allocation5], 4294967168 }
  0x5c   : > { %5630 = dma.done.wait (%p197_p1), [#allocation8], 2304  }
  0x5d   : > { %5632 = vsyncadd (%p197_p1), [#allocation8], 4294964992 }
  0x5e   : > { %5634 = dma.done.wait (%p197_p1), [#allocation11], 1056  }
  0x5f   : > { %5636 = vsyncadd (%p197_p1), [#allocation11], 4294966240 }
  0x60   : > { %5638 = dma.done.wait (%p197_p1), [#allocation14], 128  }
  0x61   : > { %5640 = vsyncadd (%p197_p1), [#allocation14], 4294967168  ;;  %s512_s2 = sand.u32 1, %s5779_s28   ;;  %s514_s29 = sand.u32 1, %s5663_s22  }
  0x62   : > { %s3631_s26 = sshll.u32 %s514_s29, 11  ;;  %s513_s30 = scalar_lea.sflag [#allocation5], %s512_s2 }
  0x63   : > { %s5922_s5 = scalar_lea.vmem [#allocation15], %s3631_s26 }
  0x64   : > { %5642 = dma.done.wait (%p5834_p12), %s513_s30, 32832  }
  0x65   : > { %5644 = vsyncadd (%p5834_p12), %s513_s30, 4294934464  ;;  %s5928_s12 = sshll.u32 %s514_s29, 2 }
  0x66   : > { %s526_s19 = scalar_lea.vmem [#allocation16], %s5928_s12 }
  0x67   : > { %5646 = dma.done.wait (%p197_p1), [#allocation8], 16  }
  0x68   : > { %5648 = vsyncadd (%p197_p1), [#allocation8], 4294967280  ;;  %s3634_s15 = sshll.u32 %s5779_s28, 6 }
  0x69   : > { %p581_p4 = scmp.lt.s32.totalorder %s3634_s15, 127  ;;  %590 = sbr.rel (%p3611_p3) target bundleno = 464 (0x1d0), region = 104 }
  0x6b   : > { %s6850_s15 = smov (!%p581_p4, %s3634_s15), 127 }
  0x6c   : > { %s3635_s18 = sshll.u32 %s6850_s15, 2 }
  0x6d   : > { %s5939_s14 = scalar_lea.vmem %s6792_s9, %s3635_s18 }
  0x6e   : > { %v803_v0 = vld [vmem:[#allocation4] sm:$0xff]  ;;  %v591_v1 = vld [vmem:[#allocation7] sm:$0xff]  ;;  %v5943_v2 = vld [vmem:[#allocation7 + $0x8] sm:$0xff]  ;;  %vm6800_vm2 = vcmask 1041409   ;;  %vm789_vm3 = vcmask 1042434   ;;  %vm791_vm4 = vcmask 1043459  }
  0x6f   : > { %851 = vmatpush.msra.mxu0 %v803_v0  ;;  %v593_v3 = vld [vmem:[#allocation9] sm:$0xff]  ;;  %v5945_v4 = vld [vmem:[#allocation9 + $0x8] sm:$0xff]  ;;  %v595_v5 = vld [vmem:[#allocation9 + $0x10] sm:$0xff]  ;;  %v609_v6 = vadd.f32 %v5943_v2, %v591_v1  ;;  %vm698_vm0 = vcmp.gt.f32.partialorder %v591_v1, 0.0  ;;  %vm699_vm1 = vcmp.gt.f32.partialorder %v5943_v2, 0.0  ;;  %vm793_vm5 = vcmask 1044484  }
  0x70   : > { %v596_v7 = vld [vmem:[#allocation9 + $0x18] sm:$0xff]  ;;  %v597_v8 = vld [vmem:[#allocation9 + $0x20] sm:$0xff]  ;;  %v598_v9 = vld [vmem:[#allocation9 + $0x28] sm:$0xff]  ;;  %v5948_v10 = vmul.f32 %v595_v5, %v591_v1  ;;  %v704_v11 = vsel %vm698_vm0, %v593_v3, -1e+30  ;;  %v5957_v18 = vmul.f32 %v593_v3, %v591_v1  ;;  %vm795_vm6 = vcmask 1045509  }
  0x71   : > { %v599_v12 = vld [vmem:[#allocation9 + $0x30] sm:$0xff]  ;;  %v600_v13 = vld [vmem:[#allocation9 + $0x38] sm:$0xff]  ;;  %v601_v14 = vld [vmem:[#allocation9 + $0x40] sm:$0xff]  ;;  %v610_v15 = vrot.slane %v609_v6, 4  ;;  %v5953_v16 = vmul.f32 %v596_v7, %v5943_v2  ;;  %v5955_v17 = vmul.f32 %v597_v8, %v591_v1  ;;  %v5960_v22 = vmul.f32 %v598_v9, %v5943_v2 }
  0x72   : > { %v602_v19 = vld [vmem:[#allocation9 + $0x48] sm:$0xff]  ;;  %v603_v20 = vld [vmem:[#allocation9 + $0x50] sm:$0xff]  ;;  %v604_v21 = vld [vmem:[#allocation9 + $0x58] sm:$0xff]  ;;  %v5962_v23 = vmul.f32 %v599_v12, %v591_v1  ;;  %v5965_v24 = vmul.f32 %v600_v13, %v5943_v2  ;;  %v5967_v25 = vmul.f32 %v601_v14, %v591_v1  ;;  %v705_v32 = vsel %vm699_vm1, %v5945_v4, -1e+30 }
  0x73   : > { %v605_v26 = vld [vmem:[#allocation9 + $0x60] sm:$0xff]  ;;  %v606_v27 = vld [vmem:[#allocation9 + $0x68] sm:$0xff]  ;;  %v607_v28 = vld [vmem:[#allocation9 + $0x70] sm:$0xff]  ;;  %v611_v29 = vadd.f32 %v610_v15, %v609_v6  ;;  %v5970_v30 = vmul.f32 %v602_v19, %v5943_v2  ;;  %v5972_v31 = vmul.f32 %v603_v20, %v591_v1  ;;  %v5978_v33 = vmul.f32 %v604_v21, %v5943_v2 }
  0x74   : > { %v5980_v34 = vmul.f32 %v605_v26, %v591_v1  ;;  %v5983_v35 = vmul.f32 %v606_v27, %v5943_v2  ;;  %v706_v36 = vsel %vm698_vm0, %v595_v5, -1e+30  ;;  %v608_v37 = vld [vmem:[#allocation9 + $0x78] sm:$0xff]  ;;  %v5986_v39 = vmul.f32 %v607_v28, %v591_v1 }
  0x75   : > { %v612_v38 = vrot.slane %v611_v29, 2  ;;  %v707_v40 = vsel %vm699_vm1, %v596_v7, -1e+30  ;;  %v708_v41 = vsel %vm698_vm0, %v597_v8, -1e+30  ;;  %v721_v45 = vmax.f32 %v704_v11, %v705_v32 }
  0x76   : > { %v709_v42 = vsel %vm699_vm1, %v598_v9, -1e+30  ;;  %v710_v43 = vsel %vm698_vm0, %v599_v12, -1e+30  ;;  %v711_v44 = vsel %vm699_vm1, %v600_v13, -1e+30  ;;  %v728_v53 = vmax.f32 %v706_v36, %v707_v40 }
  0x77   : > { %v613_v46 = vadd.f32 %v612_v38, %v611_v29  ;;  %v712_v47 = vsel %vm698_vm0, %v601_v14, -1e+30  ;;  %v713_v48 = vsel %vm699_vm1, %v602_v19, -1e+30  ;;  %v714_v49 = vsel %vm698_vm0, %v603_v20, -1e+30 }
  0x78   : > { %v715_v50 = vsel %vm699_vm1, %v604_v21, -1e+30  ;;  %v716_v51 = vsel %vm698_vm0, %v605_v26, -1e+30  ;;  %v717_v52 = vsel %vm699_vm1, %v606_v27, -1e+30  ;;  %v6006_v55 = vmul.f32 %v608_v37, %v5943_v2 }
  0x79   : > { %v614_v54 = vrot.slane %v613_v46, 1  ;;  %v718_v56 = vsel %vm698_vm0, %v607_v28, -1e+30  ;;  %v722_v57 = vrot.slane %v721_v45, 4  ;;  %v729_v58 = vrot.slane %v728_v53, 4 }
  0x7a   : > { %v735_v59 = vmax.f32 %v708_v41, %v709_v42  ;;  %v742_v60 = vmax.f32 %v710_v43, %v711_v44  ;;  %v749_v61 = vmax.f32 %v712_v47, %v713_v48  ;;  %v756_v0 = vmax.f32 %v714_v49, %v715_v50 }
  0x7b   : > { %v6009_v62 = vadd.f32 %v614_v54, %v613_v46  ;;  %v723_v63 = vmax.f32 %v721_v45, %v722_v57  ;;  %v763_v3 = vmax.f32 %v716_v51, %v717_v52  ;;  %v730_v5 = vmax.f32 %v728_v53, %v729_v58 }
  0x7c   : > { %v736_v6 = vrot.slane %v735_v59, 4  ;;  %v743_v7 = vrot.slane %v742_v60, 4  ;;  %v750_v8 = vrot.slane %v749_v61, 4  ;;  %v719_v1 = vsel %vm699_vm1, %v608_v37, -1e+30 }
  0x7d   : > { %v616_v9 = vmax.f32 %v6009_v62, 1.0  ;;  %v724_v11 = vrot.slane %v723_v63, 2  ;;  %v757_v12 = vrot.slane %v756_v0, 4  ;;  %v731_v13 = vrot.slane %v730_v5, 2 }
  0x7e   : > { %v737_v14 = vmax.f32 %v735_v59, %v736_v6  ;;  %v744_v15 = vmax.f32 %v742_v60, %v743_v7  ;;  %v751_v19 = vmax.f32 %v749_v61, %v750_v8  ;;  %v764_v26 = vrot.slane %v763_v3, 4 }
  0x7f   : > { %5273 = vrcp.f32 %v616_v9  ;;  %v725_v20 = vmax.f32 %v723_v63, %v724_v11  ;;  %v758_v21 = vmax.f32 %v756_v0, %v757_v12  ;;  %v732_v27 = vmax.f32 %v730_v5, %v731_v13 }
  0x80   : > { %v738_v28 = vrot.slane %v737_v14, 2  ;;  %v745_v29 = vrot.slane %v744_v15, 2  ;;  %v752_v32 = vrot.slane %v751_v19, 2  ;;  %v765_v38 = vmax.f32 %v763_v3, %v764_v26 }
  0x81   : > { %v726_v36 = vrot.slane %v725_v20, 1  ;;  %v759_v37 = vrot.slane %v758_v21, 2  ;;  %v770_v40 = vmax.f32 %v718_v56, %v719_v1  ;;  %v733_v41 = vrot.slane %v732_v27, 1 }
  0x82   : > { %v739_v42 = vmax.f32 %v737_v14, %v738_v28  ;;  %v746_v43 = vmax.f32 %v744_v15, %v745_v29  ;;  %v753_v44 = vmax.f32 %v751_v19, %v752_v32  ;;  %v766_v47 = vrot.slane %v765_v38, 2 }
  0x83   : > { %v727_v45 = vmax.f32 %v725_v20, %v726_v36  ;;  %v760_v46 = vmax.f32 %v758_v21, %v759_v37  ;;  %v771_v48 = vrot.slane %v770_v40, 4  ;;  %v734_v49 = vmax.f32 %v732_v27, %v733_v41 }
  0x84   : > { %v740_v50 = vrot.slane %v739_v42, 1  ;;  %v747_v51 = vrot.slane %v746_v43, 1  ;;  %v754_v52 = vrot.slane %v753_v44, 1  ;;  %v767_v57 = vmax.f32 %v765_v38, %v766_v47 }
  0x85   : > { %v6014_v53 = vpop.eup %5273  ;;  %v761_v54 = vrot.slane %v760_v46, 1  ;;  %v772_v58 = vmax.f32 %v770_v40, %v771_v48  ;;  %vm797_vm8 = vcmask 1046534   ;;  %v788_v61 = vsel %vm6800_vm2, %v734_v49, %v727_v45 }
  0x86   : > { %v741_v56 = vmax.f32 %v739_v42, %v740_v50  ;;  %v748_v59 = vmax.f32 %v746_v43, %v747_v51  ;;  %v755_v60 = vmax.f32 %v753_v44, %v754_v52  ;;  %v768_v0 = vrot.slane %v767_v57, 1 }
  0x87   : > { %v762_v63 = vmax.f32 %v760_v46, %v761_v54  ;;  %v773_v3 = vrot.slane %v772_v58, 2  ;;  %vm6799_vm10 = vcmask 1040384   ;;  %vm1083_vm11 = vsmask.f32 256 }
  0x88   : > { %v790_v5 = vsel %vm789_vm3, %v741_v56, %v788_v61  ;;  %vm1086_vm12 = vsmask.f32 1280  ;;  %v769_v6 = vmax.f32 %v767_v57, %v768_v0  ;;  %vm6021_vm13 = vmand %vm6799_vm10, %vm1083_vm11  ;;  %vm1090_vm14 = vsmask.f32 2304 }
  0x89   : > { %v774_v7 = vmax.f32 %v772_v58, %v773_v3  ;;  %v792_v8 = vsel %vm791_vm4, %v748_v59, %v790_v5  ;;  %vm6027_vm15 = vmand %vm6800_vm2, %vm1086_vm12  ;;  %vm1094_vm0 = vsmask.f32 3328  ;;  %vm1098_vm1 = vsmask.f32 4352 }
  0x8a   : > { %v794_v1 = vsel %vm793_vm5, %v755_v60, %v792_v8  ;;  %vm1102_vm7 = vsmask.f32 5376  ;;  %vm1088_vm11 = vmor %vm6027_vm15, %vm6021_vm13  ;;  %vm1106_vm10 = vsmask.f32 6400  ;;  %vm1110_vm9 = vsmask.f32 7424 }
  0x8b   : > { %v775_v12 = vrot.slane %v774_v7, 1  ;;  %v796_v13 = vsel %vm795_vm6, %v762_v63, %v794_v1  ;;  %vm1091_vm12 = vmand %vm789_vm3, %vm1090_vm14  ;;  %v619_v15 = vmul.f32 %v5945_v4, %v5943_v2  ;;  %v641_v19 = vadd.f32 %v5953_v16, %v5948_v10 }
  0x8c   : > { %v798_v14 = vsel %vm797_vm8, %v769_v6, %v796_v13  ;;  %v648_v20 = vadd.f32 %v5960_v22, %v5955_v17  ;;  %vm6044_vm2 = vmor %vm1091_vm12, %vm1088_vm11  ;;  %v655_v27 = vadd.f32 %v5965_v24, %v5962_v23  ;;  %v662_v28 = vadd.f32 %v5970_v30, %v5967_v25 }
  0x8d   : > { %v776_v21 = vmax.f32 %v774_v7, %v775_v12  ;;  %v669_v2 = vadd.f32 %v5978_v33, %v5972_v31  ;;  %vm6056_vm13 = vmand %vm791_vm4, %vm1094_vm0  ;;  %v634_v10 = vadd.f32 %v619_v15, %v5957_v18  ;;  %v642_v16 = vrot.slane %v641_v19, 4 }
  0x8e   : > { %v649_v17 = vrot.slane %v648_v20, 4  ;;  %v676_v22 = vadd.f32 %v5983_v35, %v5980_v34  ;;  %vm6830_vm14 = vcmask 1047559   ;;  %vm1096_vm15 = vmor %vm6056_vm13, %vm6044_vm2  ;;  %v656_v24 = vrot.slane %v655_v27, 4 }
  0x8f   : > { %v800_v23 = vsel %vm6830_vm14, %v776_v21, %v798_v14  ;;  %v663_v25 = vrot.slane %v662_v28, 4  ;;  %v670_v30 = vrot.slane %v669_v2, 4  ;;  %vm6831_vm0 = vcmp.gt.f32.partialorder %v6009_v62, 0.0  ;;  %vm1099_vm11 = vmand %vm793_vm5, %vm1098_vm1 }
  0x90   : > { %3637 = vmatpush.msk.msra.mxu0 %vm6831_vm0, %v800_v23  ;;  %v635_v18 = vrot.slane %v634_v10, 4  ;;  %v643_v31 = vadd.f32 %v642_v16, %v641_v19  ;;  %v650_v33 = vadd.f32 %v649_v17, %v648_v20  ;;  %v677_v34 = vrot.slane %v676_v22, 4  ;;  %vm6072_vm12 = vmor %vm1099_vm11, %vm1096_vm15  ;;  %v828_v23 = vld [vmem:[%s6787_s4] sm:$0x3] }
  0x91   : > { %v657_v29 = vadd.f32 %v656_v24, %v655_v27  ;;  %v664_v32 = vadd.f32 %v663_v25, %v662_v28  ;;  %v671_v36 = vadd.f32 %v670_v30, %v669_v2  ;;  %v683_v37 = vadd.f32 %v6006_v55, %v5986_v39  ;;  %vm6080_vm2 = vmand %vm795_vm6, %vm1102_vm7 }
  0x92   : > { %v636_v38 = vadd.f32 %v635_v18, %v634_v10  ;;  %v644_v40 = vrot.slane %v643_v31, 2  ;;  %v651_v41 = vrot.slane %v650_v33, 2  ;;  %v678_v42 = vadd.f32 %v677_v34, %v676_v22  ;;  %vm1104_vm1 = vmor %vm6080_vm2, %vm6072_vm12 }
  0x93   : > { %v658_v43 = vrot.slane %v657_v29, 2  ;;  %v665_v44 = vrot.slane %v664_v32, 2  ;;  %v672_v45 = vrot.slane %v671_v36, 2  ;;  %v684_v46 = vrot.slane %v683_v37, 4  ;;  %vm1107_vm13 = vmand %vm797_vm8, %vm1106_vm10 }
  0x94   : > { %v637_v39 = vrot.slane %v636_v38, 2  ;;  %v645_v55 = vadd.f32 %v644_v40, %v643_v31  ;;  %v652_v47 = vadd.f32 %v651_v41, %v650_v33  ;;  %v679_v48 = vrot.slane %v678_v42, 2  ;;  %vm6090_vm7 = vmor %vm1107_vm13, %vm1104_vm1  ;;  %v4839_v40 = vld [vmem:[#allocation12 + $0x4] sm:$0xf] }
  0x95   : > { %v659_v50 = vadd.f32 %v658_v43, %v657_v29  ;;  %v666_v51 = vadd.f32 %v665_v44, %v664_v32  ;;  %v673_v52 = vadd.f32 %v672_v45, %v671_v36  ;;  %v685_v54 = vadd.f32 %v684_v46, %v683_v37  ;;  %vm6096_vm15 = vmand %vm6830_vm14, %vm1110_vm9  ;;  %v827_v37 = vld [vmem:[#allocation10] sm:$0x3]  ;;  %v3649_v43 = vld [vmem:[#allocation12 + $0x8] sm:$0xf] }
  0x96   : > { %v638_v58 = vadd.f32 %v637_v39, %v636_v38  ;;  %v646_v56 = vrot.slane %v645_v55, 1  ;;  %v653_v59 = vrot.slane %v652_v47, 1  ;;  %v680_v60 = vadd.f32 %v679_v48, %v678_v42  ;;  %vm1112_vm10 = vmor %vm6096_vm15, %vm6090_vm7  ;;  %v4843_v38 = vld [vmem:[#allocation12 + $0x1c] sm:$0xf0]  ;;  %v3643_v42 = vld [vmem:[#allocation12 + $0x20] sm:$0xf0] }
  0x97   : > { %v660_v61 = vrot.slane %v659_v50, 1  ;;  %v667_v63 = vrot.slane %v666_v51, 1  ;;  %v674_v0 = vrot.slane %v673_v52, 1  ;;  %v686_v3 = vrot.slane %v685_v54, 2  ;;  %vm6841_vm11 = vmmov %vm6830_vm14  ;;  %v4844_v44 = vld [vmem:[#allocation12 + $0x24] sm:$0xf0] }
  0x98   : > { %v639_v5 = vrot.slane %v638_v58, 1  ;;  %v647_v6 = vadd.f32 %v646_v56, %v645_v55  ;;  %v654_v7 = vadd.f32 %v653_v59, %v652_v47  ;;  %v681_v8 = vrot.slane %v680_v60, 1  ;;  %v4840_v39 = vld [vmem:[#allocation12 + $0xc] sm:$0xf]  ;;  %v4841_v48 = vld [vmem:[#allocation12 + $0x14] sm:$0xf] }
  0x99   : > { %v661_v9 = vadd.f32 %v660_v61, %v659_v50  ;;  %v668_v1 = vadd.f32 %v667_v63, %v666_v51  ;;  %v675_v11 = vadd.f32 %v674_v0, %v673_v52  ;;  %v687_v12 = vadd.f32 %v686_v3, %v685_v54  ;;  %v3651_v55 = vld [vmem:[#allocation12 + $0x28] sm:$0xf0]  ;;  %v3659_v50 = vld [vmem:[#allocation12 + $0x30] sm:$0xf0]  ;;  %v3665_v51 = vld [vmem:[#allocation12 + $0x18] sm:$0xf] }
  0x9a   : > { %v640_v13 = vadd.f32 %v639_v5, %v638_v58  ;;  %v682_v14 = vadd.f32 %v681_v8, %v680_v60  ;;  %v691_v15 = vmul.f32 %v6014_v53, %v647_v6  ;;  %v692_v19 = vmul.f32 %v6014_v53, %v654_v7  ;;  %v4846_v54 = vld [vmem:[#allocation12 + $0x34] sm:$0xf0]  ;;  %v3657_v58 = vld [vmem:[#allocation12 + $0x10] sm:$0xf]  ;;  %v4842_v61 = vld [vmem:[#allocation12 + $0x1c] sm:$0xf] }
  0x9b   : > { %v688_v20 = vrot.slane %v687_v12, 1  ;;  %v693_v21 = vmul.f32 %v6014_v53, %v661_v9  ;;  %v694_v26 = vmul.f32 %v6014_v53, %v668_v1  ;;  %v695_v27 = vmul.f32 %v6014_v53, %v675_v11  ;;  %v4845_v56 = vld [vmem:[#allocation12 + $0x2c] sm:$0xf0]  ;;  %v3667_v63 = vld [vmem:[#allocation12 + $0x38] sm:$0xf0] }
  0x9c   : > { %v690_v28 = vmul.f32 %v6014_v53, %v640_v13  ;;  %v696_v2 = vmul.f32 %v6014_v53, %v682_v14  ;;  %v812_v4 = vrot.slane %v691_v15, 7  ;;  %v814_v10 = vrot.slane %v692_v19, 6  ;;  %v873_v19 = vld [vmem:[#allocation13] sm:$0xff] }
  0x9d   : > { %v689_v16 = vadd.f32 %v688_v20, %v687_v12  ;;  %v816_v17 = vrot.slane %v693_v21, 5  ;;  %v818_v22 = vrot.slane %v694_v26, 4  ;;  %vm6840_vm9 = vcmask 1041409  }
  0x9e   : > { %v813_v24 = vsel %vm6840_vm9, %v812_v4, %v690_v28  ;;  %v820_v25 = vrot.slane %v695_v27, 3  ;;  %v822_v31 = vrot.slane %v696_v2, 2  ;;  %v5686_v33 = vmov 0  }
  0x9f   : > { %v697_v30 = vmul.f32 %v6014_v53, %v689_v16  ;;  %v815_v18 = vsel %vm789_vm3, %v814_v10, %v813_v24  ;;  %5272 = vset.pattern.permute.xlu0 %v5686_v33  ;;  %vm834_vm0 = vcmask 195584   ;;  %v3641_v53 = vld [vmem:[#allocation12] sm:$0xf]  ;;  %v3646_v45 = vor.u32 %v4839_v40, %v3643_v42 }
  0xa0   : > { %v817_v34 = vsel %vm791_vm4, %v816_v17, %v815_v18  ;;  %831 = vperm.xlu0 %5272, %v828_v23   ;;  %v3642_v41 = vor.u32 %v4843_v38, %v3641_v53  ;;  %v3650_v46 = vor.u32 %v4844_v44, %v3649_v43  ;;  %v3654_v47 = vor.u32 %v4840_v39, %v3651_v55 }
  0xa1   : > { %v819_v35 = vsel %vm793_vm5, %v818_v22, %v817_v34  ;;  %v824_v29 = vrot.slane %v697_v30, 1  ;;  %955 = vmatpush.bf16.msra.mxu2 %v3646_v45  ;;  %v3662_v52 = vor.u32 %v4841_v48, %v3659_v50  ;;  %v3666_v59 = vor.u32 %v4846_v54, %v3665_v51 }
  0xa2   : > { %v821_v32 = vsel %vm795_vm6, %v820_v25, %v819_v35  ;;  %942 = vmatpush.bf16.msra.mxu1 %v3642_v41  ;;  %968 = vmatpush.bf16.msra.mxu3 %v3650_v46  ;;  %v3658_v60 = vor.u32 %v4845_v56, %v3657_v58  ;;  %v3670_v0 = vor.u32 %v4842_v61, %v3667_v63  ;;  %vm931_vm4 = vcmask 130048  }
  0xa3   : > { %v823_v36 = vsel %vm797_vm8, %v822_v31, %v821_v32  ;;  %vm1116_vm6 = vcmask 253952   ;;  %v5687_v13 = vmov 0.0   ;;  %v916_v21 = vperm.slane %v873_v19, 1 }
  0xa4   : > { %v825_v62 = vsel %vm6841_vm11, %v824_v29, %v823_v36  ;;  %1117 = vst.msk [vmem:[#allocation3] sm:$0x1] %vm1116_vm6, %v5687_v13  ;;  %v917_v27 = vperm.slane %v873_v19, 2  ;;  %v915_v28 = vperm.slane %v873_v19, 0  ;;  %v918_v2 = vperm.slane %v873_v19, 3 }
  0xa5   : > { %853 = vmatpush.msra.mxu0 %v825_v62  ;;  %1007 = vmatpush.bf16.msrb.mxu2 %v3662_v52  ;;  %v919_v30 = vperm.slane %v873_v19, 4  ;;  %v922_v33 = vperm.slane %v873_v19, 7  ;;  %v920_v35 = vperm.slane %v873_v19, 5  ;;  %v921_v32 = vperm.slane %v873_v19, 6 }
  0xa6   : > { %3638 = vmatmul.msk.f32.vlgmr.msra.gmra.mxu0 %vm834_vm0, %v827_v37  ;;  %1020 = vmatpush.bf16.msrb.mxu3 %v3666_v59  ;;  %vm1069_vm12 = vcmask 1041408   ;;  %vm1077_vm2 = vcmask 1045508   ;;  %vm6842_vm1 = vcmask 1040384   ;;  %vm1079_vm13 = vcmask 1043456  }
  0xa7   : > { %981 = vmatpush.bf16.msrb.mxu0 %v3654_v47  ;;  %994 = vmatpush.bf16.msrb.mxu1 %v3658_v60 }
  0xab   : > { %1033 = vmatpush.bf16.msra.mxu0 %v3670_v0 }
 0x112   : > { %v832_v3 = vpop.permute.xlu0 %831 }
 0x123   : > { %v855_v5 = vpop.f32.mrf.mxu0 }
 0x124   : > { %v856_v6 = vadd.f32 %v855_v5, %v832_v3 }
 0x126   : > { %v858_v7 = vmax.f32 %v856_v6, 0.0  ;;  %v1113_v6 = vld [vmem:[#allocation2] sm:$0xff] }
 0x128   : > { %v860_v8 = vrot.slane %v858_v7, 1 }
 0x12a   : > { %v862_v9 = vadd.f32 %v860_v8, %v858_v7 }
 0x12c   : > { %863 = vst [vmem:[#allocation18] sm:$0x1] %v862_v9  ;;  %v864_v1 = vpack.c.bf16 %v862_v9, %v862_v9 }
 0x12e   : > { %3671 = vmatmul.msk.bf16.vlgmr.msra.gmra.mxu1 %vm931_vm4, %v864_v1  ;;  %3672 = vmatmul.msk.bf16.vlgmr.msra.gmra.mxu2 %vm931_vm4, %v864_v1 }
 0x12f   : > { %3673 = vmatmul.msk.bf16.vlgmr.msra.gmra.mxu3 %vm931_vm4, %v864_v1  ;;  %3674 = vmatmul.msk.bf16.vlgmr.msrb.gmra.mxu0 %vm931_vm4, %v864_v1 }
 0x13e   : > { %3675 = vmatmul.msk.bf16.vlgmr.msrb.gmra.mxu1 %vm931_vm4, %v864_v1  ;;  %3676 = vmatmul.msk.bf16.vlgmr.msrb.gmra.mxu2 %vm931_vm4, %v864_v1 }
 0x13f   : > { %3677 = vmatmul.msk.bf16.vlgmr.msrb.gmra.mxu3 %vm931_vm4, %v864_v1  ;;  %3678 = vmatmul.msk.bf16.vlgmr.msra.gmra.mxu0 %vm931_vm4, %v864_v1 }
 0x1ab   : > { %v944_v11 = vpop.f32.mrf.mxu1 }
 0x1ac   : > { %v983_v12 = vpop.f32.mrf.mxu0  ;;  %v945_v17 = vadd.f32 %v944_v11, %v915_v28 }
 0x1ad   : > { %v984_v23 = vadd.f32 %v983_v12, %v918_v2 }
 0x1ae   : > { %v1039_v34 = vmax.f32 %v945_v17, 0.0 }
 0x1af   : > { %v1042_v29 = vmax.f32 %v984_v23, 0.0 }
 0x1b1   : > { %v957_v14 = vpop.f32.mrf.mxu2 }
 0x1b2   : > { %v970_v15 = vpop.f32.mrf.mxu3  ;;  %v958_v4 = vadd.f32 %v957_v14, %v916_v21 }
 0x1b3   : > { %v946_v20 = vpop.f32.mrf.mxu1  ;;  %v971_v10 = vadd.f32 %v970_v15, %v917_v27 }
 0x1b4   : > { %v985_v26 = vpop.f32.mrf.mxu0  ;;  %v1040_v25 = vmax.f32 %v958_v4, 0.0 }
 0x1b5   : > { %v1041_v31 = vmax.f32 %v971_v10, 0.0 }
 0x1b6   : > { %v1047_v36 = vpack.c.bf16 %v1040_v25, %v1039_v34 }
 0x1b7   : > { %v1048_v62 = vpack.c.bf16 %v1042_v29, %v1041_v31 }
 0x1b8   : > { %v1055_v44 = vrot.slane %v1047_v36, 3 }
 0x1b9   : > { %v959_v16 = vpop.f32.mrf.mxu2  ;;  %v1056_v55 = vrot.slane %v1048_v62, 6  ;;  %v1057_v47 = vrot.slane %v1048_v62, 1 }
 0x1ba   : > { %v972_v22 = vpop.f32.mrf.mxu3  ;;  %v1065_v56 = vsel %vm6842_vm1, %v1047_v36, %v1055_v44 }
 0x1bb   : > { %v996_v24 = vpop.f32.mrf.mxu1  ;;  %v1068_v59 = vsel %vm789_vm3, %v1056_v55, %v1057_v47 }
 0x1bc   : > { %v1035_v18 = vpop.f32.mrf.mxu0  ;;  %v997_v37 = vadd.f32 %v996_v24, %v919_v30  ;;  %v1070_v7 = vsel %vm1069_vm12, %v1065_v56, %v1068_v59 }
 0x1bd   : > { %v1036_v53 = vadd.f32 %v1035_v18, %v922_v33 }
 0x1be   : > { %v1043_v45 = vmax.f32 %v997_v37, 0.0 }
 0x1bf   : > { %v1046_v48 = vmax.f32 %v1036_v53, 0.0 }
 0x1c1   : > { %v1009_v38 = vpop.f32.mrf.mxu2 }
 0x1c2   : > { %v1010_v40 = vadd.f32 %v1009_v38, %v920_v35  ;;  %v1022_v41 = vpop.f32.mrf.mxu3 }
 0x1c3   : > { %v1023_v42 = vadd.f32 %v1022_v41, %v921_v32  ;;  %v998_v43 = vpop.f32.mrf.mxu1 }
 0x1c4   : > { %v1044_v46 = vmax.f32 %v1010_v40, 0.0  ;;  %v1037_v39 = vpop.f32.mrf.mxu0 }
 0x1c5   : > { %v1045_v50 = vmax.f32 %v1023_v42, 0.0 }
 0x1c6   : > { %v1049_v51 = vpack.c.bf16 %v1044_v46, %v1043_v45 }
 0x1c7   : > { %v1050_v52 = vpack.c.bf16 %v1046_v48, %v1045_v50 }
 0x1c8   : > { %v1058_v54 = vrot.slane %v1049_v51, 4  ;;  %v1059_v58 = vrot.slane %v1049_v51, 7 }
 0x1c9   : > { %v1060_v60 = vrot.slane %v1050_v52, 2  ;;  %v1061_v61 = vrot.slane %v1050_v52, 5  ;;  %v1011_v63 = vpop.f32.mrf.mxu2 }
 0x1ca   : > { %v1073_v0 = vsel %vm793_vm5, %v1058_v54, %v1059_v58  ;;  %v1024_v3 = vpop.f32.mrf.mxu3 }
 0x1cb   : > { %v1076_v5 = vsel %vm797_vm8, %v1060_v60, %v1061_v61 }
 0x1cc   : > { %v1078_v8 = vsel %vm1077_vm2, %v1073_v0, %v1076_v5 }
 0x1cd   : > { %v1080_v9 = vsel %vm1079_vm13, %v1070_v7, %v1078_v8 }
 0x1ce   : > { %v1114_v1 = vsel %vm1112_vm10, %v1080_v9, %v1113_v6 }
 0x1cf   : > { %1115 = vst [vmem:[#allocation2] sm:$0xff] %v1114_v1 }
 0x1d0 PF: > { %v3793_v11 = vld [vmem:[%s5922_s5 + $0xe0] sm:$0xf]  ;;  %v4877_v57 = vld [vmem:[%s5922_s5 + $0xec] sm:$0xf0]  ;;  %vm3417_vm3 = vcmask 253952   ;;  %p4831_p1 = scmp.ne.s32.totalorder %s5779_s28, 1 }
 0x1d1   : > { %v3921_v12 = vld [vmem:[%s5922_s5 + $0x1e0] sm:$0xf]  ;;  %v3794_v49 = vor.u32 %v4877_v57, %v3793_v11  ;;  %v4909_v13 = vld [vmem:[%s5922_s5 + $0x1ec] sm:$0xf0] }
 0x1d2   : > { %v4049_v14 = vld [vmem:[%s5922_s5 + $0x2e0] sm:$0xf]  ;;  %v4941_v15 = vld [vmem:[%s5922_s5 + $0x2ec] sm:$0xf0]  ;;  %v3922_v19 = vor.u32 %v4909_v13, %v3921_v12 }
 0x1d3   : > { %v4050_v20 = vor.u32 %v4941_v15, %v4049_v14  ;;  %v4177_v21 = vld [vmem:[%s5922_s5 + $0x3e0] sm:$0xf]  ;;  %v4973_v26 = vld [vmem:[%s5922_s5 + $0x3ec] sm:$0xf0]  ;;  %2683 = vmatpush.bf16.msra.mxu0 %v3794_v49 }
 0x1d4   : > { %v3777_v27 = vld [vmem:[%s5922_s5 + $0xc0] sm:$0xf]  ;;  %v4178_v28 = vor.u32 %v4973_v26, %v4177_v21  ;;  %v4873_v2 = vld [vmem:[%s5922_s5 + $0xcc] sm:$0xf0]  ;;  %2696 = vmatpush.bf16.msra.mxu1 %v3922_v19 }
 0x1d5   : > { %v3905_v4 = vld [vmem:[%s5922_s5 + $0x1c0] sm:$0xf]  ;;  %v4905_v10 = vld [vmem:[%s5922_s5 + $0x1cc] sm:$0xf0]  ;;  %2709 = vmatpush.bf16.msra.mxu2 %v4050_v20  ;;  %v3778_v16 = vor.u32 %v4873_v2, %v3777_v27 }
 0x1d6   : > { %v3906_v17 = vor.u32 %v4905_v10, %v3905_v4  ;;  %v4033_v22 = vld [vmem:[%s5922_s5 + $0x2c0] sm:$0xf]  ;;  %v4937_v23 = vld [vmem:[%s5922_s5 + $0x2cc] sm:$0xf0]  ;;  %2722 = vmatpush.bf16.msra.mxu3 %v4178_v28 }
 0x1d7   : > { %v4161_v24 = vld [vmem:[%s5922_s5 + $0x3c0] sm:$0xf]  ;;  %v4034_v25 = vor.u32 %v4937_v23, %v4033_v22  ;;  %v4969_v30 = vld [vmem:[%s5922_s5 + $0x3cc] sm:$0xf0]  ;;  %2684 = vmatpush.bf16.msra.mxu0 %v3778_v16 }
 0x1d8   : > { %v3761_v18 = vld [vmem:[%s5922_s5 + $0xa0] sm:$0xf]  ;;  %v4869_v31 = vld [vmem:[%s5922_s5 + $0xac] sm:$0xf0]  ;;  %v4162_v33 = vor.u32 %v4969_v30, %v4161_v24  ;;  %2697 = vmatpush.bf16.msra.mxu1 %v3906_v17 }
 0x1d9   : > { %v3889_v34 = vld [vmem:[%s5922_s5 + $0x1a0] sm:$0xf]  ;;  %v4901_v35 = vld [vmem:[%s5922_s5 + $0x1ac] sm:$0xf0]  ;;  %v3762_v32 = vor.u32 %v4869_v31, %v3761_v18  ;;  %2710 = vmatpush.bf16.msra.mxu2 %v4034_v25 }
 0x1da   : > { %v4017_v29 = vld [vmem:[%s5922_s5 + $0x2a0] sm:$0xf]  ;;  %v4933_v36 = vld [vmem:[%s5922_s5 + $0x2ac] sm:$0xf0]  ;;  %v3890_v53 = vor.u32 %v4901_v35, %v3889_v34  ;;  %2723 = vmatpush.bf16.msra.mxu3 %v4162_v33 }
 0x1db   : > { %v4145_v37 = vld [vmem:[%s5922_s5 + $0x3a0] sm:$0xf]  ;;  %v4965_v62 = vld [vmem:[%s5922_s5 + $0x3ac] sm:$0xf0]  ;;  %v4018_v38 = vor.u32 %v4933_v36, %v4017_v29  ;;  %2685 = vmatpush.bf16.msra.mxu0 %v3762_v32 }
 0x1dc   : > { %v3745_v40 = vld [vmem:[%s5922_s5 + $0x80] sm:$0xf]  ;;  %v4865_v41 = vld [vmem:[%s5922_s5 + $0x8c] sm:$0xf0]  ;;  %v4146_v43 = vor.u32 %v4965_v62, %v4145_v37  ;;  %2698 = vmatpush.bf16.msra.mxu1 %v3890_v53 }
 0x1dd   : > { %v3873_v42 = vld [vmem:[%s5922_s5 + $0x180] sm:$0xf]  ;;  %v4897_v44 = vld [vmem:[%s5922_s5 + $0x18c] sm:$0xf0]  ;;  %v3746_v47 = vor.u32 %v4865_v41, %v3745_v40  ;;  %2711 = vmatpush.bf16.msra.mxu2 %v4018_v38 }
 0x1de   : > { %v4001_v45 = vld [vmem:[%s5922_s5 + $0x280] sm:$0xf]  ;;  %v4929_v46 = vld [vmem:[%s5922_s5 + $0x28c] sm:$0xf0]  ;;  %v3874_v48 = vor.u32 %v4897_v44, %v3873_v42  ;;  %2724 = vmatpush.bf16.msra.mxu3 %v4146_v43 }
 0x1df   : > { %v4129_v39 = vld [vmem:[%s5922_s5 + $0x380] sm:$0xf]  ;;  %v4961_v55 = vld [vmem:[%s5922_s5 + $0x38c] sm:$0xf0]  ;;  %v4002_v50 = vor.u32 %v4929_v46, %v4001_v45  ;;  %2686 = vmatpush.bf16.msra.mxu0 %v3746_v47 }
 0x1e0   : > { %v3729_v51 = vld [vmem:[%s5922_s5 + $0x60] sm:$0xf]  ;;  %v4861_v52 = vld [vmem:[%s5922_s5 + $0x6c] sm:$0xf0]  ;;  %v4130_v58 = vor.u32 %v4961_v55, %v4129_v39  ;;  %2699 = vmatpush.bf16.msra.mxu1 %v3874_v48 }
 0x1e1   : > { %v3857_v54 = vld [vmem:[%s5922_s5 + $0x160] sm:$0xf]  ;;  %v4893_v56 = vld [vmem:[%s5922_s5 + $0x16c] sm:$0xf0]  ;;  %v3730_v0 = vor.u32 %v4861_v52, %v3729_v51  ;;  %2712 = vmatpush.bf16.msra.mxu2 %v4002_v50 }
 0x1e2   : > { %v3985_v59 = vld [vmem:[%s5922_s5 + $0x260] sm:$0xf]  ;;  %v4925_v60 = vld [vmem:[%s5922_s5 + $0x26c] sm:$0xf0]  ;;  %v3858_v3 = vor.u32 %v4893_v56, %v3857_v54  ;;  %2725 = vmatpush.bf16.msra.mxu3 %v4130_v58 }
 0x1e3   : > { %v4113_v61 = vld [vmem:[%s5922_s5 + $0x360] sm:$0xf]  ;;  %v4957_v63 = vld [vmem:[%s5922_s5 + $0x36c] sm:$0xf0]  ;;  %v3986_v5 = vor.u32 %v4925_v60, %v3985_v59  ;;  %2687 = vmatpush.bf16.msra.mxu0 %v3730_v0 }
 0x1e4   : > { %v3713_v6 = vld [vmem:[%s5922_s5 + $0x40] sm:$0xf]  ;;  %v4857_v7 = vld [vmem:[%s5922_s5 + $0x4c] sm:$0xf0]  ;;  %v4114_v9 = vor.u32 %v4957_v63, %v4113_v61  ;;  %2700 = vmatpush.bf16.msra.mxu1 %v3858_v3 }
 0x1e5   : > { %v3841_v8 = vld [vmem:[%s5922_s5 + $0x140] sm:$0xf]  ;;  %v4889_v1 = vld [vmem:[%s5922_s5 + $0x14c] sm:$0xf0]  ;;  %v3714_v13 = vor.u32 %v4857_v7, %v3713_v6  ;;  %2713 = vmatpush.bf16.msra.mxu2 %v3986_v5 }
 0x1e6   : > { %v3969_v11 = vld [vmem:[%s5922_s5 + $0x240] sm:$0xf]  ;;  %v4921_v57 = vld [vmem:[%s5922_s5 + $0x24c] sm:$0xf0]  ;;  %v3842_v14 = vor.u32 %v4889_v1, %v3841_v8  ;;  %2726 = vmatpush.bf16.msra.mxu3 %v4114_v9 }
 0x1e7   : > { %v4097_v12 = vld [vmem:[%s5922_s5 + $0x340] sm:$0xf]  ;;  %v4953_v49 = vld [vmem:[%s5922_s5 + $0x34c] sm:$0xf0]  ;;  %v3970_v15 = vor.u32 %v4921_v57, %v3969_v11  ;;  %2688 = vmatpush.bf16.msra.mxu0 %v3714_v13 }
 0x1e8   : > { %v3697_v19 = vld [vmem:[%s5922_s5 + $0x20] sm:$0xf]  ;;  %v4853_v20 = vld [vmem:[%s5922_s5 + $0x2c] sm:$0xf0]  ;;  %v4098_v26 = vor.u32 %v4953_v49, %v4097_v12  ;;  %2701 = vmatpush.bf16.msra.mxu1 %v3842_v14  ;;  %v1118_v12 = vld [vmem:[#allocation2] sm:$0xff] }
 0x1e9   : > { %v3825_v21 = vld [vmem:[%s5922_s5 + $0x120] sm:$0xf]  ;;  %v4885_v27 = vld [vmem:[%s5922_s5 + $0x12c] sm:$0xf0]  ;;  %v3698_v16 = vor.u32 %v4853_v20, %v3697_v19  ;;  %2714 = vmatpush.bf16.msra.mxu2 %v3970_v15  ;;  %1377 = vst [vmem:[#allocation1] ss:$9 sm:$0xff] %v1118_v12 }
 0x1ea   : > { %v3953_v28 = vld [vmem:[%s5922_s5 + $0x220] sm:$0xf]  ;;  %v4917_v2 = vld [vmem:[%s5922_s5 + $0x22c] sm:$0xf0]  ;;  %v3826_v23 = vor.u32 %v4885_v27, %v3825_v21  ;;  %2727 = vmatpush.bf16.msra.mxu3 %v4098_v26  ;;  %v3795_v12 = vld [vmem:[%s5922_s5 + $0xf0] sm:$0xf0] }
 0x1eb   : > { %v4081_v4 = vld [vmem:[%s5922_s5 + $0x320] sm:$0xf]  ;;  %v4949_v10 = vld [vmem:[%s5922_s5 + $0x32c] sm:$0xf0]  ;;  %v3954_v24 = vor.u32 %v4917_v2, %v3953_v28  ;;  %2689 = vmatpush.bf16.msra.mxu0 %v3698_v16 }
 0x1ec   : > { %v3681_v17 = vld [vmem:[%s5922_s5] sm:$0xf]  ;;  %v4849_v22 = vld [vmem:[%s5922_s5 + $0xc] sm:$0xf0]  ;;  %v4082_v31 = vor.u32 %v4949_v10, %v4081_v4  ;;  %2702 = vmatpush.bf16.msra.mxu1 %v3826_v23 }
 0x1ed   : > { %v3809_v25 = vld [vmem:[%s5922_s5 + $0x100] sm:$0xf]  ;;  %v4881_v30 = vld [vmem:[%s5922_s5 + $0x10c] sm:$0xf0]  ;;  %v3682_v37 = vor.u32 %v4849_v22, %v3681_v17  ;;  %2715 = vmatpush.bf16.msra.mxu2 %v3954_v24 }
 0x1ee   : > { %v3937_v18 = vld [vmem:[%s5922_s5 + $0x200] sm:$0xf]  ;;  %v4913_v33 = vld [vmem:[%s5922_s5 + $0x20c] sm:$0xf0]  ;;  %v3810_v40 = vor.u32 %v4881_v30, %v3809_v25  ;;  %2728 = vmatpush.bf16.msra.mxu3 %v4082_v31 }
 0x1ef   : > { %v4065_v34 = vld [vmem:[%s5922_s5 + $0x300] sm:$0xf]  ;;  %v4945_v35 = vld [vmem:[%s5922_s5 + $0x30c] sm:$0xf0]  ;;  %v3938_v41 = vor.u32 %v4913_v33, %v3937_v18  ;;  %2690 = vmatpush.bf16.msra.mxu0 %v3682_v37 }
 0x1f0   : > { %v4305_v29 = vld [vmem:[%s5922_s5 + $0x4e0] sm:$0xf]  ;;  %v5005_v32 = vld [vmem:[%s5922_s5 + $0x4ec] sm:$0xf0]  ;;  %v4066_v44 = vor.u32 %v4945_v35, %v4065_v34  ;;  %2703 = vmatpush.bf16.msra.mxu1 %v3810_v40 }
 0x1f1   : > { %v4433_v36 = vld [vmem:[%s5922_s5 + $0x5e0] sm:$0xf]  ;;  %v5037_v62 = vld [vmem:[%s5922_s5 + $0x5ec] sm:$0xf0]  ;;  %v4306_v45 = vor.u32 %v5005_v32, %v4305_v29  ;;  %2716 = vmatpush.bf16.msra.mxu2 %v3938_v41  ;;  %v6240_v32 = vld [vmem:[#allocation1 + $0x1b] sm:$0xff] }
 0x1f2   : > { %v4561_v53 = vld [vmem:[%s5922_s5 + $0x6e0] sm:$0xf]  ;;  %v5069_v38 = vld [vmem:[%s5922_s5 + $0x6ec] sm:$0xf0]  ;;  %v4434_v46 = vor.u32 %v5037_v62, %v4433_v36  ;;  %2729 = vmatpush.bf16.msra.mxu3 %v4066_v44 }
 0x1f3   : > { %v4689_v42 = vld [vmem:[%s5922_s5 + $0x7e0] sm:$0xf]  ;;  %v5101_v43 = vld [vmem:[%s5922_s5 + $0x7ec] sm:$0xf0]  ;;  %v4562_v39 = vor.u32 %v5069_v38, %v4561_v53  ;;  %2735 = vmatpush.bf16.msrb.mxu0 %v4306_v45  ;;  %v6244_v38 = vld [vmem:[#allocation1 + $0x9] sm:$0xff] }
 0x1f4   : > { %v4289_v55 = vld [vmem:[%s5922_s5 + $0x4c0] sm:$0xf]  ;;  %v5001_v47 = vld [vmem:[%s5922_s5 + $0x4cc] sm:$0xf0]  ;;  %v4690_v50 = vor.u32 %v5101_v43, %v4689_v42  ;;  %2748 = vmatpush.bf16.msrb.mxu1 %v4434_v46 }
 0x1f5   : > { %v4417_v48 = vld [vmem:[%s5922_s5 + $0x5c0] sm:$0xf]  ;;  %v5033_v51 = vld [vmem:[%s5922_s5 + $0x5cc] sm:$0xf0]  ;;  %v4290_v59 = vor.u32 %v5001_v47, %v4289_v55  ;;  %2761 = vmatpush.bf16.msrb.mxu2 %v4562_v39  ;;  %2730 = vmatmul.bf16.vlgmr.msra.gmra.mxu3 %v6240_v32 }
 0x1f6   : > { %v4545_v52 = vld [vmem:[%s5922_s5 + $0x6c0] sm:$0xf]  ;;  %v5065_v54 = vld [vmem:[%s5922_s5 + $0x6cc] sm:$0xf0]  ;;  %v4418_v60 = vor.u32 %v5033_v51, %v4417_v48  ;;  %2774 = vmatpush.bf16.msrb.mxu3 %v4690_v50  ;;  %2704 = vmatmul.bf16.vlgmr.msra.gmra.mxu1 %v6244_v38 }
 0x1f7   : > { %v4673_v58 = vld [vmem:[%s5922_s5 + $0x7c0] sm:$0xf]  ;;  %v5097_v56 = vld [vmem:[%s5922_s5 + $0x7cc] sm:$0xf0]  ;;  %v4546_v61 = vor.u32 %v5065_v54, %v4545_v52  ;;  %2736 = vmatpush.bf16.msrb.mxu0 %v4290_v59 }
 0x1f8   : > { %v4273_v63 = vld [vmem:[%s5922_s5 + $0x4a0] sm:$0xf]  ;;  %v4997_v0 = vld [vmem:[%s5922_s5 + $0x4ac] sm:$0xf0]  ;;  %v4674_v5 = vor.u32 %v5097_v56, %v4673_v58  ;;  %2749 = vmatpush.bf16.msrb.mxu1 %v4418_v60 }
 0x1f9   : > { %v4401_v3 = vld [vmem:[%s5922_s5 + $0x5a0] sm:$0xf]  ;;  %v5029_v6 = vld [vmem:[%s5922_s5 + $0x5ac] sm:$0xf0]  ;;  %v4274_v11 = vor.u32 %v4997_v0, %v4273_v63  ;;  %2762 = vmatpush.bf16.msrb.mxu2 %v4546_v61 }
 0x1fa   : > { %v4529_v7 = vld [vmem:[%s5922_s5 + $0x6a0] sm:$0xf]  ;;  %v5061_v8 = vld [vmem:[%s5922_s5 + $0x6ac] sm:$0xf0]  ;;  %v4402_v49 = vor.u32 %v5029_v6, %v4401_v3  ;;  %2775 = vmatpush.bf16.msrb.mxu3 %v4674_v5 }
 0x1fb   : > { %v4657_v9 = vld [vmem:[%s5922_s5 + $0x7a0] sm:$0xf]  ;;  %v5093_v1 = vld [vmem:[%s5922_s5 + $0x7ac] sm:$0xf0]  ;;  %v4530_v13 = vor.u32 %v5061_v8, %v4529_v7  ;;  %2737 = vmatpush.bf16.msrb.mxu0 %v4274_v11 }
 0x1fc   : > { %v4257_v57 = vld [vmem:[%s5922_s5 + $0x480] sm:$0xf]  ;;  %v4993_v14 = vld [vmem:[%s5922_s5 + $0x48c] sm:$0xf0]  ;;  %v4658_v19 = vor.u32 %v5093_v1, %v4657_v9  ;;  %2750 = vmatpush.bf16.msrb.mxu1 %v4402_v49  ;;  %v4907_v49 = vld [vmem:[%s5922_s5 + $0x1e4] sm:$0xf] }
 0x1fd   : > { %v4385_v15 = vld [vmem:[%s5922_s5 + $0x580] sm:$0xf]  ;;  %v5025_v20 = vld [vmem:[%s5922_s5 + $0x58c] sm:$0xf0]  ;;  %v4258_v2 = vor.u32 %v4993_v14, %v4257_v57  ;;  %2763 = vmatpush.bf16.msrb.mxu2 %v4530_v13  ;;  %v4875_v57 = vld [vmem:[%s5922_s5 + $0xe4] sm:$0xf] }
 0x1fe   : > { %v4513_v21 = vld [vmem:[%s5922_s5 + $0x680] sm:$0xf]  ;;  %v5057_v26 = vld [vmem:[%s5922_s5 + $0x68c] sm:$0xf0]  ;;  %v4386_v4 = vor.u32 %v5025_v20, %v4385_v15  ;;  %2776 = vmatpush.bf16.msrb.mxu3 %v4658_v19  ;;  %v3923_v14 = vld [vmem:[%s5922_s5 + $0x1f0] sm:$0xf0] }
 0x1ff   : > { %v4641_v27 = vld [vmem:[%s5922_s5 + $0x780] sm:$0xf]  ;;  %v5089_v28 = vld [vmem:[%s5922_s5 + $0x78c] sm:$0xf0]  ;;  %v4514_v10 = vor.u32 %v5057_v26, %v4513_v21  ;;  %2738 = vmatpush.bf16.msrb.mxu0 %v4258_v2  ;;  %v4939_v15 = vld [vmem:[%s5922_s5 + $0x2e4] sm:$0xf]  ;;  %v3798_v2 = vor.u32 %v4875_v57, %v3795_v12 }
 0x200   : > { %v4241_v16 = vld [vmem:[%s5922_s5 + $0x460] sm:$0xf]  ;;  %v4989_v17 = vld [vmem:[%s5922_s5 + $0x46c] sm:$0xf0]  ;;  %v4642_v23 = vor.u32 %v5089_v28, %v4641_v27  ;;  %2751 = vmatpush.bf16.msrb.mxu1 %v4386_v4  ;;  %v4051_v19 = vld [vmem:[%s5922_s5 + $0x2f0] sm:$0xf0]  ;;  %v3926_v4 = vor.u32 %v4907_v49, %v3923_v14 }
 0x201   : > { %v4369_v22 = vld [vmem:[%s5922_s5 + $0x560] sm:$0xf]  ;;  %v5021_v24 = vld [vmem:[%s5922_s5 + $0x56c] sm:$0xf0]  ;;  %v4242_v34 = vor.u32 %v4989_v17, %v4241_v16  ;;  %2764 = vmatpush.bf16.msrb.mxu2 %v4514_v10  ;;  %v4971_v26 = vld [vmem:[%s5922_s5 + $0x3e4] sm:$0xf]  ;;  %v4054_v10 = vor.u32 %v4939_v15, %v4051_v19 }
 0x202   : > { %v4497_v25 = vld [vmem:[%s5922_s5 + $0x660] sm:$0xf]  ;;  %v5053_v30 = vld [vmem:[%s5922_s5 + $0x66c] sm:$0xf0]  ;;  %v4370_v36 = vor.u32 %v5021_v24, %v4369_v22  ;;  %2777 = vmatpush.bf16.msrb.mxu3 %v4642_v23  ;;  %v4179_v27 = vld [vmem:[%s5922_s5 + $0x3f0] sm:$0xf0] }
 0x203   : > { %v4625_v18 = vld [vmem:[%s5922_s5 + $0x760] sm:$0xf]  ;;  %v5085_v31 = vld [vmem:[%s5922_s5 + $0x76c] sm:$0xf0]  ;;  %v4498_v37 = vor.u32 %v5053_v30, %v4497_v25  ;;  %2739 = vmatpush.bf16.msrb.mxu0 %v4242_v34  ;;  %v4871_v16 = vld [vmem:[%s5922_s5 + $0xc4] sm:$0xf]  ;;  %v4182_v23 = vor.u32 %v4971_v26, %v4179_v27 }
 0x204   : > { %v4225_v33 = vld [vmem:[%s5922_s5 + $0x440] sm:$0xf]  ;;  %v6238_v29 = vld [vmem:[#allocation1] sm:$0xff]  ;;  %v4626_v40 = vor.u32 %v5085_v31, %v4625_v18  ;;  %2752 = vmatpush.bf16.msrb.mxu1 %v4370_v36  ;;  %v4903_v22 = vld [vmem:[%s5922_s5 + $0x1c4] sm:$0xf] }
 0x205   : > { %v6236_v35 = vld [vmem:[#allocation1 + $0x12] sm:$0xff]  ;;  %v4985_v62 = vld [vmem:[%s5922_s5 + $0x44c] sm:$0xf0]  ;;  %2691 = vmatmul.bf16.vlgmr.msra.gmra.mxu0 %v6238_v29  ;;  %2765 = vmatpush.bf16.msrb.mxu2 %v4498_v37  ;;  %v3779_v17 = vld [vmem:[%s5922_s5 + $0xd0] sm:$0xf0] }
 0x206   : > { %v4353_v53 = vld [vmem:[%s5922_s5 + $0x540] sm:$0xf]  ;;  %v5017_v41 = vld [vmem:[%s5922_s5 + $0x54c] sm:$0xf0]  ;;  %2717 = vmatmul.bf16.vlgmr.msra.gmra.mxu2 %v6236_v35  ;;  %v4226_v46 = vor.u32 %v4985_v62, %v4225_v33  ;;  %2778 = vmatpush.bf16.msrb.mxu3 %v4626_v40  ;;  %v3907_v24 = vld [vmem:[%s5922_s5 + $0x1d0] sm:$0xf0]  ;;  %v3782_v34 = vor.u32 %v4871_v16, %v3779_v17 }
 0x207   : > { %v4481_v42 = vld [vmem:[%s5922_s5 + $0x640] sm:$0xf]  ;;  %v5049_v43 = vld [vmem:[%s5922_s5 + $0x64c] sm:$0xf0]  ;;  %v4354_v39 = vor.u32 %v5017_v41, %v4353_v53  ;;  %v4935_v25 = vld [vmem:[%s5922_s5 + $0x2c4] sm:$0xf]  ;;  %v3910_v53 = vor.u32 %v4903_v22, %v3907_v24 }
 0x208   : > { %v4609_v44 = vld [vmem:[%s5922_s5 + $0x740] sm:$0xf]  ;;  %v5081_v45 = vld [vmem:[%s5922_s5 + $0x74c] sm:$0xf0]  ;;  %v4482_v55 = vor.u32 %v5049_v43, %v4481_v42  ;;  %2740 = vmatpush.bf16.msrb.mxu0 %v4226_v46  ;;  %v4035_v30 = vld [vmem:[%s5922_s5 + $0x2d0] sm:$0xf0] }
 0x209   : > { %v4209_v47 = vld [vmem:[%s5922_s5 + $0x420] sm:$0xf]  ;;  %v4981_v48 = vld [vmem:[%s5922_s5 + $0x42c] sm:$0xf0]  ;;  %v4610_v51 = vor.u32 %v5081_v45, %v4609_v44  ;;  %2753 = vmatpush.bf16.msrb.mxu1 %v4354_v39  ;;  %v4967_v18 = vld [vmem:[%s5922_s5 + $0x3c4] sm:$0xf]  ;;  %v4038_v40 = vor.u32 %v4935_v25, %v4035_v30 }
 0x20a   : > { %v4337_v50 = vld [vmem:[%s5922_s5 + $0x520] sm:$0xf]  ;;  %v5013_v52 = vld [vmem:[%s5922_s5 + $0x52c] sm:$0xf0]  ;;  %v4210_v60 = vor.u32 %v4981_v48, %v4209_v47  ;;  %2766 = vmatpush.bf16.msrb.mxu2 %v4482_v55  ;;  %v4163_v31 = vld [vmem:[%s5922_s5 + $0x3d0] sm:$0xf0] }
 0x20b   : > { %v4465_v54 = vld [vmem:[%s5922_s5 + $0x620] sm:$0xf]  ;;  %v5045_v58 = vld [vmem:[%s5922_s5 + $0x62c] sm:$0xf0]  ;;  %v4338_v0 = vor.u32 %v5013_v52, %v4337_v50  ;;  %2779 = vmatpush.bf16.msrb.mxu3 %v4610_v51  ;;  %v4867_v36 = vld [vmem:[%s5922_s5 + $0xa4] sm:$0xf]  ;;  %v4166_v44 = vor.u32 %v4967_v18, %v4163_v31 }
 0x20c   : > { %v4593_v56 = vld [vmem:[%s5922_s5 + $0x720] sm:$0xf]  ;;  %v5077_v59 = vld [vmem:[%s5922_s5 + $0x72c] sm:$0xf0]  ;;  %v4466_v3 = vor.u32 %v5045_v58, %v4465_v54  ;;  %2741 = vmatpush.bf16.msrb.mxu0 %v4210_v60  ;;  %v3763_v41 = vld [vmem:[%s5922_s5 + $0xb0] sm:$0xf0] }
 0x20d   : > { %v4193_v61 = vld [vmem:[%s5922_s5 + $0x400] sm:$0xf]  ;;  %v4977_v63 = vld [vmem:[%s5922_s5 + $0x40c] sm:$0xf0]  ;;  %v4594_v8 = vor.u32 %v5077_v59, %v4593_v56  ;;  %2754 = vmatpush.bf16.msrb.mxu1 %v4338_v0  ;;  %v4899_v42 = vld [vmem:[%s5922_s5 + $0x1a4] sm:$0xf]  ;;  %v3766_v48 = vor.u32 %v4867_v36, %v3763_v41 }
 0x20e   : > { %v4321_v5 = vld [vmem:[%s5922_s5 + $0x500] sm:$0xf]  ;;  %v5009_v6 = vld [vmem:[%s5922_s5 + $0x50c] sm:$0xf0]  ;;  %v4194_v13 = vor.u32 %v4977_v63, %v4193_v61  ;;  %2767 = vmatpush.bf16.msrb.mxu2 %v4466_v3  ;;  %v3891_v45 = vld [vmem:[%s5922_s5 + $0x1b0] sm:$0xf0] }
 0x20f   : > { %v4449_v7 = vld [vmem:[%s5922_s5 + $0x600] sm:$0xf]  ;;  %v5041_v9 = vld [vmem:[%s5922_s5 + $0x60c] sm:$0xf0]  ;;  %v4322_v20 = vor.u32 %v5009_v6, %v4321_v5  ;;  %2780 = vmatpush.bf16.msrb.mxu3 %v4594_v8  ;;  %v4931_v46 = vld [vmem:[%s5922_s5 + $0x2a4] sm:$0xf]  ;;  %v3894_v50 = vor.u32 %v4899_v42, %v3891_v45 }
 0x210   : > { %v4577_v1 = vld [vmem:[%s5922_s5 + $0x700] sm:$0xf]  ;;  %v5073_v11 = vld [vmem:[%s5922_s5 + $0x70c] sm:$0xf0]  ;;  %v4450_v21 = vor.u32 %v5041_v9, %v4449_v7  ;;  %2742 = vmatpush.bf16.msrb.mxu0 %v4194_v13  ;;  %v4019_v39 = vld [vmem:[%s5922_s5 + $0x2b0] sm:$0xf0] }
 0x211   : > { %v4578_v28 = vor.u32 %v5073_v11, %v4577_v1  ;;  %2755 = vmatpush.bf16.msrb.mxu1 %v4322_v20  ;;  %v6287_v33 = vld [vmem:[#allocation1 + $0x36] sm:$0xff]  ;;  %v6290_v37 = vld [vmem:[#allocation1 + $0x24] sm:$0xff]  ;;  %v6296_v43 = vld [vmem:[#allocation1 + $0x2d] sm:$0xff]  ;;  %v4022_v51 = vor.u32 %v4931_v46, %v4019_v39 }
 0x212   : > { %2768 = vmatpush.bf16.msrb.mxu2 %v4450_v21  ;;  %v6292_v62 = vld [vmem:[#allocation1 + $0x3f] sm:$0xff]  ;;  %v4963_v55 = vld [vmem:[%s5922_s5 + $0x3a4] sm:$0xf]  ;;  %v4147_v47 = vld [vmem:[%s5922_s5 + $0x3b0] sm:$0xf0] }
 0x213   : > { %2781 = vmatpush.bf16.msrb.mxu3 %v4578_v28  ;;  %v4863_v52 = vld [vmem:[%s5922_s5 + $0x84] sm:$0xf]  ;;  %v3747_v54 = vld [vmem:[%s5922_s5 + $0x90] sm:$0xf0]  ;;  %v4150_v56 = vor.u32 %v4963_v55, %v4147_v47 }
 0x214   : > { %2787 = vmatpush.bf16.msra.mxu0 %v3798_v2  ;;  %2756 = vmatmul.bf16.vlgmr.msrb.gmra.mxu1 %v6296_v43  ;;  %v4895_v58 = vld [vmem:[%s5922_s5 + $0x184] sm:$0xf]  ;;  %v3875_v59 = vld [vmem:[%s5922_s5 + $0x190] sm:$0xf0]  ;;  %v3750_v3 = vor.u32 %v4863_v52, %v3747_v54 }
 0x215   : > { %2800 = vmatpush.bf16.msra.mxu1 %v3926_v4  ;;  %2743 = vmatmul.bf16.vlgmr.msrb.gmra.mxu0 %v6290_v37  ;;  %v4927_v60 = vld [vmem:[%s5922_s5 + $0x284] sm:$0xf]  ;;  %v4003_v61 = vld [vmem:[%s5922_s5 + $0x290] sm:$0xf0]  ;;  %v3878_v5 = vor.u32 %v4895_v58, %v3875_v59 }
 0x216   : > { %2813 = vmatpush.bf16.msra.mxu2 %v4054_v10  ;;  %2782 = vmatmul.bf16.vlgmr.msrb.gmra.mxu3 %v6292_v62  ;;  %v4959_v63 = vld [vmem:[%s5922_s5 + $0x384] sm:$0xf]  ;;  %v4131_v0 = vld [vmem:[%s5922_s5 + $0x390] sm:$0xf0]  ;;  %v4006_v6 = vor.u32 %v4927_v60, %v4003_v61 }
 0x217   : > { %2826 = vmatpush.bf16.msra.mxu3 %v4182_v23  ;;  %2769 = vmatmul.bf16.vlgmr.msrb.gmra.mxu2 %v6287_v33  ;;  %v4859_v7 = vld [vmem:[%s5922_s5 + $0x64] sm:$0xf]  ;;  %v3731_v8 = vld [vmem:[%s5922_s5 + $0x70] sm:$0xf0]  ;;  %v4134_v1 = vor.u32 %v4959_v63, %v4131_v0 }
 0x218   : > { %2788 = vmatpush.bf16.msra.mxu0 %v3782_v34  ;;  %v4891_v9 = vld [vmem:[%s5922_s5 + $0x164] sm:$0xf]  ;;  %v3859_v11 = vld [vmem:[%s5922_s5 + $0x170] sm:$0xf0]  ;;  %v3734_v14 = vor.u32 %v4859_v7, %v3731_v8 }
 0x219   : > { %2801 = vmatpush.bf16.msra.mxu1 %v3910_v53  ;;  %v4923_v57 = vld [vmem:[%s5922_s5 + $0x264] sm:$0xf]  ;;  %v3987_v12 = vld [vmem:[%s5922_s5 + $0x270] sm:$0xf0]  ;;  %v3862_v15 = vor.u32 %v4891_v9, %v3859_v11 }
 0x21a   : > { %2814 = vmatpush.bf16.msra.mxu2 %v4038_v40  ;;  %v4955_v49 = vld [vmem:[%s5922_s5 + $0x364] sm:$0xf]  ;;  %v4115_v13 = vld [vmem:[%s5922_s5 + $0x370] sm:$0xf0]  ;;  %v3990_v19 = vor.u32 %v4923_v57, %v3987_v12 }
 0x21b   : > { %2827 = vmatpush.bf16.msra.mxu3 %v4166_v44  ;;  %v4855_v20 = vld [vmem:[%s5922_s5 + $0x44] sm:$0xf]  ;;  %v3715_v21 = vld [vmem:[%s5922_s5 + $0x50] sm:$0xf0]  ;;  %v4118_v27 = vor.u32 %v4955_v49, %v4115_v13 }
 0x21c   : > { %2789 = vmatpush.bf16.msra.mxu0 %v3766_v48  ;;  %v4887_v26 = vld [vmem:[%s5922_s5 + $0x144] sm:$0xf]  ;;  %v3843_v28 = vld [vmem:[%s5922_s5 + $0x150] sm:$0xf0]  ;;  %v3718_v17 = vor.u32 %v4855_v20, %v3715_v21 }
 0x21d   : > { %2802 = vmatpush.bf16.msra.mxu1 %v3894_v50  ;;  %v4919_v2 = vld [vmem:[%s5922_s5 + $0x244] sm:$0xf]  ;;  %v3971_v4 = vld [vmem:[%s5922_s5 + $0x250] sm:$0xf0]  ;;  %v3846_v22 = vor.u32 %v4887_v26, %v3843_v28 }
 0x21e   : > { %2815 = vmatpush.bf16.msra.mxu2 %v4022_v51  ;;  %v4951_v10 = vld [vmem:[%s5922_s5 + $0x344] sm:$0xf]  ;;  %v4099_v16 = vld [vmem:[%s5922_s5 + $0x350] sm:$0xf0]  ;;  %v3974_v23 = vor.u32 %v4919_v2, %v3971_v4 }
 0x21f   : > { %2828 = vmatpush.bf16.msra.mxu3 %v4150_v56  ;;  %v4851_v24 = vld [vmem:[%s5922_s5 + $0x24] sm:$0xf]  ;;  %v3699_v25 = vld [vmem:[%s5922_s5 + $0x30] sm:$0xf0]  ;;  %v4102_v18 = vor.u32 %v4951_v10, %v4099_v16 }
 0x220   : > { %2790 = vmatpush.bf16.msra.mxu0 %v3750_v3  ;;  %v4883_v30 = vld [vmem:[%s5922_s5 + $0x124] sm:$0xf]  ;;  %v3827_v31 = vld [vmem:[%s5922_s5 + $0x130] sm:$0xf0]  ;;  %v3702_v41 = vor.u32 %v4851_v24, %v3699_v25 }
 0x221   : > { %2803 = vmatpush.bf16.msra.mxu1 %v3878_v5  ;;  %v4915_v34 = vld [vmem:[%s5922_s5 + $0x224] sm:$0xf]  ;;  %v3955_v36 = vld [vmem:[%s5922_s5 + $0x230] sm:$0xf0]  ;;  %v3830_v45 = vor.u32 %v4883_v30, %v3827_v31 }
 0x222   : > { %2816 = vmatpush.bf16.msra.mxu2 %v4006_v6  ;;  %v4947_v53 = vld [vmem:[%s5922_s5 + $0x324] sm:$0xf]  ;;  %v4083_v40 = vld [vmem:[%s5922_s5 + $0x330] sm:$0xf0]  ;;  %v3958_v46 = vor.u32 %v4915_v34, %v3955_v36 }
 0x223   : > { %2829 = vmatpush.bf16.msra.mxu3 %v4134_v1  ;;  %v4847_v42 = vld [vmem:[%s5922_s5 + $0x4] sm:$0xf]  ;;  %v3683_v44 = vld [vmem:[%s5922_s5 + $0x10] sm:$0xf0]  ;;  %v4086_v48 = vor.u32 %v4947_v53, %v4083_v40 }
 0x224   : > { %2791 = vmatpush.bf16.msra.mxu0 %v3734_v14  ;;  %v4879_v39 = vld [vmem:[%s5922_s5 + $0x104] sm:$0xf]  ;;  %v3811_v55 = vld [vmem:[%s5922_s5 + $0x110] sm:$0xf0]  ;;  %v3686_v59 = vor.u32 %v4847_v42, %v3683_v44 }
 0x225   : > { %2804 = vmatpush.bf16.msra.mxu1 %v3862_v15  ;;  %v4911_v47 = vld [vmem:[%s5922_s5 + $0x204] sm:$0xf]  ;;  %v3939_v50 = vld [vmem:[%s5922_s5 + $0x210] sm:$0xf0]  ;;  %v3814_v0 = vor.u32 %v4879_v39, %v3811_v55 }
 0x226   : > { %2817 = vmatpush.bf16.msra.mxu2 %v3990_v19  ;;  %v4943_v51 = vld [vmem:[%s5922_s5 + $0x304] sm:$0xf]  ;;  %v4067_v52 = vld [vmem:[%s5922_s5 + $0x310] sm:$0xf0]  ;;  %v3942_v3 = vor.u32 %v4911_v47, %v3939_v50 }
 0x227   : > { %2830 = vmatpush.bf16.msra.mxu3 %v4118_v27  ;;  %v5003_v54 = vld [vmem:[%s5922_s5 + $0x4e4] sm:$0xf]  ;;  %v4307_v58 = vld [vmem:[%s5922_s5 + $0x4f0] sm:$0xf0]  ;;  %v4070_v7 = vor.u32 %v4943_v51, %v4067_v52 }
 0x228   : > { %2792 = vmatpush.bf16.msra.mxu0 %v3718_v17  ;;  %v5035_v56 = vld [vmem:[%s5922_s5 + $0x5e4] sm:$0xf]  ;;  %v4435_v60 = vld [vmem:[%s5922_s5 + $0x5f0] sm:$0xf0]  ;;  %v4310_v8 = vor.u32 %v5003_v54, %v4307_v58 }
 0x229   : > { %2805 = vmatpush.bf16.msra.mxu1 %v3846_v22  ;;  %v5067_v61 = vld [vmem:[%s5922_s5 + $0x6e4] sm:$0xf]  ;;  %v4563_v63 = vld [vmem:[%s5922_s5 + $0x6f0] sm:$0xf0]  ;;  %v4438_v9 = vor.u32 %v5035_v56, %v4435_v60 }
 0x22a   : > { %2818 = vmatpush.bf16.msra.mxu2 %v3974_v23  ;;  %v5099_v5 = vld [vmem:[%s5922_s5 + $0x7e4] sm:$0xf]  ;;  %v4691_v6 = vld [vmem:[%s5922_s5 + $0x7f0] sm:$0xf0]  ;;  %v4566_v1 = vor.u32 %v5067_v61, %v4563_v63 }
 0x22b   : > { %2831 = vmatpush.bf16.msra.mxu3 %v4102_v18  ;;  %v4999_v11 = vld [vmem:[%s5922_s5 + $0x4c4] sm:$0xf]  ;;  %v4291_v57 = vld [vmem:[%s5922_s5 + $0x4d0] sm:$0xf0]  ;;  %v4694_v49 = vor.u32 %v5099_v5, %v4691_v6 }
 0x22c   : > { %2793 = vmatpush.bf16.msra.mxu0 %v3702_v41  ;;  %v5031_v12 = vld [vmem:[%s5922_s5 + $0x5c4] sm:$0xf]  ;;  %v4419_v13 = vld [vmem:[%s5922_s5 + $0x5d0] sm:$0xf0]  ;;  %v4294_v21 = vor.u32 %v4999_v11, %v4291_v57 }
 0x22d   : > { %2806 = vmatpush.bf16.msra.mxu1 %v3830_v45  ;;  %v5063_v14 = vld [vmem:[%s5922_s5 + $0x6c4] sm:$0xf]  ;;  %v4547_v15 = vld [vmem:[%s5922_s5 + $0x6d0] sm:$0xf0]  ;;  %v4422_v26 = vor.u32 %v5031_v12, %v4419_v13 }
 0x22e   : > { %2819 = vmatpush.bf16.msra.mxu2 %v3958_v46  ;;  %v5095_v19 = vld [vmem:[%s5922_s5 + $0x7c4] sm:$0xf]  ;;  %v4675_v20 = vld [vmem:[%s5922_s5 + $0x7d0] sm:$0xf0]  ;;  %v4550_v27 = vor.u32 %v5063_v14, %v4547_v15 }
 0x22f   : > { %2832 = vmatpush.bf16.msra.mxu3 %v4086_v48  ;;  %v4995_v28 = vld [vmem:[%s5922_s5 + $0x4a4] sm:$0xf]  ;;  %v4275_v2 = vld [vmem:[%s5922_s5 + $0x4b0] sm:$0xf0]  ;;  %v4678_v10 = vor.u32 %v5095_v19, %v4675_v20 }
 0x230   : > { %2794 = vmatpush.bf16.msra.mxu0 %v3686_v59  ;;  %v5027_v4 = vld [vmem:[%s5922_s5 + $0x5a4] sm:$0xf]  ;;  %v4403_v16 = vld [vmem:[%s5922_s5 + $0x5b0] sm:$0xf0]  ;;  %v4278_v25 = vor.u32 %v4995_v28, %v4275_v2 }
 0x231   : > { %2807 = vmatpush.bf16.msra.mxu1 %v3814_v0  ;;  %v5059_v17 = vld [vmem:[%s5922_s5 + $0x6a4] sm:$0xf]  ;;  %v4531_v22 = vld [vmem:[%s5922_s5 + $0x6b0] sm:$0xf0]  ;;  %v4406_v30 = vor.u32 %v5027_v4, %v4403_v16 }
 0x232   : > { %2820 = vmatpush.bf16.msra.mxu2 %v3942_v3  ;;  %v5091_v23 = vld [vmem:[%s5922_s5 + $0x7a4] sm:$0xf]  ;;  %v4659_v24 = vld [vmem:[%s5922_s5 + $0x7b0] sm:$0xf0]  ;;  %v4534_v18 = vor.u32 %v5059_v17, %v4531_v22 }
 0x233   : > { %2833 = vmatpush.bf16.msra.mxu3 %v4070_v7  ;;  %2795 = vmatmul.bf16.vlgmr.msra.gmra.mxu0 %v6238_v29  ;;  %v4991_v31 = vld [vmem:[%s5922_s5 + $0x484] sm:$0xf]  ;;  %v4259_v34 = vld [vmem:[%s5922_s5 + $0x490] sm:$0xf0]  ;;  %v4662_v53 = vor.u32 %v5091_v23, %v4659_v24 }
 0x234   : > { %2839 = vmatpush.bf16.msrb.mxu0 %v4310_v8  ;;  %2808 = vmatmul.bf16.vlgmr.msra.gmra.mxu1 %v6244_v38  ;;  %v5023_v36 = vld [vmem:[%s5922_s5 + $0x584] sm:$0xf]  ;;  %v4387_v40 = vld [vmem:[%s5922_s5 + $0x590] sm:$0xf0]  ;;  %v4262_v46 = vor.u32 %v4991_v31, %v4259_v34  ;;  %v3801_v34 = vld [vmem:[%s5922_s5 + $0xe8] sm:$0xf] }
 0x235   : > { %2852 = vmatpush.bf16.msrb.mxu1 %v4438_v9  ;;  %2821 = vmatmul.bf16.vlgmr.msra.gmra.mxu2 %v6236_v35  ;;  %v5055_v41 = vld [vmem:[%s5922_s5 + $0x684] sm:$0xf]  ;;  %v4515_v42 = vld [vmem:[%s5922_s5 + $0x690] sm:$0xf0]  ;;  %v4390_v39 = vor.u32 %v5023_v36, %v4387_v40  ;;  %v4878_v36 = vld [vmem:[%s5922_s5 + $0xf4] sm:$0xf0] }
 0x236   : > { %2865 = vmatpush.bf16.msrb.mxu2 %v4566_v1  ;;  %2834 = vmatmul.bf16.vlgmr.msra.gmra.mxu3 %v6240_v32  ;;  %v5087_v44 = vld [vmem:[%s5922_s5 + $0x784] sm:$0xf]  ;;  %v4643_v45 = vld [vmem:[%s5922_s5 + $0x790] sm:$0xf0]  ;;  %v4518_v55 = vor.u32 %v5055_v41, %v4515_v42  ;;  %v4910_v41 = vld [vmem:[%s5922_s5 + $0x1f4] sm:$0xf0] }
 0x237   : > { %2878 = vmatpush.bf16.msrb.mxu3 %v4694_v49  ;;  %v4987_v47 = vld [vmem:[%s5922_s5 + $0x464] sm:$0xf]  ;;  %v4243_v48 = vld [vmem:[%s5922_s5 + $0x470] sm:$0xf0]  ;;  %v4646_v51 = vor.u32 %v5087_v44, %v4643_v45  ;;  %v4057_v42 = vld [vmem:[%s5922_s5 + $0x2e8] sm:$0xf] }
 0x238   : > { %2840 = vmatpush.bf16.msrb.mxu0 %v4294_v21  ;;  %v5019_v50 = vld [vmem:[%s5922_s5 + $0x564] sm:$0xf]  ;;  %v4371_v52 = vld [vmem:[%s5922_s5 + $0x570] sm:$0xf0]  ;;  %v4246_v60 = vor.u32 %v4987_v47, %v4243_v48  ;;  %v4942_v44 = vld [vmem:[%s5922_s5 + $0x2f4] sm:$0xf0]  ;;  %v3802_v48 = vor.u32 %v4878_v36, %v3801_v34 }
 0x239   : > { %2853 = vmatpush.bf16.msrb.mxu1 %v4422_v26  ;;  %v5051_v54 = vld [vmem:[%s5922_s5 + $0x664] sm:$0xf]  ;;  %v4499_v58 = vld [vmem:[%s5922_s5 + $0x670] sm:$0xf0]  ;;  %v4374_v61 = vor.u32 %v5019_v50, %v4371_v52  ;;  %v3785_v52 = vld [vmem:[%s5922_s5 + $0xc8] sm:$0xf] }
 0x23a   : > { %2866 = vmatpush.bf16.msrb.mxu2 %v4550_v27  ;;  %v5083_v56 = vld [vmem:[%s5922_s5 + $0x764] sm:$0xf]  ;;  %v4627_v59 = vld [vmem:[%s5922_s5 + $0x770] sm:$0xf0]  ;;  %v4502_v63 = vor.u32 %v5051_v54, %v4499_v58  ;;  %v4874_v54 = vld [vmem:[%s5922_s5 + $0xd4] sm:$0xf0] }
 0x23b   : > { %2879 = vmatpush.bf16.msrb.mxu3 %v4678_v10  ;;  %v4983_v0 = vld [vmem:[%s5922_s5 + $0x444] sm:$0xf]  ;;  %v4227_v3 = vld [vmem:[%s5922_s5 + $0x450] sm:$0xf0]  ;;  %v4630_v6 = vor.u32 %v5083_v56, %v4627_v59  ;;  %v3913_v58 = vld [vmem:[%s5922_s5 + $0x1c8] sm:$0xf] }
 0x23c   : > { %2841 = vmatpush.bf16.msrb.mxu0 %v4278_v25  ;;  %v5015_v5 = vld [vmem:[%s5922_s5 + $0x544] sm:$0xf]  ;;  %v4355_v7 = vld [vmem:[%s5922_s5 + $0x550] sm:$0xf0]  ;;  %v4230_v57 = vor.u32 %v4983_v0, %v4227_v3  ;;  %v4906_v59 = vld [vmem:[%s5922_s5 + $0x1d4] sm:$0xf0]  ;;  %v3786_v3 = vor.u32 %v4874_v54, %v3785_v52 }
 0x23d   : > { %2854 = vmatpush.bf16.msrb.mxu1 %v4406_v30  ;;  %v5047_v8 = vld [vmem:[%s5922_s5 + $0x644] sm:$0xf]  ;;  %v4483_v9 = vld [vmem:[%s5922_s5 + $0x650] sm:$0xf0]  ;;  %v4358_v12 = vor.u32 %v5015_v5, %v4355_v7  ;;  %v4970_v0 = vld [vmem:[%s5922_s5 + $0x3d4] sm:$0xf0]  ;;  %v3914_v5 = vor.u32 %v4906_v59, %v3913_v58 }
 0x23e   : > { %2867 = vmatpush.bf16.msrb.mxu2 %v4534_v18  ;;  %v5079_v1 = vld [vmem:[%s5922_s5 + $0x744] sm:$0xf]  ;;  %v4611_v11 = vld [vmem:[%s5922_s5 + $0x750] sm:$0xf0]  ;;  %v4486_v49 = vor.u32 %v5047_v8, %v4483_v9  ;;  %v3769_v7 = vld [vmem:[%s5922_s5 + $0xa8] sm:$0xf] }
 0x23f   : > { %2880 = vmatpush.bf16.msrb.mxu3 %v4662_v53  ;;  %v4979_v13 = vld [vmem:[%s5922_s5 + $0x424] sm:$0xf]  ;;  %v4211_v14 = vld [vmem:[%s5922_s5 + $0x430] sm:$0xf0]  ;;  %v4614_v19 = vor.u32 %v5079_v1, %v4611_v11  ;;  %v3929_v53 = vld [vmem:[%s5922_s5 + $0x1e8] sm:$0xf] }
 0x240   : > { %2842 = vmatpush.bf16.msrb.mxu0 %v4262_v46  ;;  %v5011_v15 = vld [vmem:[%s5922_s5 + $0x524] sm:$0xf]  ;;  %v4339_v20 = vld [vmem:[%s5922_s5 + $0x530] sm:$0xf0]  ;;  %v4214_v2 = vor.u32 %v4979_v13, %v4211_v14  ;;  %v3930_v50 = vor.u32 %v4910_v41, %v3929_v53  ;;  %v4870_v8 = vld [vmem:[%s5922_s5 + $0xb4] sm:$0xf0] }
 0x241   : > { %2855 = vmatpush.bf16.msrb.mxu1 %v4390_v39  ;;  %v5043_v21 = vld [vmem:[%s5922_s5 + $0x624] sm:$0xf]  ;;  %v4467_v26 = vld [vmem:[%s5922_s5 + $0x630] sm:$0xf0]  ;;  %v4342_v16 = vor.u32 %v5011_v15, %v4339_v20  ;;  %v4185_v39 = vld [vmem:[%s5922_s5 + $0x3e8] sm:$0xf]  ;;  %v3770_v14 = vor.u32 %v4870_v8, %v3769_v7 }
 0x242   : > { %2868 = vmatpush.bf16.msrb.mxu2 %v4518_v55  ;;  %v5075_v27 = vld [vmem:[%s5922_s5 + $0x724] sm:$0xf]  ;;  %v4595_v28 = vld [vmem:[%s5922_s5 + $0x730] sm:$0xf0]  ;;  %v4470_v17 = vor.u32 %v5043_v21, %v4467_v26  ;;  %v4974_v55 = vld [vmem:[%s5922_s5 + $0x3f4] sm:$0xf0] }
 0x243   : > { %2881 = vmatpush.bf16.msrb.mxu3 %v4646_v51  ;;  %v4975_v4 = vld [vmem:[%s5922_s5 + $0x404] sm:$0xf]  ;;  %v4195_v10 = vld [vmem:[%s5922_s5 + $0x410] sm:$0xf0]  ;;  %v4598_v25 = vor.u32 %v5075_v27, %v4595_v28  ;;  %v4058_v51 = vor.u32 %v4942_v44, %v4057_v42  ;;  %v4186_v56 = vor.u32 %v4974_v55, %v4185_v39  ;;  %v3897_v9 = vld [vmem:[%s5922_s5 + $0x1a8] sm:$0xf] }
 0x244   : > { %2843 = vmatpush.bf16.msrb.mxu0 %v4246_v60  ;;  %v5007_v22 = vld [vmem:[%s5922_s5 + $0x504] sm:$0xf]  ;;  %v4323_v23 = vld [vmem:[%s5922_s5 + $0x510] sm:$0xf0]  ;;  %v4198_v40 = vor.u32 %v4975_v4, %v4195_v10  ;;  %v4041_v60 = vld [vmem:[%s5922_s5 + $0x2c8] sm:$0xf] }
 0x245   : > { %2856 = vmatpush.bf16.msrb.mxu1 %v4374_v61  ;;  %v5039_v24 = vld [vmem:[%s5922_s5 + $0x604] sm:$0xf]  ;;  %v4451_v30 = vld [vmem:[%s5922_s5 + $0x610] sm:$0xf0]  ;;  %v4326_v45 = vor.u32 %v5007_v22, %v4323_v23  ;;  %v4938_v61 = vld [vmem:[%s5922_s5 + $0x2d4] sm:$0xf0] }
 0x246   : > { %2869 = vmatpush.bf16.msrb.mxu2 %v4502_v63  ;;  %v5071_v18 = vld [vmem:[%s5922_s5 + $0x704] sm:$0xf]  ;;  %v4579_v31 = vld [vmem:[%s5922_s5 + $0x710] sm:$0xf0]  ;;  %v4454_v46 = vor.u32 %v5039_v24, %v4451_v30  ;;  %v4169_v63 = vld [vmem:[%s5922_s5 + $0x3c8] sm:$0xf] }
 0x247   : > { %2882 = vmatpush.bf16.msrb.mxu3 %v4630_v6  ;;  %v4582_v47 = vor.u32 %v5071_v18, %v4579_v31  ;;  %v4042_v6 = vor.u32 %v4938_v61, %v4041_v60  ;;  %v4170_v1 = vor.u32 %v4970_v0, %v4169_v63  ;;  %v4902_v11 = vld [vmem:[%s5922_s5 + $0x1b4] sm:$0xf0]  ;;  %v3881_v21 = vld [vmem:[%s5922_s5 + $0x188] sm:$0xf] }
 0x248   : > { %2844 = vmatpush.bf16.msrb.mxu0 %v4230_v57  ;;  %v4025_v57 = vld [vmem:[%s5922_s5 + $0x2a8] sm:$0xf]  ;;  %v4966_v13 = vld [vmem:[%s5922_s5 + $0x3b4] sm:$0xf0] }
 0x249   : > { %2857 = vmatpush.bf16.msrb.mxu1 %v4358_v12  ;;  %v4934_v12 = vld [vmem:[%s5922_s5 + $0x2b4] sm:$0xf0]  ;;  %v4137_v28 = vld [vmem:[%s5922_s5 + $0x388] sm:$0xf] }
 0x24a   : > { %2870 = vmatpush.bf16.msrb.mxu2 %v4486_v49  ;;  %v4153_v49 = vld [vmem:[%s5922_s5 + $0x3a8] sm:$0xf]  ;;  %v4026_v15 = vor.u32 %v4934_v12, %v4025_v57  ;;  %v4866_v20 = vld [vmem:[%s5922_s5 + $0x94] sm:$0xf0] }
 0x24b   : > { %2883 = vmatpush.bf16.msrb.mxu3 %v4614_v19  ;;  %v3753_v19 = vld [vmem:[%s5922_s5 + $0x88] sm:$0xf]  ;;  %v4898_v26 = vld [vmem:[%s5922_s5 + $0x194] sm:$0xf0] }
 0x24c   : > { %2845 = vmatpush.bf16.msrb.mxu0 %v4214_v2  ;;  %v4930_v27 = vld [vmem:[%s5922_s5 + $0x294] sm:$0xf0]  ;;  %v3754_v2 = vor.u32 %v4866_v20, %v3753_v19  ;;  %v3882_v4 = vor.u32 %v4898_v26, %v3881_v21  ;;  %v3865_v22 = vld [vmem:[%s5922_s5 + $0x168] sm:$0xf] }
 0x24d   : > { %2858 = vmatpush.bf16.msrb.mxu1 %v4342_v16  ;;  %v3737_v16 = vld [vmem:[%s5922_s5 + $0x68] sm:$0xf]  ;;  %v4894_v24 = vld [vmem:[%s5922_s5 + $0x174] sm:$0xf0] }
 0x24e   : > { %2871 = vmatpush.bf16.msrb.mxu2 %v4470_v17  ;;  %v4862_v17 = vld [vmem:[%s5922_s5 + $0x74] sm:$0xf0]  ;;  %v4121_v18 = vld [vmem:[%s5922_s5 + $0x368] sm:$0xf]  ;;  %v3866_v36 = vor.u32 %v4894_v24, %v3865_v22 }
 0x24f   : > { %2884 = vmatpush.bf16.msrb.mxu3 %v4598_v25  ;;  %v3993_v25 = vld [vmem:[%s5922_s5 + $0x268] sm:$0xf]  ;;  %v4926_v30 = vld [vmem:[%s5922_s5 + $0x274] sm:$0xf0]  ;;  %v3738_v34 = vor.u32 %v4862_v17, %v3737_v16 }
 0x250   : > { %2846 = vmatpush.bf16.msrb.mxu0 %v4198_v40  ;;  %v4958_v31 = vld [vmem:[%s5922_s5 + $0x374] sm:$0xf0]  ;;  %v3994_v53 = vor.u32 %v4926_v30, %v3993_v25  ;;  %v3721_v40 = vld [vmem:[%s5922_s5 + $0x48] sm:$0xf] }
 0x251   : > { %2859 = vmatpush.bf16.msrb.mxu1 %v4326_v45  ;;  %v4858_v41 = vld [vmem:[%s5922_s5 + $0x54] sm:$0xf0]  ;;  %v3849_v42 = vld [vmem:[%s5922_s5 + $0x148] sm:$0xf]  ;;  %v4122_v44 = vor.u32 %v4958_v31, %v4121_v18 }
 0x252   : > { %2872 = vmatpush.bf16.msrb.mxu2 %v4454_v46  ;;  %v4890_v45 = vld [vmem:[%s5922_s5 + $0x154] sm:$0xf0]  ;;  %v3977_v46 = vld [vmem:[%s5922_s5 + $0x248] sm:$0xf] }
 0x253   : > { %2885 = vmatpush.bf16.msrb.mxu3 %v4582_v47  ;;  %2847 = vmatmul.bf16.vlgmr.msrb.gmra.mxu0 %v6290_v37  ;;  %v4154_v37 = vor.u32 %v4966_v13, %v4153_v49  ;;  %v4922_v39 = vld [vmem:[%s5922_s5 + $0x254] sm:$0xf0]  ;;  %v4105_v55 = vld [vmem:[%s5922_s5 + $0x348] sm:$0xf] }
 0x254   : > { %2891 = vmatpush.bf16.msra.mxu0 %v3802_v48  ;;  %2860 = vmatmul.bf16.vlgmr.msrb.gmra.mxu1 %v6296_v43  ;;  %v4962_v43 = vld [vmem:[%s5922_s5 + $0x394] sm:$0xf0]  ;;  %v3722_v48 = vor.u32 %v4858_v41, %v3721_v40  ;;  %v3705_v52 = vld [vmem:[%s5922_s5 + $0x28] sm:$0xf] }
 0x255   : > { %2904 = vmatpush.bf16.msra.mxu1 %v3930_v50  ;;  %2873 = vmatmul.bf16.vlgmr.msrb.gmra.mxu2 %v6287_v33  ;;  %v3898_v33 = vor.u32 %v4902_v11, %v3897_v9  ;;  %v4138_v23 = vor.u32 %v4962_v43, %v4137_v28  ;;  %v4954_v47 = vld [vmem:[%s5922_s5 + $0x354] sm:$0xf0]  ;;  %v3850_v50 = vor.u32 %v4890_v45, %v3849_v42  ;;  %v3833_v58 = vld [vmem:[%s5922_s5 + $0x128] sm:$0xf] }
 0x256   : > { %2917 = vmatpush.bf16.msra.mxu2 %v4058_v51  ;;  %2886 = vmatmul.bf16.vlgmr.msrb.gmra.mxu3 %v6292_v62  ;;  %v4009_v62 = vld [vmem:[%s5922_s5 + $0x288] sm:$0xf]  ;;  %v3978_v51 = vor.u32 %v4922_v39, %v3977_v46  ;;  %v4854_v54 = vld [vmem:[%s5922_s5 + $0x34] sm:$0xf0] }
 0x257   : > { %2930 = vmatpush.bf16.msra.mxu3 %v4186_v56  ;;  %v4010_v10 = vor.u32 %v4930_v27, %v4009_v62  ;;  %v4106_v56 = vor.u32 %v4954_v47, %v4105_v55  ;;  %v4886_v59 = vld [vmem:[%s5922_s5 + $0x134] sm:$0xf0]  ;;  %v3961_v60 = vld [vmem:[%s5922_s5 + $0x228] sm:$0xf] }
 0x258   : > { %2892 = vmatpush.bf16.msra.mxu0 %v3786_v3  ;;  %v4918_v61 = vld [vmem:[%s5922_s5 + $0x234] sm:$0xf0]  ;;  %v4089_v63 = vld [vmem:[%s5922_s5 + $0x328] sm:$0xf]  ;;  %v3706_v3 = vor.u32 %v4854_v54, %v3705_v52  ;;  %v3834_v7 = vor.u32 %v4886_v59, %v3833_v58 }
 0x259   : > { %2905 = vmatpush.bf16.msra.mxu1 %v3914_v5  ;;  %v4950_v0 = vld [vmem:[%s5922_s5 + $0x334] sm:$0xf0]  ;;  %v3689_v5 = vld [vmem:[%s5922_s5 + $0x8] sm:$0xf]  ;;  %v3962_v8 = vor.u32 %v4918_v61, %v3961_v60 }
 0x25a   : > { %2918 = vmatpush.bf16.msra.mxu2 %v4042_v6  ;;  %v4850_v6 = vld [vmem:[%s5922_s5 + $0x14] sm:$0xf0]  ;;  %v3817_v9 = vld [vmem:[%s5922_s5 + $0x108] sm:$0xf]  ;;  %v4090_v57 = vor.u32 %v4950_v0, %v4089_v63 }
 0x25b   : > { %2931 = vmatpush.bf16.msra.mxu3 %v4170_v1  ;;  %v4882_v1 = vld [vmem:[%s5922_s5 + $0x114] sm:$0xf0]  ;;  %v3945_v11 = vld [vmem:[%s5922_s5 + $0x208] sm:$0xf]  ;;  %v3690_v19 = vor.u32 %v4850_v6, %v3689_v5 }
 0x25c   : > { %2893 = vmatpush.bf16.msra.mxu0 %v3770_v14  ;;  %v4914_v12 = vld [vmem:[%s5922_s5 + $0x214] sm:$0xf0]  ;;  %v4073_v49 = vld [vmem:[%s5922_s5 + $0x308] sm:$0xf]  ;;  %v3818_v26 = vor.u32 %v4882_v1, %v3817_v9 }
 0x25d   : > { %2906 = vmatpush.bf16.msra.mxu1 %v3898_v33  ;;  %v4946_v13 = vld [vmem:[%s5922_s5 + $0x314] sm:$0xf0]  ;;  %v4313_v14 = vld [vmem:[%s5922_s5 + $0x4e8] sm:$0xf]  ;;  %v3946_v62 = vor.u32 %v4914_v12, %v3945_v11 }
 0x25e   : > { %2919 = vmatpush.bf16.msra.mxu2 %v4026_v15  ;;  %v5006_v33 = vld [vmem:[%s5922_s5 + $0x4f4] sm:$0xf0]  ;;  %v4441_v15 = vld [vmem:[%s5922_s5 + $0x5e8] sm:$0xf]  ;;  %v4074_v43 = vor.u32 %v4946_v13, %v4073_v49 }
 0x25f   : > { %2932 = vmatpush.bf16.msra.mxu3 %v4154_v37  ;;  %v5038_v20 = vld [vmem:[%s5922_s5 + $0x5f4] sm:$0xf0]  ;;  %v4569_v21 = vld [vmem:[%s5922_s5 + $0x6e8] sm:$0xf] }
 0x260   : > { %2894 = vmatpush.bf16.msra.mxu0 %v3754_v2  ;;  %v5070_v37 = vld [vmem:[%s5922_s5 + $0x6f4] sm:$0xf0]  ;;  %v4697_v27 = vld [vmem:[%s5922_s5 + $0x7e8] sm:$0xf]  ;;  %v4314_v2 = vor.u32 %v5006_v33, %v4313_v14 }
 0x261   : > { %2907 = vmatpush.bf16.msra.mxu1 %v3882_v4  ;;  %v5102_v28 = vld [vmem:[%s5922_s5 + $0x7f4] sm:$0xf0]  ;;  %v4442_v4 = vor.u32 %v5038_v20, %v4441_v15  ;;  %v4297_v16 = vld [vmem:[%s5922_s5 + $0x4c8] sm:$0xf] }
 0x262   : > { %2920 = vmatpush.bf16.msra.mxu2 %v4010_v10  ;;  %v4570_v10 = vor.u32 %v5070_v37, %v4569_v21  ;;  %v5002_v17 = vld [vmem:[%s5922_s5 + $0x4d4] sm:$0xf0]  ;;  %v4425_v22 = vld [vmem:[%s5922_s5 + $0x5c8] sm:$0xf]  ;;  %v6535_v37 = vld [vmem:[%s526_s19] sm:$0xf] }
 0x263   : > { %2933 = vmatpush.bf16.msra.mxu3 %v4138_v23  ;;  %v4698_v23 = vor.u32 %v5102_v28, %v4697_v27  ;;  %v5034_v24 = vld [vmem:[%s5922_s5 + $0x5d4] sm:$0xf0]  ;;  %v4553_v25 = vld [vmem:[%s5922_s5 + $0x6c8] sm:$0xf] }
 0x264   : > { %2895 = vmatpush.bf16.msra.mxu0 %v3738_v34  ;;  %v5066_v30 = vld [vmem:[%s5922_s5 + $0x6d4] sm:$0xf0]  ;;  %v4681_v18 = vld [vmem:[%s5922_s5 + $0x7c8] sm:$0xf]  ;;  %v4298_v34 = vor.u32 %v5002_v17, %v4297_v16  ;;  %v2675_v16 = vperm.slane %v6535_v37, 0 }
 0x265   : > { %2908 = vmatpush.bf16.msra.mxu1 %v3866_v36  ;;  %v5098_v31 = vld [vmem:[%s5922_s5 + $0x7d4] sm:$0xf0]  ;;  %v4426_v36 = vor.u32 %v5034_v24, %v4425_v22  ;;  %v4281_v40 = vld [vmem:[%s5922_s5 + $0x4a8] sm:$0xf] }
 0x266   : > { %2921 = vmatpush.bf16.msra.mxu2 %v3994_v53  ;;  %v4554_v53 = vor.u32 %v5066_v30, %v4553_v25  ;;  %v4998_v41 = vld [vmem:[%s5922_s5 + $0x4b4] sm:$0xf0]  ;;  %v4409_v42 = vld [vmem:[%s5922_s5 + $0x5a8] sm:$0xf] }
 0x267   : > { %2934 = vmatpush.bf16.msra.mxu3 %v4122_v44  ;;  %v4682_v44 = vor.u32 %v5098_v31, %v4681_v18  ;;  %v5030_v45 = vld [vmem:[%s5922_s5 + $0x5b4] sm:$0xf0]  ;;  %v4537_v46 = vld [vmem:[%s5922_s5 + $0x6a8] sm:$0xf] }
 0x268   : > { %2896 = vmatpush.bf16.msra.mxu0 %v3722_v48  ;;  %v5062_v39 = vld [vmem:[%s5922_s5 + $0x6b4] sm:$0xf0]  ;;  %v4665_v55 = vld [vmem:[%s5922_s5 + $0x7a8] sm:$0xf]  ;;  %v4282_v48 = vor.u32 %v4998_v41, %v4281_v40 }
 0x269   : > { %2909 = vmatpush.bf16.msra.mxu1 %v3850_v50  ;;  %v5094_v47 = vld [vmem:[%s5922_s5 + $0x7b4] sm:$0xf0]  ;;  %v4410_v50 = vor.u32 %v5030_v45, %v4409_v42  ;;  %v4393_v54 = vld [vmem:[%s5922_s5 + $0x588] sm:$0xf] }
 0x26a   : > { %2922 = vmatpush.bf16.msra.mxu2 %v3978_v51  ;;  %v4538_v51 = vor.u32 %v5062_v39, %v4537_v46  ;;  %v4994_v52 = vld [vmem:[%s5922_s5 + $0x494] sm:$0xf0]  ;;  %v4649_v59 = vld [vmem:[%s5922_s5 + $0x788] sm:$0xf] }
 0x26b   : > { %2935 = vmatpush.bf16.msra.mxu3 %v4106_v56  ;;  %v5026_v58 = vld [vmem:[%s5922_s5 + $0x594] sm:$0xf0]  ;;  %v4249_v0 = vld [vmem:[%s5922_s5 + $0x468] sm:$0xf] }
 0x26c   : > { %2897 = vmatpush.bf16.msra.mxu0 %v3706_v3  ;;  %v5058_v56 = vld [vmem:[%s5922_s5 + $0x694] sm:$0xf0]  ;;  %v4394_v61 = vor.u32 %v5026_v58, %v4393_v54  ;;  %v4377_v5 = vld [vmem:[%s5922_s5 + $0x568] sm:$0xf]  ;;  %v4940_v58 = vld [vmem:[%s5922_s5 + $0x2ec] sm:$0xf] }
 0x26d   : > { %2910 = vmatpush.bf16.msra.mxu1 %v3834_v7  ;;  %v4990_v3 = vld [vmem:[%s5922_s5 + $0x474] sm:$0xf0]  ;;  %v4633_v1 = vld [vmem:[%s5922_s5 + $0x768] sm:$0xf] }
 0x26e   : > { %2923 = vmatpush.bf16.msra.mxu2 %v3962_v8  ;;  %v5022_v7 = vld [vmem:[%s5922_s5 + $0x574] sm:$0xf0]  ;;  %v4505_v8 = vld [vmem:[%s5922_s5 + $0x668] sm:$0xf] }
 0x26f   : > { %2936 = vmatpush.bf16.msra.mxu3 %v4090_v57  ;;  %v5054_v9 = vld [vmem:[%s5922_s5 + $0x674] sm:$0xf0]  ;;  %v4250_v57 = vor.u32 %v4990_v3, %v4249_v0  ;;  %v4233_v12 = vld [vmem:[%s5922_s5 + $0x448] sm:$0xf]  ;;  %v4378_v49 = vor.u32 %v5022_v7, %v4377_v5 }
 0x270   : > { %2898 = vmatpush.bf16.msra.mxu0 %v3690_v19  ;;  %v5086_v11 = vld [vmem:[%s5922_s5 + $0x774] sm:$0xf0]  ;;  %v4506_v13 = vor.u32 %v5054_v9, %v4505_v8  ;;  %v4361_v33 = vld [vmem:[%s5922_s5 + $0x548] sm:$0xf]  ;;  %v4872_v8 = vld [vmem:[%s5922_s5 + $0xcc] sm:$0xf] }
 0x271   : > { %2911 = vmatpush.bf16.msra.mxu1 %v3818_v26  ;;  %v4986_v14 = vld [vmem:[%s5922_s5 + $0x454] sm:$0xf0]  ;;  %v4634_v19 = vor.u32 %v5086_v11, %v4633_v1  ;;  %v4489_v20 = vld [vmem:[%s5922_s5 + $0x648] sm:$0xf]  ;;  %v3787_v9 = vld [vmem:[%s5922_s5 + $0xd8] sm:$0xf0] }
 0x272   : > { %2924 = vmatpush.bf16.msra.mxu2 %v3946_v62  ;;  %v5018_v15 = vld [vmem:[%s5922_s5 + $0x554] sm:$0xf0]  ;;  %v4617_v26 = vld [vmem:[%s5922_s5 + $0x748] sm:$0xf]  ;;  %v4234_v27 = vor.u32 %v4986_v14, %v4233_v12  ;;  %v4904_v1 = vld [vmem:[%s5922_s5 + $0x1cc] sm:$0xf] }
 0x273   : > { %2937 = vmatpush.bf16.msra.mxu3 %v4074_v43  ;;  %2899 = vmatmul.bf16.vlgmr.msra.gmra.mxu0 %v6238_v29  ;;  %v4666_v29 = vor.u32 %v5094_v47, %v4665_v55  ;;  %v5050_v21 = vld [vmem:[%s5922_s5 + $0x654] sm:$0xf0]  ;;  %v4217_v28 = vld [vmem:[%s5922_s5 + $0x428] sm:$0xf]  ;;  %v4362_v43 = vor.u32 %v5018_v15, %v4361_v33  ;;  %v2705_v46 = vpop.f32.mrf.mxu1  ;;  %v4936_v12 = vld [vmem:[%s5922_s5 + $0x2cc] sm:$0xf] }
 0x274   : > { %2943 = vmatpush.bf16.msrb.mxu0 %v4314_v2  ;;  %2912 = vmatmul.bf16.vlgmr.msra.gmra.mxu1 %v6244_v38  ;;  %v5090_v38 = vld [vmem:[%s5922_s5 + $0x794] sm:$0xf0]  ;;  %v4490_v2 = vor.u32 %v5050_v21, %v4489_v20  ;;  %v4601_v25 = vld [vmem:[%s5922_s5 + $0x728] sm:$0xf]  ;;  %v4968_v33 = vld [vmem:[%s5922_s5 + $0x3cc] sm:$0xf]  ;;  %v3790_v20 = vor.u32 %v4872_v8, %v3787_v9 }
 0x275   : > { %2956 = vmatpush.bf16.msrb.mxu1 %v4442_v4  ;;  %2925 = vmatmul.bf16.vlgmr.msra.gmra.mxu2 %v6236_v35  ;;  %v4265_v35 = vld [vmem:[%s5922_s5 + $0x488] sm:$0xf]  ;;  %v4650_v6 = vor.u32 %v5090_v38, %v4649_v59  ;;  %v5082_v62 = vld [vmem:[%s5922_s5 + $0x754] sm:$0xf0]  ;;  %v4972_v38 = vld [vmem:[%s5922_s5 + $0x3ec] sm:$0xf] }
 0x276   : > { %2969 = vmatpush.bf16.msrb.mxu2 %v4570_v10  ;;  %2938 = vmatmul.bf16.vlgmr.msra.gmra.mxu3 %v6240_v32  ;;  %v4521_v32 = vld [vmem:[%s5922_s5 + $0x688] sm:$0xf]  ;;  %v4266_v60 = vor.u32 %v4994_v52, %v4265_v35  ;;  %v4982_v4 = vld [vmem:[%s5922_s5 + $0x434] sm:$0xf0]  ;;  %v4618_v17 = vor.u32 %v5082_v62, %v4617_v26  ;;  %v4908_v35 = vld [vmem:[%s5922_s5 + $0x1ec] sm:$0xf] }
 0x277   : > { %2982 = vmatpush.bf16.msrb.mxu3 %v4698_v23  ;;  %v4522_v63 = vor.u32 %v5058_v56, %v4521_v32  ;;  %v4345_v10 = vld [vmem:[%s5922_s5 + $0x528] sm:$0xf]  ;;  %v5014_v22 = vld [vmem:[%s5922_s5 + $0x534] sm:$0xf0]  ;;  %v4218_v18 = vor.u32 %v4982_v4, %v4217_v28  ;;  %v4059_v32 = vld [vmem:[%s5922_s5 + $0x2f8] sm:$0xf0] }
 0x278   : > { %2944 = vmatpush.bf16.msrb.mxu0 %v4298_v34  ;;  %v4473_v23 = vld [vmem:[%s5922_s5 + $0x628] sm:$0xf]  ;;  %v5046_v24 = vld [vmem:[%s5922_s5 + $0x634] sm:$0xf0]  ;;  %v2731_v5 = vpop.f32.mrf.mxu3  ;;  %v4062_v7 = vor.u32 %v4940_v58, %v4059_v32  ;;  %v4171_v15 = vld [vmem:[%s5922_s5 + $0x3d8] sm:$0xf0] }
 0x279   : > { %2957 = vmatpush.bf16.msrb.mxu1 %v4426_v36  ;;  %v5078_v30 = vld [vmem:[%s5922_s5 + $0x734] sm:$0xf0]  ;;  %v4201_v31 = vld [vmem:[%s5922_s5 + $0x408] sm:$0xf]  ;;  %v4474_v40 = vor.u32 %v5046_v24, %v4473_v23  ;;  %v4868_v62 = vld [vmem:[%s5922_s5 + $0xac] sm:$0xf] }
 0x27a   : > { %2970 = vmatpush.bf16.msrb.mxu2 %v4554_v53  ;;  %v4978_v34 = vld [vmem:[%s5922_s5 + $0x414] sm:$0xf0]  ;;  %v4346_v53 = vor.u32 %v5014_v22, %v4345_v10  ;;  %v4329_v41 = vld [vmem:[%s5922_s5 + $0x508] sm:$0xf]  ;;  %v4602_v39 = vor.u32 %v5078_v30, %v4601_v25  ;;  %v4900_v28 = vld [vmem:[%s5922_s5 + $0x1ac] sm:$0xf] }
 0x27b   : > { %2983 = vmatpush.bf16.msrb.mxu3 %v4682_v44  ;;  %v5010_v42 = vld [vmem:[%s5922_s5 + $0x514] sm:$0xf0]  ;;  %v4457_v44 = vld [vmem:[%s5922_s5 + $0x608] sm:$0xf]  ;;  %v4202_v54 = vor.u32 %v4978_v34, %v4201_v31  ;;  %v3899_v4 = vld [vmem:[%s5922_s5 + $0x1b8] sm:$0xf0] }
 0x27c   : > { %2945 = vmatpush.bf16.msrb.mxu0 %v4282_v48  ;;  %v5042_v55 = vld [vmem:[%s5922_s5 + $0x614] sm:$0xf0]  ;;  %v4585_v47 = vld [vmem:[%s5922_s5 + $0x708] sm:$0xf]  ;;  %v4330_v56 = vor.u32 %v5010_v42, %v4329_v41  ;;  %v4932_v10 = vld [vmem:[%s5922_s5 + $0x2ac] sm:$0xf]  ;;  %v3902_v34 = vor.u32 %v4900_v28, %v3899_v4 }
 0x27d   : > { %2958 = vmatpush.bf16.msrb.mxu1 %v4410_v50  ;;  %v5074_v48 = vld [vmem:[%s5922_s5 + $0x714] sm:$0xf0]  ;;  %v4876_v50 = vld [vmem:[%s5922_s5 + $0xec] sm:$0xf]  ;;  %v4458_v59 = vor.u32 %v5042_v55, %v4457_v44  ;;  %v4155_v24 = vld [vmem:[%s5922_s5 + $0x3b8] sm:$0xf0] }
 0x27e   : > { %2971 = vmatpush.bf16.msrb.mxu2 %v4538_v51  ;;  %v3803_v51 = vld [vmem:[%s5922_s5 + $0xf8] sm:$0xf0]  ;;  %v6584_v22 = vld [vmem:[#allocation1 + $0x3f] sm:$0xff] }
 0x27f   : > { %2984 = vmatpush.bf16.msrb.mxu3 %v4666_v29  ;;  %v3931_v29 = vld [vmem:[%s5922_s5 + $0x1f8] sm:$0xf0]  ;;  %v3806_v0 = vor.u32 %v4876_v50, %v3803_v51  ;;  %v4964_v23 = vld [vmem:[%s5922_s5 + $0x3ac] sm:$0xf] }
 0x280   : > { %2946 = vmatpush.bf16.msrb.mxu0 %v4266_v60  ;;  %v4187_v60 = vld [vmem:[%s5922_s5 + $0x3f8] sm:$0xf0]  ;;  %v2733_v31 = vpop.f32.mrf.mxu3  ;;  %v4896_v41 = vld [vmem:[%s5922_s5 + $0x18c] sm:$0xf]  ;;  %v4158_v42 = vor.u32 %v4964_v23, %v4155_v24 }
 0x281   : > { %2959 = vmatpush.bf16.msrb.mxu1 %v4394_v61  ;;  %v4190_v11 = vor.u32 %v4972_v38, %v4187_v60  ;;  %v6589_v30 = vld [vmem:[#allocation1 + $0x2d] sm:$0xff]  ;;  %v4956_v60 = vld [vmem:[%s5922_s5 + $0x36c] sm:$0xf] }
 0x282   : > { %2972 = vmatpush.bf16.msrb.mxu2 %v4522_v63  ;;  %v2692_v36 = vpop.f32.mrf.mxu0  ;;  %v4586_v63 = vor.u32 %v5074_v48, %v4585_v47  ;;  %v3883_v44 = vld [vmem:[%s5922_s5 + $0x198] sm:$0xf0]  ;;  %v4888_v8 = vld [vmem:[%s5922_s5 + $0x14c] sm:$0xf] }
 0x283   : > { %2985 = vmatpush.bf16.msrb.mxu3 %v4650_v6  ;;  %v2693_v45 = vadd.f32 %v2692_v36, %v2675_v16  ;;  %v3934_v6 = vor.u32 %v4908_v35, %v3931_v29  ;;  %v4027_v16 = vld [vmem:[%s5922_s5 + $0x2b8] sm:$0xf0]  ;;  %v3886_v50 = vor.u32 %v4896_v41, %v3883_v44  ;;  %v4860_v35 = vld [vmem:[%s5922_s5 + $0x6c] sm:$0xf] }
 0x284   : > { %2947 = vmatpush.bf16.msrb.mxu0 %v4250_v57  ;;  %v3915_v57 = vld [vmem:[%s5922_s5 + $0x1d8] sm:$0xf0]  ;;  %v4030_v36 = vor.u32 %v4932_v10, %v4027_v16  ;;  %v4884_v28 = vld [vmem:[%s5922_s5 + $0x12c] sm:$0xf] }
 0x285   : > { %2960 = vmatpush.bf16.msrb.mxu1 %v4378_v49  ;;  %v2706_v52 = vadd.f32 %v2705_v46, %v2693_v45  ;;  %v4043_v49 = vld [vmem:[%s5922_s5 + $0x2d8] sm:$0xf0]  ;;  %v3918_v21 = vor.u32 %v4904_v1, %v3915_v57  ;;  %v4928_v45 = vld [vmem:[%s5922_s5 + $0x28c] sm:$0xf] }
 0x286   : > { %2973 = vmatpush.bf16.msrb.mxu2 %v4506_v13  ;;  %v4046_v26 = vor.u32 %v4936_v12, %v4043_v49  ;;  %v4011_v46 = vld [vmem:[%s5922_s5 + $0x298] sm:$0xf0]  ;;  %v4920_v57 = vld [vmem:[%s5922_s5 + $0x24c] sm:$0xf] }
 0x287   : > { %2986 = vmatpush.bf16.msrb.mxu3 %v4634_v19  ;;  %v2707_v19 = vpop.f32.mrf.mxu1  ;;  %v4139_v55 = vld [vmem:[%s5922_s5 + $0x398] sm:$0xf0]  ;;  %v4014_v51 = vor.u32 %v4928_v45, %v4011_v46  ;;  %v4916_v16 = vld [vmem:[%s5922_s5 + $0x22c] sm:$0xf] }
 0x288   : > { %2948 = vmatpush.bf16.msrb.mxu0 %v4234_v27  ;;  %v3771_v27 = vld [vmem:[%s5922_s5 + $0xb8] sm:$0xf0]  ;;  %v4948_v24 = vld [vmem:[%s5922_s5 + $0x32c] sm:$0xf] }
 0x289   : > { %2961 = vmatpush.bf16.msrb.mxu1 %v4362_v43  ;;  %v2718_v61 = vpop.f32.mrf.mxu2  ;;  %v6575_v43 = vld [vmem:[#allocation1 + $0x36] sm:$0xff]  ;;  %v3995_v38 = vld [vmem:[%s5922_s5 + $0x278] sm:$0xf0]  ;;  %v4848_v31 = vld [vmem:[%s5922_s5 + $0xc] sm:$0xf] }
 0x28a   : > { %2974 = vmatpush.bf16.msrb.mxu2 %v4490_v2  ;;  %v2719_v3 = vadd.f32 %v2718_v61, %v2706_v52  ;;  %v2694_v14 = vpop.f32.mrf.mxu0  ;;  %v4174_v2 = vor.u32 %v4968_v33, %v4171_v15  ;;  %v3739_v52 = vld [vmem:[%s5922_s5 + $0x78] sm:$0xf0] }
 0x28b   : > { %2987 = vmatpush.bf16.msrb.mxu3 %v4618_v17  ;;  %v6581_v17 = vld [vmem:[#allocation1 + $0x24] sm:$0xff]  ;;  %v4123_v61 = vld [vmem:[%s5922_s5 + $0x378] sm:$0xf0]  ;;  %v4952_v14 = vld [vmem:[%s5922_s5 + $0x34c] sm:$0xf] }
 0x28c   : > { %2949 = vmatpush.bf16.msrb.mxu0 %v4218_v18  ;;  %v2732_v13 = vadd.f32 %v2731_v5, %v2719_v3  ;;  %v3774_v18 = vor.u32 %v4868_v62, %v3771_v27  ;;  %v4126_v1 = vor.u32 %v4956_v60, %v4123_v61  ;;  %v3979_v12 = vld [vmem:[%s5922_s5 + $0x258] sm:$0xf0]  ;;  %v4852_v62 = vld [vmem:[%s5922_s5 + $0x2c] sm:$0xf] }
 0x28d   : > { %2962 = vmatpush.bf16.msrb.mxu1 %v4346_v53  ;;  %v4864_v53 = vld [vmem:[%s5922_s5 + $0x8c] sm:$0xf]  ;;  %v4107_v33 = vld [vmem:[%s5922_s5 + $0x358] sm:$0xf0] }
 0x28e   : > { %2975 = vmatpush.bf16.msrb.mxu2 %v4474_v40  ;;  %v3755_v40 = vld [vmem:[%s5922_s5 + $0x98] sm:$0xf0]  ;;  %v4110_v4 = vor.u32 %v4952_v14, %v4107_v33  ;;  %v5028_v33 = vld [vmem:[%s5922_s5 + $0x5ac] sm:$0xf] }
 0x28f   : > { %2988 = vmatpush.bf16.msrb.mxu3 %v4602_v39  ;;  %v4960_v39 = vld [vmem:[%s5922_s5 + $0x38c] sm:$0xf]  ;;  %v3758_v47 = vor.u32 %v4864_v53, %v3755_v40  ;;  %v3707_v27 = vld [vmem:[%s5922_s5 + $0x38] sm:$0xf0] }
 0x290   : > { %2950 = vmatpush.bf16.msrb.mxu0 %v4202_v54  ;;  %v4892_v54 = vld [vmem:[%s5922_s5 + $0x16c] sm:$0xf]  ;;  %v4142_v32 = vor.u32 %v4960_v39, %v4139_v55  ;;  %v3835_v10 = vld [vmem:[%s5922_s5 + $0x138] sm:$0xf0] }
 0x291   : > { %2963 = vmatpush.bf16.msrb.mxu1 %v4330_v56  ;;  %v2720_v25 = vpop.f32.mrf.mxu2  ;;  %v2757_v58 = vpop.f32.mrf.mxu1  ;;  %v3867_v56 = vld [vmem:[%s5922_s5 + $0x178] sm:$0xf0]  ;;  %v4880_v40 = vld [vmem:[%s5922_s5 + $0x10c] sm:$0xf] }
 0x292   : > { %2976 = vmatpush.bf16.msrb.mxu2 %v4458_v59  ;;  %v2744_v48 = vpop.f32.mrf.mxu0  ;;  %v4924_v59 = vld [vmem:[%s5922_s5 + $0x26c] sm:$0xf]  ;;  %v3870_v3 = vor.u32 %v4892_v54, %v3867_v56  ;;  %v3963_v23 = vld [vmem:[%s5922_s5 + $0x238] sm:$0xf0] }
 0x293   : > { %2989 = vmatpush.bf16.msrb.mxu3 %v4586_v63  ;;  %2951 = vmatmul.bf16.vlgmr.msrb.gmra.mxu0 %v6581_v17  ;;  %v2745_v29 = vadd.f32 %v2744_v48, %v2732_v13  ;;  %v3998_v5 = vor.u32 %v4924_v59, %v3995_v38  ;;  %v4091_v25 = vld [vmem:[%s5922_s5 + $0x338] sm:$0xf0]  ;;  %v3966_v53 = vor.u32 %v4916_v16, %v3963_v23  ;;  %v4944_v39 = vld [vmem:[%s5922_s5 + $0x30c] sm:$0xf] }
 0x294   : > { %2995 = vmatpush.bf16.msra.mxu0 %v3806_v0  ;;  %2964 = vmatmul.bf16.vlgmr.msrb.gmra.mxu1 %v6589_v30  ;;  %v3742_v0 = vor.u32 %v4860_v35, %v3739_v52  ;;  %v3819_v41 = vld [vmem:[%s5922_s5 + $0x118] sm:$0xf0]  ;;  %v4094_v45 = vor.u32 %v4948_v24, %v4091_v25  ;;  %v5004_v48 = vld [vmem:[%s5922_s5 + $0x4ec] sm:$0xf] }
 0x295   : > { %3008 = vmatpush.bf16.msra.mxu1 %v3934_v6  ;;  %2977 = vmatmul.bf16.vlgmr.msrb.gmra.mxu2 %v6575_v43  ;;  %v2758_v63 = vadd.f32 %v2757_v58, %v2745_v29  ;;  %v4856_v6 = vld [vmem:[%s5922_s5 + $0x4c] sm:$0xf]  ;;  %v3947_v46 = vld [vmem:[%s5922_s5 + $0x218] sm:$0xf0]  ;;  %v3822_v58 = vor.u32 %v4880_v40, %v3819_v41 }
 0x296   : > { %3021 = vmatpush.bf16.msra.mxu2 %v4062_v7  ;;  %2990 = vmatmul.bf16.vlgmr.msrb.gmra.mxu3 %v6584_v22  ;;  %v3723_v7 = vld [vmem:[%s5922_s5 + $0x58] sm:$0xf0]  ;;  %v5068_v54 = vld [vmem:[%s5922_s5 + $0x6ec] sm:$0xf] }
 0x297   : > { %3034 = vmatpush.bf16.msra.mxu3 %v4190_v11  ;;  %v3851_v11 = vld [vmem:[%s5922_s5 + $0x158] sm:$0xf0]  ;;  %v3726_v15 = vor.u32 %v4856_v6, %v3723_v7  ;;  %v5100_v56 = vld [vmem:[%s5922_s5 + $0x7ec] sm:$0xf] }
 0x298   : > { %2996 = vmatpush.bf16.msra.mxu0 %v3790_v20  ;;  %v4075_v55 = vld [vmem:[%s5922_s5 + $0x318] sm:$0xf0]  ;;  %v4992_v25 = vld [vmem:[%s5922_s5 + $0x48c] sm:$0xf] }
 0x299   : > { %3009 = vmatpush.bf16.msra.mxu1 %v3918_v21  ;;  %v2783_v13 = vpop.f32.mrf.mxu3  ;;  %v3854_v21 = vor.u32 %v4888_v8, %v3851_v11  ;;  %v4443_v52 = vld [vmem:[%s5922_s5 + $0x5f8] sm:$0xf0]  ;;  %v4078_v38 = vor.u32 %v4944_v39, %v4075_v55  ;;  %v5064_v8 = vld [vmem:[%s5922_s5 + $0x6cc] sm:$0xf] }
 0x29a   : > { %3022 = vmatpush.bf16.msra.mxu2 %v4046_v26  ;;  %v2770_v9 = vpop.f32.mrf.mxu2  ;;  %v2746_v20 = vpop.f32.mrf.mxu0  ;;  %v3982_v26 = vor.u32 %v4920_v57, %v3979_v12  ;;  %v4571_v29 = vld [vmem:[%s5922_s5 + $0x6f8] sm:$0xf0]  ;;  %v5088_v41 = vld [vmem:[%s5922_s5 + $0x78c] sm:$0xf] }
 0x29b   : > { %3035 = vmatpush.bf16.msra.mxu3 %v4174_v2  ;;  %v2771_v49 = vadd.f32 %v2770_v9, %v2758_v63  ;;  %v2759_v2 = vpop.f32.mrf.mxu1  ;;  %v4699_v59 = vld [vmem:[%s5922_s5 + $0x7f8] sm:$0xf0]  ;;  %v4574_v63 = vor.u32 %v5068_v54, %v4571_v29  ;;  %v4988_v55 = vld [vmem:[%s5922_s5 + $0x46c] sm:$0xf] }
 0x29c   : > { %2997 = vmatpush.bf16.msra.mxu0 %v3774_v18  ;;  %v3710_v18 = vor.u32 %v4852_v62, %v3707_v27  ;;  %v4702_v6 = vor.u32 %v5100_v56, %v4699_v59  ;;  %v4427_v7 = vld [vmem:[%s5922_s5 + $0x5d8] sm:$0xf0]  ;;  %v5092_v27 = vld [vmem:[%s5922_s5 + $0x7ac] sm:$0xf] }
 0x29d   : > { %3010 = vmatpush.bf16.msra.mxu1 %v3902_v34  ;;  %v6616_v19 = vadd.f32 %v2783_v13, %v2771_v49  ;;  %v3691_v34 = vld [vmem:[%s5922_s5 + $0x18] sm:$0xf0]  ;;  %v4996_v13 = vld [vmem:[%s5922_s5 + $0x4ac] sm:$0xf] }
 0x29e   : > { %3023 = vmatpush.bf16.msra.mxu2 %v4030_v36  ;;  %v3838_v36 = vor.u32 %v4884_v28, %v3835_v10  ;;  %v3694_v35 = vor.u32 %v4848_v31, %v3691_v34  ;;  %v4555_v9 = vld [vmem:[%s5922_s5 + $0x6d8] sm:$0xf0]  ;;  %v5280_v2 = vld [vmem:[#allocation1] sm:$0xff] }
 0x29f   : > { %3036 = vmatpush.bf16.msra.mxu3 %v4158_v42  ;;  %v4912_v42 = vld [vmem:[%s5922_s5 + $0x20c] sm:$0xf]  ;;  %v4683_v11 = vld [vmem:[%s5922_s5 + $0x7d8] sm:$0xf0]  ;;  %v4558_v49 = vor.u32 %v5064_v8, %v4555_v9 }
 0x2a0   : > { %2998 = vmatpush.bf16.msra.mxu0 %v3758_v47  ;;  %v4283_v14 = vld [vmem:[%s5922_s5 + $0x4b8] sm:$0xf0]  ;;  %v5024_v31 = vld [vmem:[%s5922_s5 + $0x58c] sm:$0xf] }
 0x2a1   : > { %3011 = vmatpush.bf16.msra.mxu1 %v3886_v50  ;;  %v2785_v47 = vpop.f32.mrf.mxu3  ;;  %v4315_v50 = vld [vmem:[%s5922_s5 + $0x4f8] sm:$0xf0]  ;;  %v4286_v10 = vor.u32 %v4996_v13, %v4283_v14  ;;  %v5084_v29 = vld [vmem:[%s5922_s5 + $0x76c] sm:$0xf] }
 0x2a2   : > { %3024 = vmatpush.bf16.msra.mxu2 %v4014_v51  ;;  %v2772_v44 = vpop.f32.mrf.mxu2  ;;  %v5036_v51 = vld [vmem:[%s5922_s5 + $0x5ec] sm:$0xf]  ;;  %v4318_v60 = vor.u32 %v5004_v48, %v4315_v50  ;;  %v5279_v20 = vld [vmem:[#allocation1 + $0x12] sm:$0xff]  ;;  %v5282_v16 = vld [vmem:[#allocation1 + $0x9] sm:$0xff] }
 0x2a3   : > { %3037 = vmatpush.bf16.msra.mxu3 %v4142_v32  ;;  %v3950_v32 = vor.u32 %v4912_v42, %v3947_v46  ;;  %v4446_v61 = vor.u32 %v5036_v51, %v4443_v52  ;;  %v4539_v62 = vld [vmem:[%s5922_s5 + $0x6b8] sm:$0xf0]  ;;  %v5020_v48 = vld [vmem:[%s5922_s5 + $0x56c] sm:$0xf] }
 0x2a4   : > { %2999 = vmatpush.bf16.msra.mxu0 %v3742_v0  ;;  %v5000_v0 = vld [vmem:[%s5922_s5 + $0x4cc] sm:$0xf]  ;;  %v4667_v28 = vld [vmem:[%s5922_s5 + $0x7b8] sm:$0xf0] }
 0x2a5   : > { %3012 = vmatpush.bf16.msra.mxu1 %v3870_v3  ;;  %v4299_v3 = vld [vmem:[%s5922_s5 + $0x4d8] sm:$0xf0]  ;;  %v4670_v34 = vor.u32 %v5092_v27, %v4667_v28  ;;  %v5052_v52 = vld [vmem:[%s5922_s5 + $0x66c] sm:$0xf]  ;;  %v2676_v28 = vperm.slane %v6535_v37, 1 }
 0x2a6   : > { %3025 = vmatpush.bf16.msra.mxu2 %v3998_v5  ;;  %v5032_v5 = vld [vmem:[%s5922_s5 + $0x5cc] sm:$0xf]  ;;  %v4302_v57 = vor.u32 %v5000_v0, %v4299_v3  ;;  %v4523_v40 = vld [vmem:[%s5922_s5 + $0x698] sm:$0xf0] }
 0x2a7   : > { %3038 = vmatpush.bf16.msra.mxu3 %v4126_v1  ;;  %v5096_v1 = vld [vmem:[%s5922_s5 + $0x7cc] sm:$0xf]  ;;  %v4430_v12 = vor.u32 %v5032_v5, %v4427_v7  ;;  %v4651_v42 = vld [vmem:[%s5922_s5 + $0x798] sm:$0xf0] }
 0x2a8   : > { %3000 = vmatpush.bf16.msra.mxu0 %v3726_v15  ;;  %v4686_v15 = vor.u32 %v5096_v1, %v4683_v11  ;;  %v4251_v47 = vld [vmem:[%s5922_s5 + $0x478] sm:$0xf0]  ;;  %v4654_v51 = vor.u32 %v5088_v41, %v4651_v42  ;;  %v5048_v5 = vld [vmem:[%s5922_s5 + $0x64c] sm:$0xf] }
 0x2a9   : > { %3013 = vmatpush.bf16.msra.mxu1 %v3854_v21  ;;  %v4411_v21 = vld [vmem:[%s5922_s5 + $0x5b8] sm:$0xf0]  ;;  %v5080_v8 = vld [vmem:[%s5922_s5 + $0x74c] sm:$0xf] }
 0x2aa   : > { %3026 = vmatpush.bf16.msra.mxu2 %v3982_v26  ;;  %v5060_v26 = vld [vmem:[%s5922_s5 + $0x6ac] sm:$0xf]  ;;  %v4414_v23 = vor.u32 %v5028_v33, %v4411_v21  ;;  %v4507_v54 = vld [vmem:[%s5922_s5 + $0x678] sm:$0xf0] }
 0x2ab   : > { %3039 = vmatpush.bf16.msra.mxu3 %v4110_v4  ;;  %v5281_v4 = vld [vmem:[#allocation1 + $0x1b] sm:$0xff]  ;;  %v4542_v24 = vor.u32 %v5060_v26, %v4539_v62  ;;  %v4510_v59 = vor.u32 %v5052_v52, %v4507_v54  ;;  %v4363_v3 = vld [vmem:[%s5922_s5 + $0x558] sm:$0xf0] }
 0x2ac   : > { %3001 = vmatpush.bf16.msra.mxu0 %v3710_v18  ;;  %v4267_v18 = vld [vmem:[%s5922_s5 + $0x498] sm:$0xf0]  ;;  %v5012_v14 = vld [vmem:[%s5922_s5 + $0x52c] sm:$0xf] }
 0x2ad   : > { %3014 = vmatpush.bf16.msra.mxu1 %v3838_v36  ;;  %v4395_v36 = vld [vmem:[%s5922_s5 + $0x598] sm:$0xf0]  ;;  %v4270_v44 = vor.u32 %v4992_v25, %v4267_v18  ;;  %v5044_v21 = vld [vmem:[%s5922_s5 + $0x62c] sm:$0xf] }
 0x2ae   : > { %3027 = vmatpush.bf16.msra.mxu2 %v3966_v53  ;;  %v5056_v53 = vld [vmem:[%s5922_s5 + $0x68c] sm:$0xf]  ;;  %v4398_v46 = vor.u32 %v5024_v31, %v4395_v36  ;;  %v4619_v9 = vld [vmem:[%s5922_s5 + $0x758] sm:$0xf0] }
 0x2af   : > { %3040 = vmatpush.bf16.msra.mxu3 %v4094_v45  ;;  %v4526_v39 = vor.u32 %v5056_v53, %v4523_v40  ;;  %v4219_v13 = vld [vmem:[%s5922_s5 + $0x438] sm:$0xf0]  ;;  %v5076_v62 = vld [vmem:[%s5922_s5 + $0x72c] sm:$0xf] }
 0x2b0   : > { %3002 = vmatpush.bf16.msra.mxu0 %v3694_v35  ;;  %v6666_v45 = vpop.f32.mrf.mxu0  ;;  %v4379_v35 = vld [vmem:[%s5922_s5 + $0x578] sm:$0xf0]  ;;  %v5072_v40 = vld [vmem:[%s5922_s5 + $0x70c] sm:$0xf] }
 0x2b1   : > { %3015 = vmatpush.bf16.msra.mxu1 %v3822_v58  ;;  %v6671_v50 = vpop.f32.mrf.mxu1  ;;  %v4635_v58 = vld [vmem:[%s5922_s5 + $0x778] sm:$0xf0]  ;;  %v4382_v56 = vor.u32 %v5020_v48, %v4379_v35  ;;  %v2797_v42 = vadd.f32 %v6666_v45, %v2676_v28  ;;  %v5118_v48 = vld [vmem:[%s5939_s14 + $0x78] sm:$0xff] }
 0x2b2   : > { %3028 = vmatpush.bf16.msra.mxu2 %v3950_v32  ;;  %v4254_v32 = vor.u32 %v4988_v55, %v4251_v47  ;;  %v4638_v0 = vor.u32 %v5084_v29, %v4635_v58  ;;  %v4475_v26 = vld [vmem:[%s5922_s5 + $0x638] sm:$0xf0]  ;;  %v5110_v47 = vld [vmem:[%s5939_s14 + $0x38] sm:$0xff]  ;;  %v5107_v58 = vld [vmem:[%s5939_s14 + $0x20] sm:$0xff] }
 0x2b3   : > { %3041 = vmatpush.bf16.msra.mxu3 %v4078_v38  ;;  %3003 = vmatmul.bf16.vlgmr.msra.gmra.mxu0 %v5280_v2  ;;  %v4984_v38 = vld [vmem:[%s5922_s5 + $0x44c] sm:$0xf]  ;;  %v4603_v27 = vld [vmem:[%s5922_s5 + $0x738] sm:$0xf0] }
 0x2b4   : > { %3047 = vmatpush.bf16.msrb.mxu0 %v4318_v60  ;;  %3016 = vmatmul.bf16.vlgmr.msra.gmra.mxu1 %v5282_v16  ;;  %v4235_v60 = vld [vmem:[%s5922_s5 + $0x458] sm:$0xf0]  ;;  %v4976_v16 = vld [vmem:[%s5922_s5 + $0x40c] sm:$0xf]  ;;  %v4606_v18 = vor.u32 %v5076_v62, %v4603_v27 }
 0x2b5   : > { %3060 = vmatpush.bf16.msrb.mxu1 %v4446_v61  ;;  %3029 = vmatmul.bf16.vlgmr.msra.gmra.mxu2 %v5279_v20  ;;  %v5016_v61 = vld [vmem:[%s5922_s5 + $0x54c] sm:$0xf]  ;;  %v4238_v1 = vor.u32 %v4984_v38, %v4235_v60  ;;  %v4347_v20 = vld [vmem:[%s5922_s5 + $0x538] sm:$0xf0] }
 0x2b6   : > { %3073 = vmatpush.bf16.msrb.mxu2 %v4574_v63  ;;  %3042 = vmatmul.bf16.vlgmr.msra.gmra.mxu3 %v5281_v4  ;;  %v4350_v4 = vor.u32 %v5012_v14, %v4347_v20  ;;  %v4331_v31 = vld [vmem:[%s5922_s5 + $0x518] sm:$0xf0]  ;;  %v5126_v35 = vld [vmem:[%s5939_s14 + $0xb8] sm:$0xff]  ;;  %v5111_v20 = vld [vmem:[%s5939_s14 + $0x40] sm:$0xff] }
 0x2b7   : > { %3086 = vmatpush.bf16.msrb.mxu3 %v4702_v6  ;;  %v4491_v6 = vld [vmem:[%s5922_s5 + $0x658] sm:$0xf0]  ;;  %v5114_v60 = vld [vmem:[%s5939_s14 + $0x58] sm:$0xff] }
 0x2b8   : > { %3048 = vmatpush.bf16.msrb.mxu0 %v4302_v57  ;;  %v6681_v63 = vpop.f32.mrf.mxu2  ;;  %v2798_v11 = vpop.f32.mrf.mxu0  ;;  %v4366_v57 = vor.u32 %v5016_v61, %v4363_v3  ;;  %v4459_v36 = vld [vmem:[%s5922_s5 + $0x618] sm:$0xf0] }
 0x2b9   : > { %3061 = vmatpush.bf16.msrb.mxu1 %v4430_v12  ;;  %v6686_v7 = vpop.f32.mrf.mxu3  ;;  %v4494_v12 = vor.u32 %v5048_v5, %v4491_v6  ;;  %v2811_v33 = vpop.f32.mrf.mxu1  ;;  %v4587_v41 = vld [vmem:[%s5922_s5 + $0x718] sm:$0xf0] }
 0x2ba   : > { %3074 = vmatpush.bf16.msrb.mxu2 %v4558_v49  ;;  %v4980_v49 = vld [vmem:[%s5922_s5 + $0x42c] sm:$0xf]  ;;  %v4590_v55 = vor.u32 %v5072_v40, %v4587_v41  ;;  %v5109_v45 = vld [vmem:[%s5939_s14 + $0x30] sm:$0xff]  ;;  %v5104_v11 = vld [vmem:[%s5939_s14 + $0x8] sm:$0xff] }
 0x2bb   : > { %3087 = vmatpush.bf16.msrb.mxu3 %v4686_v15  ;;  %v4622_v15 = vor.u32 %v5080_v8, %v4619_v9  ;;  %v4222_v2 = vor.u32 %v4980_v49, %v4219_v13  ;;  %v5117_v52 = vld [vmem:[%s5939_s14 + $0x70] sm:$0xff]  ;;  %v5103_v33 = vld [vmem:[%s5939_s14] sm:$0xff] }
 0x2bc   : > { %3049 = vmatpush.bf16.msrb.mxu0 %v4286_v10  ;;  %v4478_v10 = vor.u32 %v5044_v21, %v4475_v26  ;;  %v5105_v3 = vld [vmem:[%s5939_s14 + $0x10] sm:$0xff] }
 0x2bd   : > { %3062 = vmatpush.bf16.msrb.mxu1 %v4414_v23  ;;  %v4203_v23 = vld [vmem:[%s5922_s5 + $0x418] sm:$0xf0] }
 0x2be   : > { %3075 = vmatpush.bf16.msrb.mxu2 %v4542_v24  ;;  %v5008_v24 = vld [vmem:[%s5922_s5 + $0x50c] sm:$0xf]  ;;  %v5113_v8 = vld [vmem:[%s5939_s14 + $0x50] sm:$0xff] }
 0x2bf   : > { %3088 = vmatpush.bf16.msrb.mxu3 %v4670_v34  ;;  %v5040_v34 = vld [vmem:[%s5922_s5 + $0x60c] sm:$0xf]  ;;  %v5121_v28 = vld [vmem:[%s5939_s14 + $0x90] sm:$0xff] }
 0x2c0   : > { %3050 = vmatpush.bf16.msrb.mxu0 %v4270_v44  ;;  %v2824_v25 = vpop.f32.mrf.mxu2  ;;  %v4206_v44 = vor.u32 %v4976_v16, %v4203_v23 }
 0x2c1   : > { %3063 = vmatpush.bf16.msrb.mxu1 %v4398_v46  ;;  %v2837_v53 = vpop.f32.mrf.mxu3  ;;  %v4334_v46 = vor.u32 %v5008_v24, %v4331_v31  ;;  %v2677_v24 = vperm.slane %v6535_v37, 2 }
 0x2c2   : > { %3076 = vmatpush.bf16.msrb.mxu2 %v4526_v39  ;;  %v4462_v39 = vor.u32 %v5040_v34, %v4459_v36 }
 0x2c3   : > { %3089 = vmatpush.bf16.msrb.mxu3 %v4654_v51  ;;  %v2810_v51 = vadd.f32 %v6671_v50, %v2797_v42  ;;  %v5108_v50 = vld [vmem:[%s5939_s14 + $0x28] sm:$0xff] }
 0x2c4   : > { %3051 = vmatpush.bf16.msrb.mxu0 %v4254_v32 }
 0x2c5   : > { %3064 = vmatpush.bf16.msrb.mxu1 %v4382_v56  ;;  %v2823_v54 = vadd.f32 %v6681_v63, %v2810_v51 }
 0x2c6   : > { %3077 = vmatpush.bf16.msrb.mxu2 %v4510_v59  ;;  %v5106_v59 = vld [vmem:[%s5939_s14 + $0x18] sm:$0xff] }
 0x2c7   : > { %3090 = vmatpush.bf16.msrb.mxu3 %v4638_v0  ;;  %v2836_v29 = vadd.f32 %v6686_v7, %v2823_v54  ;;  %v5124_v0 = vld [vmem:[%s5939_s14 + $0xa8] sm:$0xff]  ;;  %v5123_v7 = vld [vmem:[%s5939_s14 + $0xa0] sm:$0xff] }
 0x2c8   : > { %3052 = vmatpush.bf16.msrb.mxu0 %v4238_v1 }
 0x2c9   : > { %3065 = vmatpush.bf16.msrb.mxu1 %v4366_v57  ;;  %v5122_v57 = vld [vmem:[%s5939_s14 + $0x98] sm:$0xff] }
 0x2ca   : > { %3078 = vmatpush.bf16.msrb.mxu2 %v4494_v12  ;;  %v5112_v12 = vld [vmem:[%s5939_s14 + $0x48] sm:$0xff] }
 0x2cb   : > { %3091 = vmatpush.bf16.msrb.mxu3 %v4622_v15  ;;  %v3099_v15 = vmax.f32 %v6616_v19, 0.0  ;;  %v5119_v19 = vld [vmem:[%s5939_s14 + $0x80] sm:$0xff] }
 0x2cc   : > { %3053 = vmatpush.bf16.msrb.mxu0 %v4222_v2 }
 0x2cd   : > { %3066 = vmatpush.bf16.msrb.mxu1 %v4350_v4  ;;  %v3104_v26 = vpack.c.bf16 %v3099_v15, %v3099_v15 }
 0x2ce   : > { %3079 = vmatpush.bf16.msrb.mxu2 %v4478_v10  ;;  %v5120_v10 = vld [vmem:[%s5939_s14 + $0x88] sm:$0xff] }
 0x2cf   : > { %3092 = vmatpush.bf16.msrb.mxu3 %v4606_v18 }
 0x2d0   : > { %3054 = vmatpush.bf16.msrb.mxu0 %v4206_v44  ;;  %v2848_v32 = vpop.f32.mrf.mxu0 }
 0x2d1   : > { %3067 = vmatpush.bf16.msrb.mxu1 %v4334_v46  ;;  %v2849_v56 = vadd.f32 %v2848_v32, %v2836_v29  ;;  %v5130_v32 = vld [vmem:[%s5939_s14 + $0xd8] sm:$0xff] }
 0x2d2   : > { %3080 = vmatpush.bf16.msrb.mxu2 %v4462_v39 }
 0x2d3   : > { %3093 = vmatpush.bf16.msrb.mxu3 %v4590_v55  ;;  %3055 = vmatmul.bf16.vlgmr.msrb.gmra.mxu0 %v6581_v17  ;;  %v5116_v17 = vld [vmem:[%s5939_s14 + $0x68] sm:$0xff] }
 0x2d4   : > { %3364 = vmatpush.bf16.msra.mxu0 %v5110_v47  ;;  %3068 = vmatmul.bf16.vlgmr.msrb.gmra.mxu1 %v6589_v30  ;;  %v5115_v30 = vld [vmem:[%s5939_s14 + $0x60] sm:$0xff]  ;;  %v5134_v47 = vld [vmem:[%s5939_s14 + $0xf8] sm:$0xff] }
 0x2d5   : > { %3377 = vmatpush.bf16.msra.mxu1 %v5118_v48  ;;  %3081 = vmatmul.bf16.vlgmr.msrb.gmra.mxu2 %v6575_v43  ;;  %v2861_v43 = vpop.f32.mrf.mxu1 }
 0x2d6   : > { %3094 = vmatmul.bf16.vlgmr.msrb.gmra.mxu3 %v6584_v22  ;;  %3390 = vmatpush.bf16.msra.mxu2 %v5126_v35  ;;  %v5125_v22 = vld [vmem:[%s5939_s14 + $0xb0] sm:$0xff]  ;;  %v2862_v38 = vadd.f32 %v2861_v43, %v2849_v56 }
 0x2d7   : > { %3403 = vmatpush.bf16.msra.mxu3 %v5134_v47 }
 0x2d8   : > { %3365 = vmatpush.bf16.msra.mxu0 %v5109_v45  ;;  %v2874_v61 = vpop.f32.mrf.mxu2  ;;  %v2850_v6 = vpop.f32.mrf.mxu0  ;;  %v5133_v45 = vld [vmem:[%s5939_s14 + $0xf0] sm:$0xff] }
 0x2d9   : > { %3378 = vmatpush.bf16.msra.mxu1 %v5117_v52  ;;  %v2887_v63 = vpop.f32.mrf.mxu3  ;;  %v2875_v5 = vadd.f32 %v2874_v61, %v2862_v38  ;;  %v5127_v61 = vld [vmem:[%s5939_s14 + $0xc0] sm:$0xff] }
 0x2da   : > { %3391 = vmatpush.bf16.msra.mxu2 %v5125_v22  ;;  %v5128_v22 = vld [vmem:[%s5939_s14 + $0xc8] sm:$0xff] }
 0x2db   : > { %v2888_v1 = vadd.f32 %v2887_v63, %v2875_v5  ;;  %3404 = vmatpush.bf16.msra.mxu3 %v5133_v45 }
 0x2dc   : > { %3366 = vmatpush.bf16.msra.mxu0 %v5108_v50  ;;  %v5132_v50 = vld [vmem:[%s5939_s14 + $0xe8] sm:$0xff] }
 0x2dd   : > { %3379 = vmatpush.bf16.msra.mxu1 %v5116_v17  ;;  %v2863_v9 = vpop.f32.mrf.mxu1  ;;  %v3100_v14 = vmax.f32 %v2888_v1, 0.0 }
 0x2de   : > { %3392 = vmatpush.bf16.msra.mxu2 %v5124_v0  ;;  %v2678_v0 = vperm.slane %v6535_v37, 3 }
 0x2df   : > { %v3105_v21 = vpack.c.bf16 %v3100_v14, %v3100_v14  ;;  %3405 = vmatpush.bf16.msra.mxu3 %v5132_v50 }
 0x2e0   : > { %3367 = vmatpush.bf16.msra.mxu0 %v5107_v58  ;;  %v2876_v49 = vpop.f32.mrf.mxu2  ;;  %v5131_v58 = vld [vmem:[%s5939_s14 + $0xe0] sm:$0xff] }
 0x2e1   : > { %3380 = vmatpush.bf16.msra.mxu1 %v5115_v30  ;;  %v2889_v13 = vpop.f32.mrf.mxu3  ;;  %v5129_v30 = vld [vmem:[%s5939_s14 + $0xd0] sm:$0xff] }
 0x2e2   : > { %3393 = vmatpush.bf16.msra.mxu2 %v5123_v7 }
 0x2e3   : > { %3406 = vmatpush.bf16.msra.mxu3 %v5131_v58 }
 0x2e4   : > { %3368 = vmatpush.bf16.msra.mxu0 %v5106_v59 }
 0x2e5   : > { %3381 = vmatpush.bf16.msra.mxu1 %v5114_v60 }
 0x2e6   : > { %3394 = vmatpush.bf16.msra.mxu2 %v5122_v57 }
 0x2e7   : > { %3407 = vmatpush.bf16.msra.mxu3 %v5130_v32 }
 0x2e8   : > { %3369 = vmatpush.bf16.msra.mxu0 %v5105_v3 }
 0x2e9   : > { %3382 = vmatpush.bf16.msra.mxu1 %v5113_v8 }
 0x2ea   : > { %3395 = vmatpush.bf16.msra.mxu2 %v5121_v28 }
 0x2eb   : > { %3408 = vmatpush.bf16.msra.mxu3 %v5129_v30 }
 0x2ec   : > { %3370 = vmatpush.bf16.msra.mxu0 %v5104_v11 }
 0x2ed   : > { %3383 = vmatpush.bf16.msra.mxu1 %v5112_v12 }
 0x2ee   : > { %3396 = vmatpush.bf16.msra.mxu2 %v5120_v10 }
 0x2ef   : > { %3409 = vmatpush.bf16.msra.mxu3 %v5128_v22 }
 0x2f0   : > { %3371 = vmatpush.bf16.msra.mxu0 %v5103_v33  ;;  %v2900_v62 = vpop.f32.mrf.mxu0 }
 0x2f1   : > { %3384 = vmatpush.bf16.msra.mxu1 %v5111_v20  ;;  %v2913_v27 = vpop.f32.mrf.mxu1  ;;  %v2901_v31 = vadd.f32 %v2900_v62, %v2677_v24  ;;  %v3103_v24 = vld [vmem:[#allocation3] sm:$0x1] }
 0x2f2   : > { %3397 = vmatpush.bf16.msra.mxu2 %v5119_v19 }
 0x2f3   : > { %3372 = vmatmul.bf16.vlgmr.msra.gmra.mxu0 %v3104_v26  ;;  %v2914_v34 = vadd.f32 %v2913_v27, %v2901_v31  ;;  %3410 = vmatpush.bf16.msra.mxu3 %v5127_v61 }
 0x2f4   : > { %3385 = vmatmul.bf16.vlgmr.msra.gmra.mxu1 %v3105_v21 }
 0x2f8   : > { %v2926_v2 = vpop.f32.mrf.mxu2  ;;  %v2902_v16 = vpop.f32.mrf.mxu0 }
 0x2f9   : > { %v2939_v4 = vpop.f32.mrf.mxu3  ;;  %v2915_v23 = vpop.f32.mrf.mxu1  ;;  %v2927_v36 = vadd.f32 %v2926_v2, %v2914_v34 }
 0x2fb   : > { %v2940_v53 = vadd.f32 %v2939_v4, %v2927_v36 }
 0x300   : > { %v2928_v25 = vpop.f32.mrf.mxu2 }
 0x301   : > { %v2941_v18 = vpop.f32.mrf.mxu3 }
 0x310   : > { %v2952_v40 = vpop.f32.mrf.mxu0 }
 0x311   : > { %v2953_v41 = vadd.f32 %v2952_v40, %v2940_v53  ;;  %v2965_v42 = vpop.f32.mrf.mxu1 }
 0x313   : > { %v2966_v44 = vadd.f32 %v2965_v42, %v2953_v41 }
 0x318   : > { %v2978_v46 = vpop.f32.mrf.mxu2  ;;  %v2954_v51 = vpop.f32.mrf.mxu0 }
 0x319   : > { %v2979_v39 = vadd.f32 %v2978_v46, %v2966_v44  ;;  %v2991_v55 = vpop.f32.mrf.mxu3  ;;  %v2967_v35 = vpop.f32.mrf.mxu1 }
 0x31b   : > { %v2992_v48 = vadd.f32 %v2991_v55, %v2979_v39 }
 0x31d   : > { %v3101_v52 = vmax.f32 %v2992_v48, 0.0 }
 0x31f   : > { %v3106_v54 = vpack.c.bf16 %v3101_v52, %v3101_v52 }
 0x320   : > { %v2980_v29 = vpop.f32.mrf.mxu2 }
 0x321   : > { %3398 = vmatmul.bf16.vlgmr.msra.gmra.mxu2 %v3106_v54  ;;  %v2993_v17 = vpop.f32.mrf.mxu3 }
 0x330   : > { %v3004_v56 = vpop.f32.mrf.mxu0 }
 0x331   : > { %v3017_v43 = vpop.f32.mrf.mxu1  ;;  %v3005_v6 = vadd.f32 %v3004_v56, %v2678_v0 }
 0x333   : > { %v3018_v7 = vadd.f32 %v3017_v43, %v3005_v6 }
 0x338   : > { %v3030_v59 = vpop.f32.mrf.mxu2  ;;  %v3006_v60 = vpop.f32.mrf.mxu0 }
 0x339   : > { %v3043_v38 = vpop.f32.mrf.mxu3  ;;  %v3019_v63 = vpop.f32.mrf.mxu1  ;;  %v3031_v8 = vadd.f32 %v3030_v59, %v3018_v7 }
 0x33b   : > { %v3044_v9 = vadd.f32 %v3043_v38, %v3031_v8 }
 0x340   : > { %v3032_v3 = vpop.f32.mrf.mxu2 }
 0x341   : > { %v3045_v5 = vpop.f32.mrf.mxu3 }
 0x350   : > { %v3056_v1 = vpop.f32.mrf.mxu0 }
 0x351   : > { %v3069_v11 = vpop.f32.mrf.mxu1  ;;  %v3057_v57 = vadd.f32 %v3056_v1, %v3044_v9 }
 0x353   : > { %v3070_v12 = vadd.f32 %v3069_v11, %v3057_v57 }
 0x358   : > { %v3082_v49 = vpop.f32.mrf.mxu2  ;;  %v3058_v33 = vpop.f32.mrf.mxu0 }
 0x359   : > { %v3083_v13 = vadd.f32 %v3082_v49, %v3070_v12  ;;  %v3095_v14 = vpop.f32.mrf.mxu3  ;;  %v3071_v15 = vpop.f32.mrf.mxu1 }
 0x35b   : > { %v3096_v20 = vadd.f32 %v3095_v14, %v3083_v13 }
 0x35d   : > { %v3102_v21 = vmax.f32 %v3096_v20, 0.0 }
 0x35f   : > { %v3107_v26 = vpack.c.bf16 %v3102_v21, %v3102_v21 }
 0x360   : > { %v3084_v62 = vpop.f32.mrf.mxu2 }
 0x361   : > { %v3097_v37 = vpop.f32.mrf.mxu3  ;;  %3411 = vmatmul.bf16.vlgmr.msra.gmra.mxu3 %v3107_v26 }
 0x370   : > { %v3373_v27 = vpop.f32.mrf.mxu0 }
 0x371   : > { %v3386_v28 = vpop.f32.mrf.mxu1 }
 0x372   : > { %v3387_v2 = vadd.f32 %v3386_v28, %v3373_v27 }
 0x378   : > { %v3375_v4 = vpop.f32.mrf.mxu0 }
 0x379   : > { %v3388_v10 = vpop.f32.mrf.mxu1 }
 0x3a4   : > { %v3399_v16 = vpop.f32.mrf.mxu2 }
 0x3a5   : > { %v3400_v19 = vadd.f32 %v3399_v16, %v3387_v2 }
 0x3ac   : > { %v3401_v23 = vpop.f32.mrf.mxu2 }
 0x3e4   : > { %v3412_v25 = vpop.f32.mrf.mxu3 }
 0x3e5   : > { %v3413_v18 = vadd.f32 %v3412_v25, %v3400_v19 }
 0x3e7   : > { %v3416_v31 = vadd.f32 %v3413_v18, %v3103_v24 }
 0x3e8   : > { %3422 = sbr.rel (%p4831_p1) target bundleno = 1014 (0x3f6), region = 108 }
 0x3e9   : > { %3418 = vst.msk [vmem:[#allocation3] sm:$0x1] %vm3417_vm3, %v3416_v31 }
 0x3ec   : > { %v3414_v34 = vpop.f32.mrf.mxu3 }
 0x3ed   : > { %v3424_v53 = vld [vmem:[#allocation17] sm:$0x1] }
 0x3f0   : > { %v3423_v36 = vld [vmem:[#allocation3] sm:$0x1] }
 0x3f1   : > { %v3425_v40 = vadd.f32 %v3424_v53, %v3423_v36 }
 0x3f3   : > { %v3426_v41 = vmax.f32 %v3425_v40, 0.0 }
 0x3f5   : > { %3427 = vst.msk [vmem:[#allocation19] sm:$0x1] %vm3417_vm3, %v3426_v41 }
 0x3f6 PF: > { %p5219_p3 = scmp.eq.s32.totalorder %s5779_s28, 1  ;;  %s5688_s7 = smov [#allocation18]  }
 0x3f7   : > { %s3434_s3 = sshll.u32 %s5688_s7, 4  ;;  %s3436_s20 = sshll.u32 %s6794_s11, 4  ;;  %s3435_s3 = int_to_ptr.vmem [resolvable:$true] %s3434_s3  ;;  %s3437_s20 = int_to_ptr.hbm [resolvable:$true] %s3436_s20 }
 0x3f8   : > { %5168 = dma.vmem_to_hbm [thread:$0]  (%p5219_p3), %s3435_s3, 16, %s3437_s20, [#allocation6]  }
 0x3f9   : > { %s6843_s1 = sld [smem:[#allocation37_spill]]  ;;  %s5689_s29 = smov [#allocation19]  }
 0x3fa   : > { %s3446_s26 = sshll.u32 %s5689_s29, 4  ;;  %s3447_s26 = int_to_ptr.vmem [resolvable:$true] %s3446_s26 }
 0x3ff   : > { %s3448_s2 = sshll.u32 %s6843_s1, 4  ;;  %s3449_s2 = int_to_ptr.hbm [resolvable:$true] %s3448_s2 }
 0x400   : > { %5170 = dma.vmem_to_hbm [thread:$0]  (%p5219_p3), %s3447_s26, 16, %s3449_s2, [#allocation20]  }
 0x401   : > { %5650 = dma.done.wait (%p5219_p3), [#allocation6], 16  }
 0x402   : > { %5652 = vsyncadd (%p5219_p3), [#allocation6], 4294967280 }
 0x403   : > { %5654 = dma.done.wait (%p5219_p3), [#allocation20], 16  }
 0x404   : > { %5656 = vsyncadd (%p5219_p3), [#allocation20], 4294967280 }
 0x405 PF: > { %s6844_s24 = sld [smem:[#allocation29_spill]]  ;;  %s6846_s21 = smov %s5663_s22 }
 0x406   : > { %s6845_s30 = sld [smem:[#allocation30_spill]]  ;;  %s6847_s22 = smov %s5667_s23 }
 0x40b   : > { %p26_p12 = scmp.ge.s32.totalorder %s6844_s24, 4  }
 0x40c   : > { %s6848_s23 = smov %s6845_s30 }
 0x40d   :  { %28 = sbr.rel (!%p26_p12) target bundleno = 15 (0xf), region = 158 }
 0x412   :  { %3467 = vsyncpa [#allocation5], 1 }
 0x413   :  { %3469 = vsyncpa [#allocation5 + $0x1], 1 }
 0x414   :  { %3470 = vsyncpa [#allocation8], 1 }
 0x415   :  { %3471 = vsyncpa [#allocation11], 1 }
 0x416   :  { %3472 = vsyncpa [#allocation14], 1 }
 0x417   :  { %3473 = vsyncpa [#allocation6], 1 }
 0x418   :  { %3475 = vsyncpa [#allocation6 + $0x1], 1 }
 0x419   :  { %3476 = vsyncpa [#allocation20], 1 }

</bundles_post_ra>
